<compile_context>
chip_gen: v7x
topology: tpu7x:2x2x1
jax: 0.10.0
libtpu: 0.0.40
codegen_flags: <defaults>
</compile_context>

<pallas_src>
import functools

import jax
import jax.numpy as jnp
from jax.experimental import pallas as pl
from jax.experimental.pallas import tpu as pltpu

LANE = 128      # channel axis padded to a multiple of the 128-lane width
SUBLANE = 8     # padded image width Wp is a multiple of the sublane granularity


def _round_up(x, m):
    return (x + m - 1) // m * m


def _double_conv_kernel(x_ref, mask_ref, w1_ref, s1_ref, b1_ref,
                        w2_ref, s2_ref, b2_ref, o_ref,
                        y_ref, patch_ref, *, TH, Wp):
    """One (batch, H-strip) tile per grid step.

    x_ref    : (1, 1, (TH+4)*Wp, Cin)   strip (2-row halo each side), rows flattened
    mask_ref : (1, (TH+4)*Wp, 1)        1.0 inside the true image, 0.0 on padding
    w1_ref   : (9*Cin, Cout)            conv1 taps flattened along K (im2col order)
    s1/b1    : (1, Cout)                folded BN1 scale / bias
    w2_ref   : (9*Cout, Cout)           conv2 taps flattened along K
    s2/b2    : (1, Cout)                folded BN2 scale / bias
    o_ref    : (1, 1, TH*Wp, Cout)      TH output rows of this strip (full padded width)
    y_ref    : VMEM ((TH+4)*Wp, Cout)   conv1 intermediate (zero on padding)
    patch_ref: VMEM ((TH+4)*Wp, 9*Cmax) shared im2col patch for both convs
    """
    SR = TH + 4
    n_rows = SR * Wp
    Cin = x_ref.shape[-1]
    Cout = o_ref.shape[-1]

    def build_patch(src, c):
        # im2col: column block k = 3*dh + dw holds src shifted by (dh-1) rows and
        # (dw-1) cols, realized as one static roll (XLU) of the flattened strip.
        # All column blocks are 128-aligned, so the stores are plain full-lane vst.
        for dh in range(3):
            for dw in range(3):
                k = 3 * dh + dw
                shift = ((1 - dh) * Wp + (1 - dw)) % n_rows
                shifted = src if shift == 0 else pltpu.roll(src, shift, axis=0)
                patch_ref[:, k * c:(k + 1) * c] = shifted

    mask = mask_ref[0]                                   # ((TH+4)*Wp, 1)

    # ---- conv1 as a single deep-K matmul, then folded BN + ReLU + padding mask ----
    build_patch(x_ref[...].reshape(n_rows, Cin), Cin)
    acc1 = jnp.dot(patch_ref[:, :9 * Cin], w1_ref[...],
                   preferred_element_type=jnp.float32)
    y_ref[...] = jnp.maximum(acc1 * s1_ref[...] + b1_ref[...], 0.0) * mask

    # ---- conv2 on the (mask-zero-padded) intermediate ----
    build_patch(y_ref[...], Cout)
    # Only the TH stored rows (local rows [2, TH+2)) are matmul'ed; the row slice
    # starts at 2*Wp, which is sublane-aligned because Wp % 8 == 0.
    acc2 = jnp.dot(patch_ref[2 * Wp:(TH + 2) * Wp, :9 * Cout], w2_ref[...],
                   preferred_element_type=jnp.float32)
    out = jnp.maximum(acc2 * s2_ref[...] + b2_ref[...], 0.0)
    o_ref[...] = out.reshape(o_ref.shape).astype(o_ref.dtype)


def double_conv(x_nchw, params, eps=1e-5, tile_h=8):
    """Pallas-backed DoubleConv forward. x_nchw: (N, Cin, H, W) f32 -> (N, Cout, H, W)."""
    (w1, g1, be1, m1, v1, w2, g2, be2, m2, v2) = params
    N, Cin, H, W = x_nchw.shape
    Cout = w1.shape[0]

    Cin_p = _round_up(Cin, LANE)
    Cout_p = _round_up(Cout, LANE)
    cmax = max(Cin_p, Cout_p)
    TH = max(1, min(tile_h, H))
    H_t = _round_up(H, TH)
    nS = H_t // TH
    SR = TH + 4
    Wp = _round_up(W + 2, SUBLANE)
    f32 = jnp.float32

    # Fold eval-mode BatchNorm into per-channel scale / bias, zero-padded to lane width.
    def padc(v):
        return jnp.pad(v.astype(f32), (0, Cout_p - Cout)).reshape(1, Cout_p)
    inv1 = g1 / jnp.sqrt(v1 + eps)
    inv2 = g2 / jnp.sqrt(v2 + eps)
    s1, b1 = padc(inv1), padc(be1 - m1 * inv1)
    s2, b2 = padc(inv2), padc(be2 - m2 * inv2)

    # NCHW -> NHWC; zero-pad: 2 halo rows top / 2+(H_t-H) bottom, 1 col left,
    # Wp-W-1 cols right, channels up to the lane multiple.
    x = jnp.transpose(x_nchw, (0, 2, 3, 1)).astype(f32)
    xp = jnp.pad(x, ((0, 0), (2, 2 + H_t - H), (1, Wp - W - 1), (0, Cin_p - Cin)))
    # Overlapping H-strips (TH + 4 rows, stride TH), rows flattened row-major so all
    # in-kernel reshapes are views.  (Small halo duplication in HBM; the fully general
    # alternative is a manual pl.ANY + make_async_copy halo DMA.)
    strips = jnp.stack([xp[:, s * TH:s * TH + SR] for s in range(nS)], axis=1)
    strips = strips.reshape(N, nS, SR * Wp, Cin_p)

    # Per-strip validity mask: 1.0 where the padded-grid position lies in the true image.
    ss = jnp.arange(nS)[:, None, None]
    uu = jnp.arange(SR)[None, :, None]
    cc = jnp.arange(Wp)[None, None, :]
    rr = ss * TH + uu
    mask = ((rr >= 2) & (rr < H + 2) & (cc >= 1) & (cc < W + 1))
    mask = mask.astype(f32).reshape(nS, SR * Wp, 1)

    # OIHW -> HWIO, zero-pad channels, flatten the 9 taps into one (9*Cin_p, Cout_p)
    # matrix matching the kernel's im2col column ordering (k = 3*dh + dw).
    def prep_w(w, ci, ci_p):
        w = jnp.transpose(w, (2, 3, 1, 0)).astype(f32)            # (3, 3, ci, co)
        w = jnp.pad(w, ((0, 0), (0, 0), (0, ci_p - ci), (0, Cout_p - Cout)))
        return w.reshape(9 * ci_p, Cout_p)
    w1_mat = prep_w(w1, Cin, Cin_p)
    w2_mat = prep_w(w2, Cout, Cout_p)

    kernel = functools.partial(_double_conv_kernel, TH=TH, Wp=Wp)
    out = pl.pallas_call(
        kernel,
        out_shape=jax.ShapeDtypeStruct((N, nS, TH * Wp, Cout_p), f32),
        grid_spec=pltpu.PrefetchScalarGridSpec(
            num_scalar_prefetch=0,
            grid=(N, nS),
            in_specs=[
                pl.BlockSpec((1, 1, SR * Wp, Cin_p), lambda n, s: (n, s, 0, 0)),
                pl.BlockSpec((1, SR * Wp, 1), lambda n, s: (s, 0, 0)),
                pl.BlockSpec((9 * Cin_p, Cout_p), lambda n, s: (0, 0)),
                pl.BlockSpec((1, Cout_p), lambda n, s: (0, 0)),
                pl.BlockSpec((1, Cout_p), lambda n, s: (0, 0)),
                pl.BlockSpec((9 * Cout_p, Cout_p), lambda n, s: (0, 0)),
                pl.BlockSpec((1, Cout_p), lambda n, s: (0, 0)),
                pl.BlockSpec((1, Cout_p), lambda n, s: (0, 0)),
            ],
            out_specs=pl.BlockSpec((1, 1, TH * Wp, Cout_p),
                                   lambda n, s: (n, s, 0, 0)),
            scratch_shapes=[
                pltpu.VMEM((SR * Wp, Cout_p), f32),       # conv1 intermediate
                pltpu.VMEM((SR * Wp, 9 * cmax), f32),     # shared im2col patch
            ],
        ),
        compiler_params=pltpu.CompilerParams(
            dimension_semantics=("parallel", "parallel")),
    )(strips, mask, w1_mat, s1, b1, w2_mat, s2, b2)

    # (N, nS, TH*Wp, Cp) -> (N, H_t, Wp, Cp) -> crop padding -> NCHW.
    out = out.reshape(N, H_t, Wp, Cout_p)[:, :H, 1:W + 1, :Cout]
    return jnp.transpose(out, (0, 3, 1, 2))


def ref_double_conv(x, params, eps=1e-5):
    """Pure-JAX reference (eval-mode BN), NCHW, for correctness check."""
    (w1, g1, be1, m1, v1, w2, g2, be2, m2, v2) = params

    def conv(x, w):
        return jax.lax.conv_general_dilated(
            x, w, window_strides=(1, 1), padding=((1, 1), (1, 1)),
            dimension_numbers=("NCHW", "OIHW", "NCHW"))

    def bn_relu(x, g, b, m, v):
        g, b, m, v = (t[None, :, None, None] for t in (g, b, m, v))
        return jnp.maximum((x - m) / jnp.sqrt(v + eps) * g + b, 0.0)

    y = bn_relu(conv(x, w1), g1, be1, m1, v1)
    return bn_relu(conv(y, w2), g2, be2, m2, v2)


def init_params(key, in_channels, out_channels):
    ks = jax.random.split(key, 8)
    w1 = jax.random.normal(ks[0], (out_channels, in_channels, 3, 3),
                           jnp.float32) * (1.0 / jnp.sqrt(9.0 * in_channels))
    w2 = jax.random.normal(ks[1], (out_channels, out_channels, 3, 3),
                           jnp.float32) * (1.0 / jnp.sqrt(9.0 * out_channels))
    g1 = 1.0 + 0.1 * jax.random.normal(ks[2], (out_channels,), jnp.float32)
    be1 = 0.1 * jax.random.normal(ks[3], (out_channels,), jnp.float32)
    m1 = 0.05 * jax.random.normal(ks[4], (out_channels,), jnp.float32)
    v1 = 1.0 + 0.1 * jnp.abs(jax.random.normal(ks[5], (out_channels,), jnp.float32))
    g2 = 1.0 + 0.1 * jax.random.normal(ks[6], (out_channels,), jnp.float32)
    be2 = 0.1 * jax.random.normal(ks[7], (out_channels,), jnp.float32)
    m2 = jnp.zeros((out_channels,), jnp.float32)
    v2 = jnp.ones((out_channels,), jnp.float32)
    return (w1, g1, be1, m1, v1, w2, g2, be2, m2, v2)


if __name__ == "__main__":
    key = jax.random.PRNGKey(0)
    k_x, k_p = jax.random.split(key)

    N, Cin, Cout, H, W = 2, 4, 8, 16, 16
    x = jax.random.normal(k_x, (N, Cin, H, W), jnp.float32)
    params = init_params(k_p, Cin, Cout)

    out = jax.block_until_ready(double_conv(x, params, tile_h=8))
    ref = jax.block_until_ready(ref_double_conv(x, params))

    assert out.shape == (N, Cout, H, W)
    max_err = float(jnp.max(jnp.abs(out - ref)))
    assert jnp.allclose(out, ref, atol=1e-3, rtol=1e-3), max_err

    print("KERNEL_OK")
</pallas_src>

<mosaic_0001>
module attributes {stable_mosaic.version = 11 : i64} {
  func.func @_double_conv_kernel(%arg0: i32, %arg1: i32, %arg2: memref<1x1x288x128xf32, #tpu.memory_space<vmem>>, %arg3: memref<1x288x1xf32, #tpu.memory_space<vmem>>, %arg4: memref<1152x128xf32, #tpu.memory_space<vmem>>, %arg5: memref<1x128xf32, #tpu.memory_space<vmem>>, %arg6: memref<1x128xf32, #tpu.memory_space<vmem>>, %arg7: memref<1152x128xf32, #tpu.memory_space<vmem>>, %arg8: memref<1x128xf32, #tpu.memory_space<vmem>>, %arg9: memref<1x128xf32, #tpu.memory_space<vmem>>, %arg10: memref<1x1x192x128xf32, #tpu.memory_space<vmem>>, %arg11: memref<288x128xf32, #tpu.memory_space<vmem>>, %arg12: memref<288x1152xf32, #tpu.memory_space<vmem>>) attributes {dimension_semantics = [#tpu.dimension_semantics<parallel>, #tpu.dimension_semantics<parallel>], iteration_bounds = array<i64: 2, 2>, scalar_prefetch = 0 : i64, scratch_operands = 2 : i64, tpu.core_type = #tpu.core_type<tc>, window_params = [{transform_indices = @transform_0, window_bounds = array<i64: 1, 1, 288, 128>}, {transform_indices = @transform_1, window_bounds = array<i64: 1, 288, 1>}, {pipeline_mode = #tpu.pipeline_mode<synchronous>, transform_indices = @transform_2, window_bounds = array<i64: 1152, 128>}, {pipeline_mode = #tpu.pipeline_mode<synchronous>, transform_indices = @transform_3, window_bounds = array<i64: 1, 128>}, {pipeline_mode = #tpu.pipeline_mode<synchronous>, transform_indices = @transform_4, window_bounds = array<i64: 1, 128>}, {pipeline_mode = #tpu.pipeline_mode<synchronous>, transform_indices = @transform_5, window_bounds = array<i64: 1152, 128>}, {pipeline_mode = #tpu.pipeline_mode<synchronous>, transform_indices = @transform_6, window_bounds = array<i64: 1, 128>}, {pipeline_mode = #tpu.pipeline_mode<synchronous>, transform_indices = @transform_7, window_bounds = array<i64: 1, 128>}, {transform_indices = @transform_8, window_bounds = array<i64: 1, 1, 192, 128>}]} {
    %c0 = arith.constant 0 : index
    %c0_0 = arith.constant 0 : index
    %c0_1 = arith.constant 0 : index
    %0 = vector.load %arg3[%c0, %c0_0, %c0_1] : memref<1x288x1xf32, #tpu.memory_space<vmem>>, vector<1x288x1xf32>
    %1 = vector.shape_cast %0 : vector<1x288x1xf32> to vector<288x1xf32>
    %c0_2 = arith.constant 0 : index
    %c0_3 = arith.constant 0 : index
    %c0_4 = arith.constant 0 : index
    %c0_5 = arith.constant 0 : index
    %2 = vector.load %arg2[%c0_2, %c0_3, %c0_4, %c0_5] : memref<1x1x288x128xf32, #tpu.memory_space<vmem>>, vector<1x1x288x128xf32>
    %3 = vector.shape_cast %2 : vector<1x1x288x128xf32> to vector<288x128xf32>
    %c25_i32 = arith.constant 25 : i32
    %4 = tpu.dynamic_rotate %3 by %c25_i32 dim 0 : vector<288x128xf32>, i32 -> vector<288x128xf32>
    %c0_6 = arith.constant 0 : index
    %c0_7 = arith.constant 0 : index
    %5 = vector.load %arg12[%c0_6, %c0_7] : memref<288x1152xf32, #tpu.memory_space<vmem>>, vector<288x128xf32>
    tpu.vector_store %arg12[%c0_6, %c0_7], %4 {strides = array<i32>} : memref<288x1152xf32, #tpu.memory_space<vmem>>, vector<288x128xf32>,
    %c24_i32 = arith.constant 24 : i32
    %6 = tpu.dynamic_rotate %3 by %c24_i32 dim 0 : vector<288x128xf32>, i32 -> vector<288x128xf32>
    %c0_8 = arith.constant 0 : index
    %c128 = arith.constant 128 : index
    %7 = vector.load %arg12[%c0_8, %c128] : memref<288x1152xf32, #tpu.memory_space<vmem>>, vector<288x128xf32>
    tpu.vector_store %arg12[%c0_8, %c128], %6 {strides = array<i32>} : memref<288x1152xf32, #tpu.memory_space<vmem>>, vector<288x128xf32>,
    %c23_i32 = arith.constant 23 : i32
    %8 = tpu.dynamic_rotate %3 by %c23_i32 dim 0 : vector<288x128xf32>, i32 -> vector<288x128xf32>
    %c0_9 = arith.constant 0 : index
    %c256 = arith.constant 256 : index
    %9 = vector.load %arg12[%c0_9, %c256] : memref<288x1152xf32, #tpu.memory_space<vmem>>, vector<288x128xf32>
    tpu.vector_store %arg12[%c0_9, %c256], %8 {strides = array<i32>} : memref<288x1152xf32, #tpu.memory_space<vmem>>, vector<288x128xf32>,
    %c1_i32 = arith.constant 1 : i32
    %10 = tpu.dynamic_rotate %3 by %c1_i32 dim 0 : vector<288x128xf32>, i32 -> vector<288x128xf32>
    %c0_10 = arith.constant 0 : index
    %c384 = arith.constant 384 : index
    %11 = vector.load %arg12[%c0_10, %c384] : memref<288x1152xf32, #tpu.memory_space<vmem>>, vector<288x128xf32>
    tpu.vector_store %arg12[%c0_10, %c384], %10 {strides = array<i32>} : memref<288x1152xf32, #tpu.memory_space<vmem>>, vector<288x128xf32>,
    %c0_11 = arith.constant 0 : index
    %c512 = arith.constant 512 : index
    %12 = vector.load %arg12[%c0_11, %c512] : memref<288x1152xf32, #tpu.memory_space<vmem>>, vector<288x128xf32>
    tpu.vector_store %arg12[%c0_11, %c512], %3 {strides = array<i32>} : memref<288x1152xf32, #tpu.memory_space<vmem>>, vector<288x128xf32>,
    %c287_i32 = arith.constant 287 : i32
    %13 = tpu.dynamic_rotate %3 by %c287_i32 dim 0 : vector<288x128xf32>, i32 -> vector<288x128xf32>
    %c0_12 = arith.constant 0 : index
    %c640 = arith.constant 640 : index
    %14 = vector.load %arg12[%c0_12, %c640] : memref<288x1152xf32, #tpu.memory_space<vmem>>, vector<288x128xf32>
    tpu.vector_store %arg12[%c0_12, %c640], %13 {strides = array<i32>} : memref<288x1152xf32, #tpu.memory_space<vmem>>, vector<288x128xf32>,
    %c265_i32 = arith.constant 265 : i32
    %15 = tpu.dynamic_rotate %3 by %c265_i32 dim 0 : vector<288x128xf32>, i32 -> vector<288x128xf32>
    %c0_13 = arith.constant 0 : index
    %c768 = arith.constant 768 : index
    %16 = vector.load %arg12[%c0_13, %c768] : memref<288x1152xf32, #tpu.memory_space<vmem>>, vector<288x128xf32>
    tpu.vector_store %arg12[%c0_13, %c768], %15 {strides = array<i32>} : memref<288x1152xf32, #tpu.memory_space<vmem>>, vector<288x128xf32>,
    %c264_i32 = arith.constant 264 : i32
    %17 = tpu.dynamic_rotate %3 by %c264_i32 dim 0 : vector<288x128xf32>, i32 -> vector<288x128xf32>
    %c0_14 = arith.constant 0 : index
    %c896 = arith.constant 896 : index
    %18 = vector.load %arg12[%c0_14, %c896] : memref<288x1152xf32, #tpu.memory_space<vmem>>, vector<288x128xf32>
    tpu.vector_store %arg12[%c0_14, %c896], %17 {strides = array<i32>} : memref<288x1152xf32, #tpu.memory_space<vmem>>, vector<288x128xf32>,
    %c263_i32 = arith.constant 263 : i32
    %19 = tpu.dynamic_rotate %3 by %c263_i32 dim 0 : vector<288x128xf32>, i32 -> vector<288x128xf32>
    %c0_15 = arith.constant 0 : index
    %c1024 = arith.constant 1024 : index
    %20 = vector.load %arg12[%c0_15, %c1024] : memref<288x1152xf32, #tpu.memory_space<vmem>>, vector<288x128xf32>
    tpu.vector_store %arg12[%c0_15, %c1024], %19 {strides = array<i32>} : memref<288x1152xf32, #tpu.memory_space<vmem>>, vector<288x128xf32>,
    %c0_16 = arith.constant 0 : index
    %c0_17 = arith.constant 0 : index
    %21 = vector.load %arg12[%c0_16, %c0_17] : memref<288x1152xf32, #tpu.memory_space<vmem>>, vector<288x1152xf32>
    %c0_18 = arith.constant 0 : index
    %c0_19 = arith.constant 0 : index
    %22 = vector.load %arg4[%c0_18, %c0_19] : memref<1152x128xf32, #tpu.memory_space<vmem>>, vector<1152x128xf32>
    %cst = arith.constant dense<0.000000e+00> : vector<288x128xf32>
    %23 = tpu.matmul %21, %22, %cst {dimension_numbers = #tpu.dot_dimension_numbers<[1], [0], [0], [1], [0, 0, 1, 1], [], []>} : vector<288x1152xf32>, vector<1152x128xf32>, vector<288x128xf32> -> vector<288x128xf32>
    %c0_20 = arith.constant 0 : index
    %c0_21 = arith.constant 0 : index
    %24 = vector.load %arg5[%c0_20, %c0_21] : memref<1x128xf32, #tpu.memory_space<vmem>>, vector<1x128xf32>
    %25 = vector.broadcast %24 : vector<1x128xf32> to vector<288x128xf32>
    %26 = arith.mulf %23, %25 : vector<288x128xf32>
    %c0_22 = arith.constant 0 : index
    %c0_23 = arith.constant 0 : index
    %27 = vector.load %arg6[%c0_22, %c0_23] : memref<1x128xf32, #tpu.memory_space<vmem>>, vector<1x128xf32>
    %28 = vector.broadcast %27 : vector<1x128xf32> to vector<288x128xf32>
    %29 = arith.addf %26, %28 : vector<288x128xf32>
    %cst_24 = arith.constant 0.000000e+00 : f32
    %30 = vector.broadcast %cst_24 : f32 to vector<288x128xf32>
    %31 = arith.maximumf %29, %30 : vector<288x128xf32>
    %32 = vector.broadcast %1 : vector<288x1xf32> to vector<288x128xf32>
    %33 = arith.mulf %31, %32 : vector<288x128xf32>
    %c0_25 = arith.constant 0 : index
    %c0_26 = arith.constant 0 : index
    %34 = vector.load %arg11[%c0_25, %c0_26] : memref<288x128xf32, #tpu.memory_space<vmem>>, vector<288x128xf32>
    tpu.vector_store %arg11[%c0_25, %c0_26], %33 {strides = array<i32>} : memref<288x128xf32, #tpu.memory_space<vmem>>, vector<288x128xf32>,
    %c0_27 = arith.constant 0 : index
    %c0_28 = arith.constant 0 : index
    %35 = vector.load %arg11[%c0_27, %c0_28] : memref<288x128xf32, #tpu.memory_space<vmem>>, vector<288x128xf32>
    %c25_i32_29 = arith.constant 25 : i32
    %36 = tpu.dynamic_rotate %35 by %c25_i32_29 dim 0 : vector<288x128xf32>, i32 -> vector<288x128xf32>
    %c0_30 = arith.constant 0 : index
    %c0_31 = arith.constant 0 : index
    %37 = vector.load %arg12[%c0_30, %c0_31] : memref<288x1152xf32, #tpu.memory_space<vmem>>, vector<288x128xf32>
    tpu.vector_store %arg12[%c0_30, %c0_31], %36 {strides = array<i32>} : memref<288x1152xf32, #tpu.memory_space<vmem>>, vector<288x128xf32>,
    %c24_i32_32 = arith.constant 24 : i32
    %38 = tpu.dynamic_rotate %35 by %c24_i32_32 dim 0 : vector<288x128xf32>, i32 -> vector<288x128xf32>
    %c0_33 = arith.constant 0 : index
    %c128_34 = arith.constant 128 : index
    %39 = vector.load %arg12[%c0_33, %c128_34] : memref<288x1152xf32, #tpu.memory_space<vmem>>, vector<288x128xf32>
    tpu.vector_store %arg12[%c0_33, %c128_34], %38 {strides = array<i32>} : memref<288x1152xf32, #tpu.memory_space<vmem>>, vector<288x128xf32>,
    %c23_i32_35 = arith.constant 23 : i32
    %40 = tpu.dynamic_rotate %35 by %c23_i32_35 dim 0 : vector<288x128xf32>, i32 -> vector<288x128xf32>
    %c0_36 = arith.constant 0 : index
    %c256_37 = arith.constant 256 : index
    %41 = vector.load %arg12[%c0_36, %c256_37] : memref<288x1152xf32, #tpu.memory_space<vmem>>, vector<288x128xf32>
    tpu.vector_store %arg12[%c0_36, %c256_37], %40 {strides = array<i32>} : memref<288x1152xf32, #tpu.memory_space<vmem>>, vector<288x128xf32>,
    %c1_i32_38 = arith.constant 1 : i32
    %42 = tpu.dynamic_rotate %35 by %c1_i32_38 dim 0 : vector<288x128xf32>, i32 -> vector<288x128xf32>
    %c0_39 = arith.constant 0 : index
    %c384_40 = arith.constant 384 : index
    %43 = vector.load %arg12[%c0_39, %c384_40] : memref<288x1152xf32, #tpu.memory_space<vmem>>, vector<288x128xf32>
    tpu.vector_store %arg12[%c0_39, %c384_40], %42 {strides = array<i32>} : memref<288x1152xf32, #tpu.memory_space<vmem>>, vector<288x128xf32>,
    %c0_41 = arith.constant 0 : index
    %c512_42 = arith.constant 512 : index
    %44 = vector.load %arg12[%c0_41, %c512_42] : memref<288x1152xf32, #tpu.memory_space<vmem>>, vector<288x128xf32>
    tpu.vector_store %arg12[%c0_41, %c512_42], %35 {strides = array<i32>} : memref<288x1152xf32, #tpu.memory_space<vmem>>, vector<288x128xf32>,
    %c287_i32_43 = arith.constant 287 : i32
    %45 = tpu.dynamic_rotate %35 by %c287_i32_43 dim 0 : vector<288x128xf32>, i32 -> vector<288x128xf32>
    %c0_44 = arith.constant 0 : index
    %c640_45 = arith.constant 640 : index
    %46 = vector.load %arg12[%c0_44, %c640_45] : memref<288x1152xf32, #tpu.memory_space<vmem>>, vector<288x128xf32>
    tpu.vector_store %arg12[%c0_44, %c640_45], %45 {strides = array<i32>} : memref<288x1152xf32, #tpu.memory_space<vmem>>, vector<288x128xf32>,
    %c265_i32_46 = arith.constant 265 : i32
    %47 = tpu.dynamic_rotate %35 by %c265_i32_46 dim 0 : vector<288x128xf32>, i32 -> vector<288x128xf32>
    %c0_47 = arith.constant 0 : index
    %c768_48 = arith.constant 768 : index
    %48 = vector.load %arg12[%c0_47, %c768_48] : memref<288x1152xf32, #tpu.memory_space<vmem>>, vector<288x128xf32>
    tpu.vector_store %arg12[%c0_47, %c768_48], %47 {strides = array<i32>} : memref<288x1152xf32, #tpu.memory_space<vmem>>, vector<288x128xf32>,
    %c264_i32_49 = arith.constant 264 : i32
    %49 = tpu.dynamic_rotate %35 by %c264_i32_49 dim 0 : vector<288x128xf32>, i32 -> vector<288x128xf32>
    %c0_50 = arith.constant 0 : index
    %c896_51 = arith.constant 896 : index
    %50 = vector.load %arg12[%c0_50, %c896_51] : memref<288x1152xf32, #tpu.memory_space<vmem>>, vector<288x128xf32>
    tpu.vector_store %arg12[%c0_50, %c896_51], %49 {strides = array<i32>} : memref<288x1152xf32, #tpu.memory_space<vmem>>, vector<288x128xf32>,
    %c263_i32_52 = arith.constant 263 : i32
    %51 = tpu.dynamic_rotate %35 by %c263_i32_52 dim 0 : vector<288x128xf32>, i32 -> vector<288x128xf32>
    %c0_53 = arith.constant 0 : index
    %c1024_54 = arith.constant 1024 : index
    %52 = vector.load %arg12[%c0_53, %c1024_54] : memref<288x1152xf32, #tpu.memory_space<vmem>>, vector<288x128xf32>
    tpu.vector_store %arg12[%c0_53, %c1024_54], %51 {strides = array<i32>} : memref<288x1152xf32, #tpu.memory_space<vmem>>, vector<288x128xf32>,
    %c48 = arith.constant 48 : index
    %c0_55 = arith.constant 0 : index
    %53 = vector.load %arg12[%c48, %c0_55] : memref<288x1152xf32, #tpu.memory_space<vmem>>, vector<192x1152xf32>
    %c0_56 = arith.constant 0 : index
    %c0_57 = arith.constant 0 : index
    %54 = vector.load %arg7[%c0_56, %c0_57] : memref<1152x128xf32, #tpu.memory_space<vmem>>, vector<1152x128xf32>
    %cst_58 = arith.constant dense<0.000000e+00> : vector<192x128xf32>
    %55 = tpu.matmul %53, %54, %cst_58 {dimension_numbers = #tpu.dot_dimension_numbers<[1], [0], [0], [1], [0, 0, 1, 1], [], []>} : vector<192x1152xf32>, vector<1152x128xf32>, vector<192x128xf32> -> vector<192x128xf32>
    %c0_59 = arith.constant 0 : index
    %c0_60 = arith.constant 0 : index
    %56 = vector.load %arg8[%c0_59, %c0_60] : memref<1x128xf32, #tpu.memory_space<vmem>>, vector<1x128xf32>
    %57 = vector.broadcast %56 : vector<1x128xf32> to vector<192x128xf32>
    %58 = arith.mulf %55, %57 : vector<192x128xf32>
    %c0_61 = arith.constant 0 : index
    %c0_62 = arith.constant 0 : index
    %59 = vector.load %arg9[%c0_61, %c0_62] : memref<1x128xf32, #tpu.memory_space<vmem>>, vector<1x128xf32>
    %60 = vector.broadcast %59 : vector<1x128xf32> to vector<192x128xf32>
    %61 = arith.addf %58, %60 : vector<192x128xf32>
    %cst_63 = arith.constant 0.000000e+00 : f32
    %62 = vector.broadcast %cst_63 : f32 to vector<192x128xf32>
    %63 = arith.maximumf %61, %62 : vector<192x128xf32>
    %64 = vector.shape_cast %63 : vector<192x128xf32> to vector<1x1x192x128xf32>
    %c0_64 = arith.constant 0 : index
    %c0_65 = arith.constant 0 : index
    %c0_66 = arith.constant 0 : index
    %c0_67 = arith.constant 0 : index
    %65 = vector.load %arg10[%c0_64, %c0_65, %c0_66, %c0_67] : memref<1x1x192x128xf32, #tpu.memory_space<vmem>>, vector<1x1x192x128xf32>
    tpu.vector_store %arg10[%c0_64, %c0_65, %c0_66, %c0_67], %64 {strides = array<i32>} : memref<1x1x192x128xf32, #tpu.memory_space<vmem>>, vector<1x1x192x128xf32>,
    return
  }
  func.func @transform_0(%arg0: i32, %arg1: i32) -> (i32, i32, i32, i32) {
    %c0_i32 = arith.constant 0 : i32
    %c0_i32_0 = arith.constant 0 : i32
    %c0_i32_1 = arith.constant 0 : i32
    return %arg0, %arg1, %c0_i32, %c0_i32_0 : i32, i32, i32, i32
  }
  func.func @transform_1(%arg0: i32, %arg1: i32) -> (i32, i32, i32) {
    %c0_i32 = arith.constant 0 : i32
    %c0_i32_0 = arith.constant 0 : i32
    %c0_i32_1 = arith.constant 0 : i32
    return %arg1, %c0_i32, %c0_i32_0 : i32, i32, i32
  }
  func.func @transform_2(%arg0: i32, %arg1: i32) -> (i32, i32) {
    %c0_i32 = arith.constant 0 : i32
    %c0_i32_0 = arith.constant 0 : i32
    %c0_i32_1 = arith.constant 0 : i32
    return %c0_i32, %c0_i32_0 : i32, i32
  }
  func.func @transform_3(%arg0: i32, %arg1: i32) -> (i32, i32) {
    %c0_i32 = arith.constant 0 : i32
    %c0_i32_0 = arith.constant 0 : i32
    %c0_i32_1 = arith.constant 0 : i32
    return %c0_i32, %c0_i32_0 : i32, i32
  }
  func.func @transform_4(%arg0: i32, %arg1: i32) -> (i32, i32) {
    %c0_i32 = arith.constant 0 : i32
    %c0_i32_0 = arith.constant 0 : i32
    %c0_i32_1 = arith.constant 0 : i32
    return %c0_i32, %c0_i32_0 : i32, i32
  }
  func.func @transform_5(%arg0: i32, %arg1: i32) -> (i32, i32) {
    %c0_i32 = arith.constant 0 : i32
    %c0_i32_0 = arith.constant 0 : i32
    %c0_i32_1 = arith.constant 0 : i32
    return %c0_i32, %c0_i32_0 : i32, i32
  }
  func.func @transform_6(%arg0: i32, %arg1: i32) -> (i32, i32) {
    %c0_i32 = arith.constant 0 : i32
    %c0_i32_0 = arith.constant 0 : i32
    %c0_i32_1 = arith.constant 0 : i32
    return %c0_i32, %c0_i32_0 : i32, i32
  }
  func.func @transform_7(%arg0: i32, %arg1: i32) -> (i32, i32) {
    %c0_i32 = arith.constant 0 : i32
    %c0_i32_0 = arith.constant 0 : i32
    %c0_i32_1 = arith.constant 0 : i32
    return %c0_i32, %c0_i32_0 : i32, i32
  }
  func.func @transform_8(%arg0: i32, %arg1: i32) -> (i32, i32, i32, i32) {
    %c0_i32 = arith.constant 0 : i32
    %c0_i32_0 = arith.constant 0 : i32
    %c0_i32_1 = arith.constant 0 : i32
    return %arg0, %arg1, %c0_i32, %c0_i32_0 : i32, i32, i32, i32
  }
}

</mosaic_0001>

<bundles_post_ra>
// kernel: tpu_custom_call.1
= control target key start
LH: loop header
LB: loop body
LE: loop exit
PB: predicated region body
PF: predicated region fallthrough
CT: control target
= control target key end

     0   :  { %s8752_s0 = inlined_call_operand.hbm [shape: f32[2,2,288,128], index: 0, kind: input, shape index: {}]   ;;  %s8753_s1 = inlined_call_operand.vmem [shape: f32[2,288,1], index: 1, kind: input, shape index: {}]   ;;  %s8754_s2 = inlined_call_operand.hbm [shape: f32[1152,128], index: 2, kind: input, shape index: {}]   ;;  %s8755_s3 = inlined_call_operand.vmem [shape: f32[1,128], index: 3, kind: input, shape index: {}]   ;;  %s8756_s4 = inlined_call_operand.vmem [shape: f32[1,128], index: 4, kind: input, shape index: {}]   ;;  %s8757_s5 = inlined_call_operand.hbm [shape: f32[1152,128], index: 5, kind: input, shape index: {}]   ;;  %s8758_s6 = inlined_call_operand.vmem [shape: f32[1,128], index: 6, kind: input, shape index: {}]   ;;  %s8759_s7 = inlined_call_operand.vmem [shape: f32[1,128], index: 7, kind: input, shape index: {}]   ;;  %s8760_s8 = inlined_call_operand.hbm [shape: f32[2,2,192,128], index: 8, kind: output, shape index: {}]  }
   0x1   :  { %8895 = sst [smem:[#allocation75_spill]] %s8754_s2 }
   0x2   :  { %8896 = sst [smem:[#allocation76_spill]] %s8757_s5 }
   0x3   :  { %8897 = sst [smem:[#allocation77_spill]] %s8759_s7 }
   0x4   :  { %8898 = sst [smem:[#allocation78_spill]] %s8760_s8 }
   0x5   :  { %13 = vsyncpa [#allocation5], 0 }
   0x6   :  { %15 = vsyncpa [#allocation5 + $0x1], 0 }
   0x7   :  { %16 = vsyncpa [#allocation8], 0 }
   0x8   :  { %17 = vsyncpa [#allocation6], 0 }
   0x9   :  { %19 = vsyncpa [#allocation6 + $0x1], 0  ;;  %s6509_s27 = smov 0   ;;  %s6511_s28 = smov 0  }
   0xa   :  { %s6513_s29 = smov 0   ;;  %s6515_s30 = smov 0  }
   0xb   :  { %s6517_s9 = smov 0   ;;  %s6519_s10 = smov 0  }
   0xc   :  { %s6521_s11 = smov 0   ;;  %s6523_s12 = smov 0  }
   0xd LB: > { %8899 = sst [smem:[#allocation14_spill]] %s6424_s27  ;;  %s5038_s13 = sadd.s32 4294967295, %s6452_s12   ;;  %s6452_s12 = sphi %s6523_s12, %s25_s12   ;;  %s6448_s11 = sphi %s6521_s11, %s9133_s11   ;;  %s6444_s10 = sphi %s6519_s10, %s9127_s10   ;;  %s6440_s9 = sphi %s6517_s9, %s9132_s9   ;;  %s6436_s30 = sphi %s6515_s30, %s9126_s30   ;;  %s6432_s29 = sphi %s6513_s29, %s9131_s29   ;;  %s6428_s28 = sphi %s6511_s28, %s9130_s28   ;;  %s6424_s27 = sphi %s6509_s27, %s9129_s27  }
   0xe   : > { %8900 = sst [smem:[#allocation15_spill]] %s6440_s9  ;;  %s5039_s14 = sadd.s32 4294967294, %s6452_s12  }
   0xf   : > { %8901 = sst [smem:[#allocation16_spill]] %s6444_s10  ;;  %p59_p0 = scmp.ne.s32.totalorder %s6428_s28, %s6424_s27 }
  0x10   : > { %p6553_p1 = scmp.eq.s32.totalorder %s5038_s13, 0  ;;  %p6557_p2 = scmp.eq.s32.totalorder %s5038_s13, 3 }
  0x11   : > { %p243_p3 = scmp.eq.s32.totalorder %s5039_s14, 3  ;;  %p5040_p5 = scmp.ge.s32.totalorder %s6452_s12, 1 }
  0x12   : > { %s8902_s15 = scalar_select %p6553_p1, 1, 0 }
  0x13   : > { %s8903_s16 = scalar_select %p6557_p2, 1, 0 }
  0x14   : > { %p6563_p4 = por %p6553_p1, %p59_p0  ;;  %p6568_p6 = por %p243_p3, %p59_p0 }
  0x15   : > { %p250_p7 = scmp.lt.s32.totalorder %s6452_s12, 5  ;;  %s6454_s20 = smov [#allocation7]  }
  0x16   : > { %s8904_s17 = scalar_select %p6563_p4, 1, 0 }
  0x17   : > { %s8905_s18 = scalar_select %p6568_p6, 1, 0 }
  0x18   : > { %p6573_p8 = pnand %p5040_p5, %p250_p7  ;;  %s262_s21 = sshll.u32 %s6454_s20, 4  ;;  %s263_s21 = int_to_ptr.vmem [resolvable:$true] %s262_s21 }
  0x19   : > { %8906 = sst [smem:[#allocation17_spill]] %s8905_s18  ;;  %s6455_s23 = smov [#allocation9]  }
  0x1a   : > { %s8907_s19 = scalar_select %p6573_p8, 1, 0 }
  0x1b   : > { %p6131_p9 = pneg %p6573_p8  ;;  %s281_s24 = sshll.u32 %s6455_s23, 4  ;;  %s6585_s24 = int_to_ptr.vmem [resolvable:$true] %s281_s24 }
  0x1c   : > { %s8909_s2 = sld [smem:[#allocation75_spill]] }
  0x1d   : > { %p6581_p10 = pnand %p6131_p9, %p6553_p1 }
  0x1f   : > { %p6266_p12 = pneg %p6581_p10 }
  0x22   : > { %s6264_s13 = scalar_lea.hbm %s8909_s2, 18432 }
  0x23   : > { %p6265_p11 = scmp.ne.s32.totalorder %s8909_s2, %s6264_s13  ;;  %p6271_p3 = scmp.lt.u32.totalorder %s6264_s13, %s8909_s2 }
  0x25   : > { %p6267_p13 = pnand %p6266_p12, %p6265_p11 }
  0x27   : > { %p6268_p0 = pneg %p6267_p13 }
  0x29   : > { %p6273_p5 = pnand %p6271_p3, %p6268_p0 }
  0x2b   : > { %6276 = shalt.err (!%p6273_p5)
}
  0x2c   : > { %s6277_s23 = scalar_lea.vmem %s263_s21, 18432  ;;  %p6285_p1 = scmp.lt.s32.totalorder %s263_s21, %s263_s21 }
  0x2d   : > { %p6278_p7 = scmp.ne.s32.totalorder %s263_s21, %s6277_s23  ;;  %p6286_p4 = scmp.lt.s32.totalorder %s6277_s23, %s6277_s23 }
  0x2f   : > { %p6280_p9 = pnand %p6278_p7, %p6266_p12  ;;  %p6287_p8 = por %p6286_p4, %p6285_p1 }
  0x31   : > { %p6281_p6 = pneg %p6280_p9 }
  0x33   : > { %p6288_p2 = pnand %p6287_p8, %p6281_p6 }
  0x35   : > { %6291 = shalt.err (!%p6288_p2)
}
  0x36   : > { %s8768_s25 = smov 128   ;;  %s8769_s26 = smov 8  }
  0x37   : > { %6134 = dma.hbm_to_vmem [thread:$0]  (!%p6581_p10), %s8909_s2, 18432, %s263_s21, [#allocation8], %s8768_s25, %s8768_s25, %s8769_s26  }
  0x38   : > { %s8910_s5 = sld [smem:[#allocation76_spill]] }
  0x3e   : > { %s6292_s20 = scalar_lea.hbm %s8910_s5, 18432 }
  0x3f   : > { %p6293_p1 = scmp.ne.s32.totalorder %s8910_s5, %s6292_s20  ;;  %p6299_p6 = scmp.lt.u32.totalorder %s6292_s20, %s8910_s5 }
  0x41   : > { %p6295_p2 = pnand %p6293_p1, %p6266_p12 }
  0x43   : > { %p6296_p4 = pneg %p6295_p2 }
  0x45   : > { %p6301_p8 = pnand %p6299_p6, %p6296_p4 }
  0x47   : > { %6304 = shalt.err (!%p6301_p8)
}
  0x48   : > { %s6305_s21 = scalar_lea.vmem %s6585_s24, 18432  ;;  %p6313_p3 = scmp.lt.s32.totalorder %s6585_s24, %s6585_s24 }
  0x49   : > { %p6306_p11 = scmp.ne.s32.totalorder %s6585_s24, %s6305_s21  ;;  %p6314_p5 = scmp.lt.s32.totalorder %s6305_s21, %s6305_s21 }
  0x4b   : > { %p6308_p13 = pnand %p6306_p11, %p6266_p12  ;;  %p6315_p7 = por %p6314_p5, %p6313_p3 }
  0x4d   : > { %p6309_p0 = pneg %p6308_p13 }
  0x4f   : > { %p6316_p9 = pnand %p6315_p7, %p6309_p0 }
  0x51   : > { %6319 = shalt.err (!%p6316_p9)
}
  0x52   : > { %6137 = dma.hbm_to_vmem [thread:$0]  (!%p6581_p10), %s8910_s5, 18432, %s6585_s24, [#allocation8], %s8768_s25, %s8768_s25, %s8769_s26  }
  0x53   : > { %s34_s9 = sadd.s32 1, %s6444_s10  ;;  %s37_s22 = sadd.s32 1, %s6448_s11 }
  0x54   : > { %p35_p12 = scmp.ge.s32.totalorder %s34_s9, 2  ;;  %s46_s27 = sadd.s32 1, %s6432_s29 }
  0x55   : > { %p53_p1 = scmp.ne.s32.totalorder %s6432_s29, %s6428_s28  ;;  %p54_p2 = scmp.eq.s32.totalorder %s6452_s12, 0 }
  0x56   : > { %s9135_s9 = smov (%p35_p12, %s34_s9), 0  ;;  %s9137_s22 = smov (!%p35_p12, %s37_s22), %s6448_s11 }
  0x57   : > { %8911 = sst [smem:[#allocation18_spill]] %s9135_s9  ;;  %s42_s18 = ssub.s32 %s6444_s10, %s9135_s9 }
  0x58   : > { %p6651_p4 = por %p54_p2, %p53_p1  ;;  %p39_p10 = scmp.ge.s32.totalorder %s9137_s22, 2 }
  0x59   : > { %p8913_p6 = scmp.ne.s32.totalorder %s8903_s16, 0  ;;  %p6148_p11 = scmp.lt.s32.totalorder %s6452_s12, 4 }
  0x5a   : > { %s301_s14 = sand.u32 1, %s6432_s29   ;;  %s9139_s22 = smov (%p39_p10, %s9137_s22), 0 }
  0x5b   : > { %p6657_p8 = por %p8913_p6, %p53_p1  ;;  %8915 = sst [smem:[#allocation19_spill]] %s9139_s22 }
  0x5c   : > { %s6111_s20 = smul.u32 288, %s301_s14  ;;  %s41_s23 = ssub.s32 %s6448_s11, %s9139_s22 }
  0x5d   : > { %s6112_s21 = smul.u32 36, %s6444_s10  ;;  %s43_s7 = sor.u32 %s42_s18, %s41_s23 }
  0x5e   : > { %p44_p13 = scmp.eq.s32.totalorder %s43_s7, 0  ;;  %s6113_s8 = smul.u32 72, %s6448_s11 }
  0x5f   : > { %s305_s25 = scalar_lea.vmem [#allocation4], %s6111_s20  ;;  %p6671_p0 = pnand %p6148_p11, %p6651_p4 }
  0x60   : > { %s314_s26 = sshll.u32 %s305_s25, 4  ;;  %s311_s5 = sadd.s32 %s6113_s8, %s6112_s21  ;;  %s6678_s26 = int_to_ptr.vmem [resolvable:$true] %s314_s26 }
  0x61   : > { %s6676_s2 = scalar_select %p44_p13, %s6432_s29, %s46_s27  }
  0x62   : > { %s5044_s9 = sshll.u32 %s311_s5, 7  ;;  %s6685_s25 = scalar_lea.sflag [#allocation5], %s301_s14 }
  0x63   : > { %s6683_s18 = scalar_lea.hbm %s8752_s0, %s5044_s9  ;;  %p6322_p5 = pneg %p6671_p0 }
  0x64   : > { %s6320_s13 = scalar_lea.hbm %s6683_s18, 4608  ;;  %s6325_s10 = scalar_lea.hbm %s8752_s0, 18432 }
  0x65   : > { %p6321_p3 = scmp.ne.s32.totalorder %s6683_s18, %s6320_s13  ;;  %p6326_p12 = scmp.lt.u32.totalorder %s6683_s18, %s8752_s0 }
  0x66   : > { %p6327_p1 = scmp.lt.u32.totalorder %s6325_s10, %s6320_s13  ;;  %p6329_p4 = scmp.lt.u32.totalorder %s6320_s13, %s6683_s18 }
  0x67   : > { %p6323_p7 = pnand %p6322_p5, %p6321_p3 }
  0x68   : > { %p6328_p2 = por %p6327_p1, %p6326_p12 }
  0x69   : > { %p6324_p9 = pneg %p6323_p7 }
  0x6a   : > { %p6330_p10 = por %p6329_p4, %p6328_p2 }
  0x6c   : > { %p6331_p6 = pnand %p6330_p10, %p6324_p9 }
  0x6e   : > { %6334 = shalt.err (!%p6331_p6)
}
  0x6f   : > { %s6335_s14 = scalar_lea.vmem %s6678_s26, 4608  ;;  %s6458_s20 = smov [#allocation4]  }
  0x70   : > { %p6336_p11 = scmp.ne.s32.totalorder %s6678_s26, %s6335_s14  ;;  %s6340_s23 = sshll.u32 %s6458_s20, 4  ;;  %s6341_s23 = int_to_ptr.vmem [resolvable:$false] %s6340_s23 }
  0x71   : > { %s6342_s21 = scalar_lea.vmem %s6341_s23, 9216  ;;  %p6343_p7 = scmp.lt.s32.totalorder %s6678_s26, %s6341_s23 }
  0x72   : > { %p6338_p13 = pnand %p6336_p11, %p6322_p5  ;;  %p6344_p12 = scmp.lt.s32.totalorder %s6342_s21, %s6335_s14 }
  0x74   : > { %p6339_p3 = pneg %p6338_p13  ;;  %p6345_p1 = por %p6344_p12, %p6343_p7 }
  0x76   : > { %p6346_p2 = pnand %p6345_p1, %p6339_p3 }
  0x78   : > { %6349 = shalt.err (!%p6346_p2)
}
  0x79   : > { %s8917_s7 = smov 8   ;;  %s8918_s8 = smov 128  }
  0x7a   : > { %6141 = dma.hbm_to_vmem [thread:$0]  (!%p6671_p0), %s6683_s18, 4608, %s6678_s26, %s6685_s25, %s8918_s8, %s8918_s8, %s8917_s7  }
  0x7b   : > { %p8919_p5 = scmp.ne.s32.totalorder %s8907_s19, 0 }
  0x7d   : > { %334 = sbr.rel (%p8919_p5) target bundleno = 1503 (0x5df), region = 52 }
  0x84   : > { %s6719_s13 = sand.u32 1, %s6428_s28   ;;  %p8920_p9 = scmp.ne.s32.totalorder %s8904_s17, 0 }
  0x85   : > { %s6114_s5 = smul.u32 288, %s6719_s13  ;;  %s337_s27 = scalar_lea.sflag [#allocation5], %s6719_s13 }
  0x87   : > { %s6723_s10 = scalar_lea.vmem [#allocation4], %s6114_s5 }
  0x88   : > { %6411 = dma.done.wait (%p8920_p9), %s337_s27, 4608  }
  0x89   : > { %6413 = vsyncadd (%p8920_p9), %s337_s27, 4294962688  ;;  %p8921_p0 = scmp.ne.s32.totalorder %s8902_s15, 0 }
  0x8b   : > { %6415 = dma.done.wait (%p8921_p0), [#allocation8], 36864  }
  0x8c   : > { %6417 = vsyncadd (%p8921_p0), [#allocation8], 4294930432  ;;  %v8773_v0 = vmov 0.0|0.0   ;;  %v1259_v1 = vld [vmem:[#allocation7] sm:$0xff]  ;;  %v1260_v2 = vld [vmem:[#allocation7 + $0x8] sm:$0xff]  ;;  %v499_v46 = vlaneseq  ;;  %p386_p4 = scmp.lt.s32.totalorder %s6436_s30, 1 }
  0x8d   : > { %5302 = vmatprep.subr.bf16.mxu0 %v8773_v0  ;;  %5750 = vmatprep.subr.bf16.mxu1 %v8773_v0  ;;  %v1261_v3 = vld [vmem:[#allocation7 + $0x10] sm:$0xff]  ;;  %v5303_v4 = vpack.c.bf16 %v1260_v2, %v1259_v1  ;;  %v1262_v5 = vld [vmem:[#allocation7 + $0x18] sm:$0xff]  ;;  %v1263_v7 = vld [vmem:[#allocation7 + $0x20] sm:$0xff]  ;;  %s6115_s5 = smul.u32 192, %s6719_s13  ;;  %s9121_s19 = sld [smem:[#allocation15_spill]] }
  0x8e   : > { %v5306_v6 = vpack.c.bf16 %v1262_v5, %v1261_v3  ;;  %v1264_v8 = vld [vmem:[#allocation7 + $0x28] sm:$0xff]  ;;  %v1265_v10 = vld [vmem:[#allocation7 + $0x30] sm:$0xff]  ;;  %v1266_v11 = vld [vmem:[#allocation7 + $0x38] sm:$0xff]  ;;  %v6769_v51 = vshrl.u32 %v499_v46, 7  ;;  %s387_s15 = scalar_select %p386_p4, %s6436_s30, 1 }
  0x8f   : > { %5304 = vmatpush1.bf16.msra.mxu0 %v5303_v4  ;;  %5766 = vmatpush1.bf16.msra.mxu1 %v5303_v4  ;;  %v5309_v9 = vpack.c.bf16 %v1264_v8, %v1263_v7  ;;  %v6740_v12 = vld [vmem:[%s6723_s10 + $0x108] sm:$0xff]  ;;  %v5312_v13 = vpack.c.bf16 %v1266_v11, %v1265_v10  ;;  %v1267_v14 = vld [vmem:[#allocation7 + $0x40] sm:$0xff]  ;;  %v1269_v17 = vld [vmem:[#allocation7 + $0x50] sm:$0xff]  ;;  %s6117_s26 = smul.u32 24, %s6436_s30  ;;  %s9122_s14 = sld [smem:[#allocation78_spill]] }
  0x90   : > { %5305 = vmatprep.subr.bf16.mxu0 %v8773_v0  ;;  %5751 = vmatprep.subr.bf16.mxu1 %v8773_v0  ;;  %8922 = vst [vmem:[#allocation20_spill] sm:$0xff] %v6740_v12  ;;  %v1268_v15 = vld [vmem:[#allocation7 + $0x48] sm:$0xff]  ;;  %v1270_v18 = vld [vmem:[#allocation7 + $0x58] sm:$0xff]  ;;  %v1271_v20 = vld [vmem:[#allocation7 + $0x60] sm:$0xff]  ;;  %v496_v54 = vrot.slane %v6740_v12, 7  ;;  %vm501_vm0 = vcmp.lt.s32.totalorder %v6769_v51, 1 }
  0x91   : > { %1467 = vmatprep.mubr.f32.mxu0 %v6740_v12  ;;  %v5315_v16 = vpack.c.bf16 %v1268_v15, %v1267_v14  ;;  %v5318_v19 = vpack.c.bf16 %v1270_v18, %v1269_v17  ;;  %v1272_v21 = vld [vmem:[#allocation7 + $0x68] sm:$0xff]  ;;  %v1273_v23 = vld [vmem:[#allocation7 + $0x70] sm:$0xff]  ;;  %v1274_v24 = vld [vmem:[#allocation7 + $0x78] sm:$0xff]  ;;  %8923 = vst [vmem:[#allocation21_spill] sm:$0xff] %v6769_v51  ;;  %vm646_vm1 = vcmp.lt.s32.totalorder %v6769_v51, 7  ;;  %s6116_s17 = smul.u32 288, %s387_s15 }
  0x92   : > { %v5321_v22 = vpack.c.bf16 %v1272_v21, %v1271_v20  ;;  %v5324_v25 = vpack.c.bf16 %v1274_v24, %v1273_v23  ;;  %v1275_v26 = vld [vmem:[#allocation7 + $0x80] sm:$0xff]  ;;  %v1276_v27 = vld [vmem:[#allocation7 + $0x88] sm:$0xff]  ;;  %v1277_v29 = vld [vmem:[#allocation7 + $0x90] sm:$0xff]  ;;  %s9120_s15 = sld [smem:[#allocation77_spill]]  ;;  %s4902_s23 = scalar_lea.sflag [#allocation6], %s6719_s13 }
  0x93   : > { %5307 = vmatpush1.bf16.msra.mxu0 %v5306_v6  ;;  %5767 = vmatpush1.bf16.msra.mxu1 %v5306_v6  ;;  %v5327_v28 = vpack.c.bf16 %v1276_v27, %v1275_v26  ;;  %v1278_v30 = vld [vmem:[#allocation7 + $0x98] sm:$0xff]  ;;  %v1279_v32 = vld [vmem:[#allocation7 + $0xa0] sm:$0xff]  ;;  %v1280_v33 = vld [vmem:[#allocation7 + $0xa8] sm:$0xff]  ;;  %s7496_s16 = scalar_lea.vmem %s8753_s1, %s6116_s17  ;;  %s8603_s17 = scalar_lea.vmem [#allocation10], %s6115_s5 }
  0x94   : > { %5308 = vmatprep.subr.bf16.mxu0 %v8773_v0  ;;  %5752 = vmatprep.subr.bf16.mxu1 %v8773_v0  ;;  %v5330_v31 = vpack.c.bf16 %v1278_v30, %v1277_v29  ;;  %v5333_v34 = vpack.c.bf16 %v1280_v33, %v1279_v32  ;;  %v1281_v35 = vld [vmem:[#allocation7 + $0xb0] sm:$0xff]  ;;  %v1282_v36 = vld [vmem:[#allocation7 + $0xb8] sm:$0xff]  ;;  %v1283_v38 = vld [vmem:[#allocation7 + $0xc0] sm:$0xff]  ;;  %s4917_s25 = sshll.u32 %s8603_s17, 4  ;;  %s6461_s7 = smov [#allocation10]   ;;  %s8696_s25 = int_to_ptr.vmem [resolvable:$true] %s4917_s25 }
  0x95   : > { %v5336_v37 = vpack.c.bf16 %v1282_v36, %v1281_v35  ;;  %v1284_v39 = vld [vmem:[#allocation7 + $0xc8] sm:$0xff]  ;;  %v1285_v41 = vld [vmem:[#allocation7 + $0xd0] sm:$0xff]  ;;  %v1286_v42 = vld [vmem:[#allocation7 + $0xd8] sm:$0xff]  ;;  %s6350_s21 = scalar_lea.vmem %s8696_s25, 3072  ;;  %s6354_s8 = sshll.u32 %s6461_s7, 4  ;;  %s6355_s8 = int_to_ptr.vmem [resolvable:$false] %s6354_s8 }
  0x96   : > { %v5339_v40 = vpack.c.bf16 %v1284_v39, %v1283_v38  ;;  %v5342_v43 = vpack.c.bf16 %v1286_v42, %v1285_v41  ;;  %v1287_v44 = vld [vmem:[#allocation7 + $0xe0] sm:$0xff]  ;;  %v1288_v45 = vld [vmem:[#allocation7 + $0xe8] sm:$0xff]  ;;  %v1289_v48 = vld [vmem:[#allocation7 + $0xf0] sm:$0xff]  ;;  %p6351_p10 = scmp.ne.s32.totalorder %s8696_s25, %s6350_s21  ;;  %s6356_s5 = scalar_lea.vmem %s6355_s8, 6144 }
  0x97   : > { %5310 = vmatpush1.bf16.msra.mxu0 %v5309_v9  ;;  %5768 = vmatpush1.bf16.msra.mxu1 %v5309_v9  ;;  %v5345_v47 = vpack.c.bf16 %v1288_v45, %v1287_v44  ;;  %v1290_v49 = vld [vmem:[#allocation7 + $0xf8] sm:$0xff]  ;;  %v6767_v50 = vld [vmem:[%s6723_s10 + $0x100] sm:$0xff]  ;;  %v1292_v56 = vld [vmem:[#allocation7 + $0x108] sm:$0xff]  ;;  %p6357_p13 = scmp.lt.s32.totalorder %s8696_s25, %s6355_s8  ;;  %p6358_p3 = scmp.lt.s32.totalorder %s6356_s5, %s6350_s21 }
  0x98   : > { %5311 = vmatprep.subr.bf16.mxu0 %v8773_v0  ;;  %5753 = vmatprep.subr.bf16.mxu1 %v8773_v0  ;;  %v5348_v52 = vpack.c.bf16 %v1290_v49, %v1289_v48  ;;  %v8775_v53 = vrot.slane %v6767_v50, 7  ;;  %v1291_v55 = vld [vmem:[#allocation7 + $0x100] sm:$0xff]  ;;  %v6777_v57 = vld [vmem:[%s6723_s10 + $0x110] sm:$0xff]  ;;  %v6789_v61 = vld [vmem:[%s6723_s10 + $0x118] sm:$0xff]  ;;  %p6352_p6 = pnand %p6351_p10, %p6657_p8 }
  0x99   : > { %v5351_v59 = vpack.c.bf16 %v1292_v56, %v1291_v55  ;;  %v497_v60 = vrot.slane %v6777_v57, 7  ;;  %v1293_v62 = vld [vmem:[#allocation7 + $0x110] sm:$0xff]  ;;  %v1294_v63 = vld [vmem:[#allocation7 + $0x118] sm:$0xff]  ;;  %v498_v2 = vrot.slane %v6789_v61, 7  ;;  %v6800_v4 = vld [vmem:[%s6723_s10] sm:$0xff]  ;;  %p6359_p7 = por %p6358_p3, %p6357_p13 }
  0x9a   : > { %v6784_v58 = vsel %vm501_vm0, %v8775_v53, %v496_v54  ;;  %v5354_v3 = vpack.c.bf16 %v1294_v63, %v1293_v62  ;;  %v1295_v5 = vld [vmem:[#allocation7 + $0x120] sm:$0xff]  ;;  %v1296_v6 = vld [vmem:[#allocation7 + $0x128] sm:$0xff]  ;;  %v463_v8 = vrot.slane %v6800_v4, 7  ;;  %v1297_v11 = vld [vmem:[#allocation7 + $0x130] sm:$0xff]  ;;  %p6353_p11 = pneg %p6352_p6 }
  0x9b   : > { %5313 = vmatpush1.bf16.msra.mxu0 %v5312_v13  ;;  %5769 = vmatpush1.bf16.msra.mxu1 %v5312_v13  ;;  %8924 = vst [vmem:[#allocation22_spill] sm:$0xff] %v6784_v58  ;;  %v6795_v1 = vsel %vm501_vm0, %v496_v54, %v497_v60  ;;  %v6806_v7 = vsel %vm501_vm0, %v497_v60, %v498_v2  ;;  %v6811_v10 = vld [vmem:[%s6723_s10 + $0x8] sm:$0xff]  ;;  %v1298_v13 = vld [vmem:[#allocation7 + $0x138] sm:$0xff]  ;;  %v6821_v17 = vld [vmem:[%s6723_s10 + $0x10] sm:$0xff] }
  0x9c   : > { %5314 = vmatprep.subr.bf16.mxu0 %v8773_v0  ;;  %5754 = vmatprep.subr.bf16.mxu1 %v8773_v0  ;;  %8925 = vst [vmem:[#allocation23_spill] sm:$0xff] %v6795_v1  ;;  %8926 = vst [vmem:[#allocation24_spill] sm:$0xff] %v6806_v7  ;;  %v5357_v9 = vpack.c.bf16 %v1296_v6, %v1295_v5  ;;  %v6817_v14 = vsel %vm501_vm0, %v498_v2, %v463_v8  ;;  %v464_v15 = vrot.slane %v6811_v10, 7  ;;  %v1299_v18 = vld [vmem:[#allocation7 + $0x140] sm:$0xff]  ;;  %v6832_v23 = vld [vmem:[%s6723_s10 + $0x18] sm:$0xff]  ;;  %p6360_p12 = pnand %p6359_p7, %p6353_p11 }
  0x9d   : > { %8927 = vst [vmem:[#allocation25_spill] sm:$0xff] %v6817_v14  ;;  %v465_v21 = vrot.slane %v6821_v17, 7  ;;  %v1301_v24 = vld [vmem:[#allocation7 + $0x150] sm:$0xff]  ;;  %v466_v27 = vrot.slane %v6832_v23, 7  ;;  %v6843_v29 = vld [vmem:[%s6723_s10 + $0x20] sm:$0xff]  ;;  %v6854_v35 = vld [vmem:[%s6723_s10 + $0x28] sm:$0xff] }
  0x9e   : > { %v6828_v20 = vsel %vm501_vm0, %v463_v8, %v464_v15  ;;  %v1303_v30 = vld [vmem:[#allocation7 + $0x160] sm:$0xff]  ;;  %v467_v33 = vrot.slane %v6843_v29, 7  ;;  %v1305_v36 = vld [vmem:[#allocation7 + $0x170] sm:$0xff]  ;;  %v468_v39 = vrot.slane %v6854_v35, 7  ;;  %v1310_v49 = vld [vmem:[#allocation7 + $0x198] sm:$0xff] }
  0x9f   : > { %5316 = vmatpush1.bf16.msra.mxu0 %v5315_v16  ;;  %5770 = vmatpush1.bf16.msra.mxu1 %v5315_v16  ;;  %v5360_v16 = vpack.c.bf16 %v1298_v13, %v1297_v11  ;;  %8928 = vst [vmem:[#allocation26_spill] sm:$0xff] %v6828_v20  ;;  %v6839_v26 = vsel %vm501_vm0, %v464_v15, %v465_v21  ;;  %v6865_v41 = vld [vmem:[%s6723_s10 + $0x30] sm:$0xff]  ;;  %v1307_v42 = vld [vmem:[#allocation7 + $0x180] sm:$0xff]  ;;  %v1312_v60 = vld [vmem:[#allocation7 + $0x1a8] sm:$0xff] }
  0xa0   : > { %5317 = vmatprep.subr.bf16.mxu0 %v8773_v0  ;;  %5755 = vmatprep.subr.bf16.mxu1 %v8773_v0  ;;  %8929 = vst [vmem:[#allocation27_spill] sm:$0xff] %v6839_v26  ;;  %v6850_v32 = vsel %vm501_vm0, %v465_v21, %v466_v27  ;;  %v6861_v38 = vsel %vm501_vm0, %v466_v27, %v467_v33  ;;  %v469_v45 = vrot.slane %v6865_v41, 7  ;;  %v1309_v48 = vld [vmem:[#allocation7 + $0x190] sm:$0xff]  ;;  %v6887_v56 = vld [vmem:[%s6723_s10 + $0x40] sm:$0xff]  ;;  %v1314_v6 = vld [vmem:[#allocation7 + $0x1b8] sm:$0xff] }
  0xa1   : > { %8930 = vst [vmem:[#allocation28_spill] sm:$0xff] %v6850_v32  ;;  %8931 = vst [vmem:[#allocation29_spill] sm:$0xff] %v6861_v38  ;;  %v6872_v44 = vsel %vm501_vm0, %v467_v33, %v468_v39  ;;  %v5378_v55 = vpack.c.bf16 %v1310_v49, %v1309_v48  ;;  %v471_v63 = vrot.slane %v6887_v56, 7  ;;  %v1313_v5 = vld [vmem:[#allocation7 + $0x1b0] sm:$0xff]  ;;  %v1315_v15 = vld [vmem:[#allocation7 + $0x1c0] sm:$0xff] }
  0xa2   : > { %8932 = vst [vmem:[#allocation30_spill] sm:$0xff] %v6872_v44  ;;  %v5384_v11 = vpack.c.bf16 %v1314_v6, %v1313_v5  ;;  %v6909_v13 = vld [vmem:[%s6723_s10 + $0x50] sm:$0xff]  ;;  %v1319_v33 = vld [vmem:[#allocation7 + $0x1e0] sm:$0xff]  ;;  %v7066_v53 = vld [vmem:[%s6723_s10 + $0xa8] sm:$0xff] }
  0xa3   : > { %5319 = vmatpush1.bf16.msra.mxu0 %v5318_v19  ;;  %5771 = vmatpush1.bf16.msra.mxu1 %v5318_v19  ;;  %v1300_v19 = vld [vmem:[#allocation7 + $0x148] sm:$0xff]  ;;  %v6953_v49 = vld [vmem:[%s6723_s10 + $0x70] sm:$0xff]  ;;  %8958 = vst [vmem:[#allocation56_spill] sm:$0xff] %v7066_v53 }
  0xa4   : > { %5320 = vmatprep.subr.bf16.mxu0 %v8773_v0  ;;  %5756 = vmatprep.subr.bf16.mxu1 %v8773_v0  ;;  %v1360_v51 = vld [vmem:[#allocation7 + $0x328] sm:$0xff] }
  0xa7   : > { %5322 = vmatpush1.bf16.msra.mxu0 %v5321_v22  ;;  %5772 = vmatpush1.bf16.msra.mxu1 %v5321_v22  ;;  %v5363_v22 = vpack.c.bf16 %v1300_v19, %v1299_v18  ;;  %v473_v19 = vrot.slane %v6909_v13, 7 }
  0xa8   : > { %5323 = vmatprep.subr.bf16.mxu0 %v8773_v0  ;;  %5757 = vmatprep.subr.bf16.mxu1 %v8773_v0 }
  0xab   : > { %5325 = vmatpush1.bf16.msra.mxu0 %v5324_v25  ;;  %5773 = vmatpush1.bf16.msra.mxu1 %v5324_v25  ;;  %v1302_v25 = vld [vmem:[#allocation7 + $0x158] sm:$0xff] }
  0xac   : > { %5326 = vmatprep.subr.bf16.mxu0 %v8773_v0  ;;  %5758 = vmatprep.subr.bf16.mxu1 %v8773_v0 }
  0xaf   : > { %5328 = vmatpush1.bf16.msra.mxu0 %v5327_v28  ;;  %5774 = vmatpush1.bf16.msra.mxu1 %v5327_v28  ;;  %v5366_v28 = vpack.c.bf16 %v1302_v25, %v1301_v24  ;;  %v1317_v24 = vld [vmem:[#allocation7 + $0x1d0] sm:$0xff]  ;;  %v1318_v25 = vld [vmem:[#allocation7 + $0x1d8] sm:$0xff] }
  0xb0   : > { %5329 = vmatprep.subr.bf16.mxu0 %v8773_v0  ;;  %5759 = vmatprep.subr.bf16.mxu1 %v8773_v0 }
  0xb3   : > { %5331 = vmatpush1.bf16.msra.mxu0 %v5330_v31  ;;  %5775 = vmatpush1.bf16.msra.mxu1 %v5330_v31  ;;  %v1304_v31 = vld [vmem:[#allocation7 + $0x168] sm:$0xff] }
  0xb4   : > { %5332 = vmatprep.subr.bf16.mxu0 %v8773_v0  ;;  %5760 = vmatprep.subr.bf16.mxu1 %v8773_v0 }
  0xb7   : > { %5334 = vmatpush1.bf16.msra.mxu0 %v5333_v34  ;;  %5776 = vmatpush1.bf16.msra.mxu1 %v5333_v34  ;;  %v5369_v34 = vpack.c.bf16 %v1304_v31, %v1303_v30  ;;  %v5390_v30 = vpack.c.bf16 %v1318_v25, %v1317_v24  ;;  %v6931_v31 = vld [vmem:[%s6723_s10 + $0x60] sm:$0xff]  ;;  %v7004_v25 = vld [vmem:[%s6723_s10 + $0x90] sm:$0xff] }
  0xb8   : > { %5335 = vmatprep.subr.bf16.mxu0 %v8773_v0  ;;  %5761 = vmatprep.subr.bf16.mxu1 %v8773_v0  ;;  %8946 = vst [vmem:[#allocation44_spill] sm:$0xff] %v7004_v25 }
  0xbb   : > { %5337 = vmatpush1.bf16.msra.mxu0 %v5336_v37  ;;  %5777 = vmatpush1.bf16.msra.mxu1 %v5336_v37  ;;  %v1306_v37 = vld [vmem:[#allocation7 + $0x178] sm:$0xff] }
  0xbc   : > { %5338 = vmatprep.subr.bf16.mxu0 %v8773_v0  ;;  %5762 = vmatprep.subr.bf16.mxu1 %v8773_v0 }
  0xbf   : > { %5340 = vmatpush1.bf16.msra.mxu0 %v5339_v40  ;;  %5778 = vmatpush1.bf16.msra.mxu1 %v5339_v40  ;;  %v5372_v40 = vpack.c.bf16 %v1306_v37, %v1305_v36  ;;  %v475_v37 = vrot.slane %v6931_v31, 7 }
  0xc0   : > { %5341 = vmatprep.subr.bf16.mxu0 %v8773_v0  ;;  %5763 = vmatprep.subr.bf16.mxu1 %v8773_v0 }
  0xc3   : > { %5343 = vmatpush1.bf16.msra.mxu0 %v5342_v43  ;;  %5779 = vmatpush1.bf16.msra.mxu1 %v5342_v43  ;;  %v1308_v43 = vld [vmem:[#allocation7 + $0x188] sm:$0xff] }
  0xc4   : > { %5344 = vmatprep.subr.bf16.mxu0 %v8773_v0  ;;  %5764 = vmatprep.subr.bf16.mxu1 %v8773_v0  ;;  %v5375_v46 = vpack.c.bf16 %v1308_v43, %v1307_v42  ;;  %v1321_v42 = vld [vmem:[#allocation7 + $0x1f0] sm:$0xff]  ;;  %v1322_v43 = vld [vmem:[#allocation7 + $0x1f8] sm:$0xff] }
  0xc5   : > { %v5396_v48 = vpack.c.bf16 %v1322_v43, %v1321_v42  ;;  %v7033_v43 = vld [vmem:[%s6723_s10 + $0xd0] sm:$0xff] }
  0xc6   : > { %8952 = vst [vmem:[#allocation50_spill] sm:$0xff] %v7033_v43 }
  0xc7   : > { %5346 = vmatpush1.bf16.msra.mxu0 %v5345_v47  ;;  %5780 = vmatpush1.bf16.msra.mxu1 %v5345_v47  ;;  %v6876_v47 = vld [vmem:[%s6723_s10 + $0x38] sm:$0xff] }
  0xc8   : > { %5347 = vmatprep.subr.bf16.mxu0 %v8773_v0  ;;  %5765 = vmatprep.subr.bf16.mxu1 %v8773_v0  ;;  %v470_v54 = vrot.slane %v6876_v47, 7 }
  0xca   : > { %v6894_v62 = vsel %vm501_vm0, %v469_v45, %v470_v54  ;;  %v6905_v8 = vsel %vm501_vm0, %v470_v54, %v471_v63 }
  0xcb   : > { %5349 = vmatpush1.bf16.msra.mxu0 %v5348_v52  ;;  %5781 = vmatpush1.bf16.msra.mxu1 %v5348_v52  ;;  %v6883_v52 = vsel %vm501_vm0, %v468_v39, %v469_v45  ;;  %8934 = vst [vmem:[#allocation32_spill] sm:$0xff] %v6894_v62  ;;  %8935 = vst [vmem:[#allocation33_spill] sm:$0xff] %v6905_v8 }
  0xcc   : > { %5350 = vmatprep.subr.bf16.mxu0 %v8773_v0  ;;  %8933 = vst [vmem:[#allocation31_spill] sm:$0xff] %v6883_v52 }
  0xce   : > { %1468 = vmatmul.mubr.f32.vlgmr.msra.gmra.mrb[0].mxu0 %v6784_v58  ;;  %v7086_v58 = vld [vmem:[%s6723_s10 + $0xb0] sm:$0xff] }
  0xcf   : > { %5352 = vmatpush1.bf16.msra.mxu0 %v5351_v59  ;;  %1472 = vmatprep.mubr.f32.mxu0 %v6777_v57  ;;  %v1311_v59 = vld [vmem:[#allocation7 + $0x1a0] sm:$0xff]  ;;  %8962 = vst [vmem:[#allocation60_spill] sm:$0xff] %v7086_v58 }
  0xd0   : > { %5353 = vmatprep.subr.bf16.mxu0 %v8773_v0  ;;  %v5381_v2 = vpack.c.bf16 %v1312_v60, %v1311_v59  ;;  %v6964_v59 = vld [vmem:[%s6723_s10 + $0x78] sm:$0xff] }
  0xd2   : > { %1473 = vmatmul.mubr.f32.gmra.mrb[2].mxu0 %v6795_v1 }
  0xd3   : > { %1477 = vmatprep.mubr.f32.mxu0 %v6789_v61  ;;  %5355 = vmatpush1.bf16.msra.mxu0 %v5354_v3  ;;  %v6898_v3 = vld [vmem:[%s6723_s10 + $0x48] sm:$0xff] }
  0xd4   : > { %5356 = vmatprep.subr.bf16.mxu0 %v8773_v0 }
  0xd6   : > { %1478 = vmatmul.mubr.f32.gmra.mrb[4].mxu0 %v6806_v7  ;;  %v7073_v7 = vld [vmem:[%s6723_s10 + $0xe0] sm:$0xff] }
  0xd7   : > { %1482 = vmatprep.mubr.f32.mxu0 %v6800_v4  ;;  %5358 = vmatpush1.bf16.msra.mxu0 %v5357_v9  ;;  %v472_v9 = vrot.slane %v6898_v3, 7  ;;  %8960 = vst [vmem:[#allocation58_spill] sm:$0xff] %v7073_v7  ;;  %v491_v1 = vrot.slane %v7073_v7, 7 }
  0xd8   : > { %5359 = vmatprep.subr.bf16.mxu0 %v8773_v0 }
  0xd9   : > { %v6916_v18 = vsel %vm501_vm0, %v471_v63, %v472_v9  ;;  %v6927_v27 = vsel %vm501_vm0, %v472_v9, %v473_v19  ;;  %v478_v63 = vrot.slane %v6964_v59, 7  ;;  %v6985_v9 = vld [vmem:[%s6723_s10 + $0xb8] sm:$0xff] }
  0xda   : > { %1483 = vmatmul.mubr.f32.gmra.mrb[6].mxu0 %v6817_v14  ;;  %8936 = vst [vmem:[#allocation34_spill] sm:$0xff] %v6916_v18  ;;  %8937 = vst [vmem:[#allocation35_spill] sm:$0xff] %v6927_v27 }
  0xdb   : > { %1487 = vmatprep.mubr.f32.mxu0 %v6811_v10  ;;  %5361 = vmatpush1.bf16.msra.mxu0 %v5360_v16  ;;  %v1316_v16 = vld [vmem:[#allocation7 + $0x1c8] sm:$0xff]  ;;  %8943 = vst [vmem:[#allocation41_spill] sm:$0xff] %v6985_v9 }
  0xdc   : > { %5362 = vmatprep.subr.bf16.mxu0 %v8773_v0  ;;  %v5387_v21 = vpack.c.bf16 %v1316_v16, %v1315_v15  ;;  %v6991_v15 = vld [vmem:[%s6723_s10 + $0xc0] sm:$0xff]  ;;  %v8776_v16 = vrot.slane %v6985_v9, 7 }
  0xdd   : > { %8944 = vst [vmem:[#allocation42_spill] sm:$0xff] %v6991_v15  ;;  %1602 = vmatprep.mubr.f32.mxu1 %v6991_v15 }
  0xde   : > { %1488 = vmatmul.mubr.f32.gmra.mrb[8].mxu0 %v6828_v20 }
  0xdf   : > { %1492 = vmatprep.mubr.f32.mxu0 %v6821_v17  ;;  %5364 = vmatpush1.bf16.msra.mxu0 %v5363_v22  ;;  %v6920_v22 = vld [vmem:[%s6723_s10 + $0x58] sm:$0xff] }
  0xe0   : > { %5365 = vmatprep.subr.bf16.mxu0 %v8773_v0 }
  0xe2   : > { %1493 = vmatmul.mubr.f32.gmra.mrb[10].mxu0 %v6839_v26 }
  0xe3   : > { %1497 = vmatprep.mubr.f32.mxu0 %v6832_v23  ;;  %5367 = vmatpush1.bf16.msra.mxu0 %v5366_v28  ;;  %v474_v28 = vrot.slane %v6920_v22, 7 }
  0xe4   : > { %5368 = vmatprep.subr.bf16.mxu0 %v8773_v0 }
  0xe5   : > { %v6938_v36 = vsel %vm501_vm0, %v473_v19, %v474_v28  ;;  %v6949_v45 = vsel %vm501_vm0, %v474_v28, %v475_v37  ;;  %v487_v19 = vrot.slane %v6991_v15, 7  ;;  %v1324_v15 = vld [vmem:[#allocation7 + $0x208] sm:$0xff] }
  0xe6   : > { %1498 = vmatmul.mubr.f32.gmra.mrb[12].mxu0 %v6850_v32  ;;  %8938 = vst [vmem:[#allocation36_spill] sm:$0xff] %v6938_v36  ;;  %8939 = vst [vmem:[#allocation37_spill] sm:$0xff] %v6949_v45 }
  0xe7   : > { %1502 = vmatprep.mubr.f32.mxu0 %v6843_v29  ;;  %5370 = vmatpush1.bf16.msra.mxu0 %v5369_v34  ;;  %v1320_v34 = vld [vmem:[#allocation7 + $0x1e8] sm:$0xff]  ;;  %v7010_v28 = vsel %vm501_vm0, %v8776_v16, %v487_v19 }
  0xe8   : > { %5371 = vmatprep.subr.bf16.mxu0 %v8773_v0  ;;  %v5393_v39 = vpack.c.bf16 %v1320_v34, %v1319_v33  ;;  %8947 = vst [vmem:[#allocation45_spill] sm:$0xff] %v7010_v28  ;;  %1603 = vmatmul.mubr.f32.vlgmr.msra.gmra.mrb[0].mxu1 %v7010_v28 }
  0xea   : > { %1503 = vmatmul.mubr.f32.gmra.mrb[14].mxu0 %v6861_v38 }
  0xeb   : > { %1507 = vmatprep.mubr.f32.mxu0 %v6854_v35  ;;  %5373 = vmatpush1.bf16.msra.mxu0 %v5372_v40  ;;  %v6942_v40 = vld [vmem:[%s6723_s10 + $0x68] sm:$0xff] }
  0xec   : > { %5374 = vmatprep.subr.bf16.mxu0 %v8773_v0 }
  0xee   : > { %1508 = vmatmul.mubr.f32.gmra.mrb[16].mxu0 %v6872_v44 }
  0xef   : > { %1512 = vmatprep.mubr.f32.mxu0 %v6865_v41  ;;  %5376 = vmatpush1.bf16.msra.mxu0 %v5375_v46  ;;  %v476_v46 = vrot.slane %v6942_v40, 7 }
  0xf0   : > { %5377 = vmatprep.subr.bf16.mxu0 %v8773_v0 }
  0xf1   : > { %v6960_v54 = vsel %vm501_vm0, %v475_v37, %v476_v46  ;;  %v481_v37 = vrot.slane %v7004_v25, 7 }
  0xf2   : > { %1513 = vmatmul.mubr.f32.gmra.mrb[18].mxu0 %v6883_v52  ;;  %8940 = vst [vmem:[#allocation38_spill] sm:$0xff] %v6960_v54 }
  0xf3   : > { %1517 = vmatprep.mubr.f32.mxu0 %v6876_v47  ;;  %5379 = vmatpush1.bf16.msra.mxu0 %v5378_v55  ;;  %v477_v55 = vrot.slane %v6953_v49, 7 }
  0xf4   : > { %5380 = vmatprep.subr.bf16.mxu0 %v8773_v0 }
  0xf5   : > { %v6971_v60 = vsel %vm501_vm0, %v476_v46, %v477_v55  ;;  %v6981_v5 = vsel %vm501_vm0, %v477_v55, %v478_v63  ;;  %v489_v46 = vrot.slane %v7033_v43, 7 }
  0xf6   : > { %1518 = vmatmul.mubr.f32.gmra.mrb[20].mxu0 %v6894_v62  ;;  %8941 = vst [vmem:[#allocation39_spill] sm:$0xff] %v6971_v60  ;;  %8942 = vst [vmem:[#allocation40_spill] sm:$0xff] %v6981_v5 }
  0xf7   : > { %1522 = vmatprep.mubr.f32.mxu0 %v6887_v56  ;;  %5382 = vmatpush1.bf16.msra.mxu0 %v5381_v2  ;;  %v6975_v2 = vld [vmem:[%s6723_s10 + $0x80] sm:$0xff] }
  0xf8   : > { %5383 = vmatprep.subr.bf16.mxu0 %v8773_v0  ;;  %v479_v6 = vrot.slane %v6975_v2, 7 }
  0xfa   : > { %1523 = vmatmul.mubr.f32.gmra.mrb[22].mxu0 %v6905_v8 }
  0xfb   : > { %1527 = vmatprep.mubr.f32.mxu0 %v6898_v3  ;;  %5385 = vmatpush1.bf16.msra.mxu0 %v5384_v11  ;;  %v6988_v11 = vld [vmem:[%s6723_s10 + $0x88] sm:$0xff] }
  0xfc   : > { %5386 = vmatprep.subr.bf16.mxu0 %v8773_v0  ;;  %v480_v24 = vrot.slane %v6988_v11, 7 }
  0xfe   : > { %1528 = vmatmul.mubr.f32.gmra.mrb[24].mxu0 %v6916_v18  ;;  %v7022_v34 = vsel %vm501_vm0, %v479_v6, %v480_v24 }
  0xff   : > { %1532 = vmatprep.mubr.f32.mxu0 %v6909_v13  ;;  %5388 = vmatpush1.bf16.msra.mxu0 %v5387_v21  ;;  %v7000_v21 = vsel %vm501_vm0, %v478_v63, %v479_v6  ;;  %8949 = vst [vmem:[#allocation47_spill] sm:$0xff] %v7022_v34  ;;  %v7046_v63 = vld [vmem:[%s6723_s10 + $0xa0] sm:$0xff] }
 0x100   : > { %5389 = vmatprep.subr.bf16.mxu0 %v8773_v0  ;;  %8945 = vst [vmem:[#allocation43_spill] sm:$0xff] %v7000_v21  ;;  %8954 = vst [vmem:[#allocation52_spill] sm:$0xff] %v7046_v63 }
 0x102   : > { %1533 = vmatmul.mubr.f32.gmra.mrb[26].mxu0 %v6927_v27 }
 0x103   : > { %1537 = vmatprep.mubr.f32.mxu0 %v6920_v22  ;;  %5391 = vmatpush1.bf16.msra.mxu0 %v5390_v30  ;;  %v7013_v30 = vld [vmem:[%s6723_s10 + $0xc8] sm:$0xff] }
 0x104   : > { %5392 = vmatprep.subr.bf16.mxu0 %v8773_v0  ;;  %8948 = vst [vmem:[#allocation46_spill] sm:$0xff] %v7013_v30  ;;  %v488_v33 = vrot.slane %v7013_v30, 7  ;;  %1607 = vmatprep.mubr.f32.mxu1 %v7013_v30  ;;  %v7126_v30 = vld [vmem:[%s6723_s10 + $0xf8] sm:$0xff] }
 0x105   : > { %8970 = vst [vmem:[#allocation68_spill] sm:$0xff] %v7126_v30 }
 0x106   : > { %1538 = vmatmul.mubr.f32.gmra.mrb[28].mxu0 %v6938_v36  ;;  %v7030_v42 = vsel %vm501_vm0, %v487_v19, %v488_v33  ;;  %v7050_v6 = vsel %vm501_vm0, %v488_v33, %v489_v46  ;;  %v7053_v19 = vld [vmem:[%s6723_s10 + $0xd8] sm:$0xff]  ;;  %v483_v33 = vrot.slane %v7046_v63, 7 }
 0x107   : > { %1542 = vmatprep.mubr.f32.mxu0 %v6931_v31  ;;  %5394 = vmatpush1.bf16.msra.mxu0 %v5393_v39  ;;  %v7026_v39 = vld [vmem:[%s6723_s10 + $0x98] sm:$0xff]  ;;  %8951 = vst [vmem:[#allocation49_spill] sm:$0xff] %v7030_v42  ;;  %8955 = vst [vmem:[#allocation53_spill] sm:$0xff] %v7050_v6 }
 0x108   : > { %5395 = vmatprep.subr.bf16.mxu0 %v8773_v0  ;;  %8950 = vst [vmem:[#allocation48_spill] sm:$0xff] %v7026_v39  ;;  %1608 = vmatmul.mubr.f32.gmra.mrb[2].mxu1 %v7030_v42  ;;  %v482_v55 = vrot.slane %v7026_v39, 7  ;;  %8956 = vst [vmem:[#allocation54_spill] sm:$0xff] %v7053_v19 }
 0x109   : > { %1612 = vmatprep.mubr.f32.mxu1 %v7033_v43  ;;  %v7093_v43 = vld [vmem:[%s6723_s10 + $0xe8] sm:$0xff] }
 0x10a   : > { %1543 = vmatmul.mubr.f32.gmra.mrb[30].mxu0 %v6949_v45  ;;  %8964 = vst [vmem:[#allocation62_spill] sm:$0xff] %v7093_v43 }
 0x10b   : > { %1547 = vmatprep.mubr.f32.mxu0 %v6942_v40  ;;  %5397 = vmatpush1.bf16.msra.mxu0 %v5396_v48  ;;  %v7042_v48 = vsel %vm501_vm0, %v480_v24, %v481_v37  ;;  %v7062_v24 = vsel %vm501_vm0, %v481_v37, %v482_v55  ;;  %v7082_v37 = vsel %vm501_vm0, %v482_v55, %v483_v33 }
 0x10c   : > { %5398 = vmatprep.subr.bf16.mxu0 %v8773_v0  ;;  %8953 = vst [vmem:[#allocation51_spill] sm:$0xff] %v7042_v48  ;;  %1613 = vmatmul.mubr.f32.gmra.mrb[4].mxu1 %v7050_v6  ;;  %v490_v0 = vrot.slane %v7053_v19, 7  ;;  %8957 = vst [vmem:[#allocation55_spill] sm:$0xff] %v7062_v24  ;;  %v644_v6 = vrot.slane %v6777_v57, 1 }
 0x10d   : > { %1617 = vmatprep.mubr.f32.mxu1 %v7053_v19  ;;  %8961 = vst [vmem:[#allocation59_spill] sm:$0xff] %v7082_v37 }
 0x10e   : > { %1548 = vmatmul.mubr.f32.gmra.mrb[32].mxu0 %v6960_v54  ;;  %v7070_v16 = vsel %vm501_vm0, %v489_v46, %v490_v0  ;;  %v484_v46 = vrot.slane %v7066_v53, 7  ;;  %v7090_v19 = vsel %vm501_vm0, %v490_v0, %v491_v1  ;;  %v485_v0 = vrot.slane %v7086_v58, 7 }
 0x10f   : > { %1552 = vmatprep.mubr.f32.mxu0 %v6953_v49  ;;  %8959 = vst [vmem:[#allocation57_spill] sm:$0xff] %v7070_v16  ;;  %8963 = vst [vmem:[#allocation61_spill] sm:$0xff] %v7090_v19 }
 0x110   : > { %1618 = vmatmul.mubr.f32.gmra.mrb[6].mxu1 %v7070_v16  ;;  %v7102_v55 = vsel %vm501_vm0, %v483_v33, %v484_v46  ;;  %v7119_v33 = vsel %vm501_vm0, %v484_v46, %v485_v0 }
 0x111   : > { %1622 = vmatprep.mubr.f32.mxu1 %v7073_v7  ;;  %v492_v7 = vrot.slane %v7093_v43, 7  ;;  %8965 = vst [vmem:[#allocation63_spill] sm:$0xff] %v7102_v55  ;;  %8968 = vst [vmem:[#allocation66_spill] sm:$0xff] %v7119_v33 }
 0x112   : > { %1553 = vmatmul.mubr.f32.gmra.mrb[34].mxu0 %v6971_v60 }
 0x113   : > { %1557 = vmatprep.mubr.f32.mxu0 %v6964_v59  ;;  %v7107_v16 = vsel %vm501_vm0, %v491_v1, %v492_v7 }
 0x114   : > { %1623 = vmatmul.mubr.f32.gmra.mrb[8].mxu1 %v7090_v19  ;;  %8966 = vst [vmem:[#allocation64_spill] sm:$0xff] %v7107_v16  ;;  %v7110_v19 = vld [vmem:[%s6723_s10 + $0xf0] sm:$0xff] }
 0x115   : > { %1627 = vmatprep.mubr.f32.mxu1 %v7093_v43  ;;  %8967 = vst [vmem:[#allocation65_spill] sm:$0xff] %v7110_v19  ;;  %v493_v43 = vrot.slane %v7110_v19, 7 }
 0x116   : > { %1558 = vmatmul.mubr.f32.gmra.mrb[36].mxu0 %v6981_v5 }
 0x117   : > { %1562 = vmatprep.mubr.f32.mxu0 %v6975_v2  ;;  %v7123_v1 = vsel %vm501_vm0, %v492_v7, %v493_v43  ;;  %v8810_v7 = vrot.slane %v6740_v12, 1 }
 0x118   : > { %1628 = vmatmul.mubr.f32.gmra.mrb[10].mxu1 %v7107_v16  ;;  %8969 = vst [vmem:[#allocation67_spill] sm:$0xff] %v7123_v1  ;;  %v494_v16 = vrot.slane %v7126_v30, 7 }
 0x119   : > { %1632 = vmatprep.mubr.f32.mxu1 %v7110_v19  ;;  %v8971_v19 = vrot.slane %v6985_v9, 7  ;;  %v7155_v57 = vsel %vm646_vm1, %v8810_v7, %v644_v6  ;;  %v611_v7 = vrot.slane %v6811_v10, 1 }
 0x11a   : > { %1563 = vmatmul.mubr.f32.gmra.mrb[38].mxu0 %v7000_v21  ;;  %v7144_v42 = vsel %vm501_vm0, %v493_v43, %v494_v16  ;;  %8974 = vst [vmem:[#allocation71_spill] sm:$0xff] %v7155_v57  ;;  %v645_v43 = vrot.slane %v6789_v61, 1 }
 0x11b   : > { %1567 = vmatprep.mubr.f32.mxu0 %v6988_v11  ;;  %v7137_v46 = vsel %vm501_vm0, %v485_v0, %v8971_v19  ;;  %8973 = vst [vmem:[#allocation70_spill] sm:$0xff] %v7144_v42  ;;  %v613_v0 = vrot.slane %v6832_v23, 1 }
 0x11c   : > { %1633 = vmatmul.mubr.f32.gmra.mrb[12].mxu1 %v7123_v1  ;;  %8972 = vst [vmem:[#allocation69_spill] sm:$0xff] %v7137_v46  ;;  %v1323_v1 = vld [vmem:[#allocation7 + $0x200] sm:$0xff]  ;;  %v7177_v61 = vsel %vm646_vm1, %v644_v6, %v645_v43 }
 0x11d   : > { %1637 = vmatprep.mubr.f32.mxu1 %v7126_v30  ;;  %v5399_v19 = vpack.c.bf16 %v1324_v15, %v1323_v1  ;;  %v1325_v30 = vld [vmem:[#allocation7 + $0x210] sm:$0xff]  ;;  %8978 = vst [vmem:[#allocation73_spill] sm:$0xff] %v7177_v61  ;;  %v610_v15 = vrot.slane %v6800_v4, 1  ;;  %v1328_v1 = vld [vmem:[#allocation7 + $0x228] sm:$0xff] }
 0x11e   : > { %1568 = vmatmul.mubr.f32.gmra.mrb[40].mxu0 %v7022_v34 }
 0x11f   : > { %1572 = vmatprep.mubr.f32.mxu0 %v7004_v25 }
 0x120   : > { %1638 = vmatmul.mubr.f32.gmra.mrb[14].mxu1 %v7144_v42  ;;  %v8975_v42 = vrot.slane %v6767_v50, 7 }
 0x121   : > { %1642 = vmatprep.mubr.f32.mxu1 %v6767_v50 }
 0x122   : > { %1573 = vmatmul.mubr.f32.gmra.mrb[42].mxu0 %v7042_v48  ;;  %v7163_v28 = vsel %vm501_vm0, %v494_v16, %v8975_v42  ;;  %v8979_v42 = vmov 0.0|0.0  }
 0x123   : > { %1577 = vmatprep.mubr.f32.mxu0 %v7026_v39  ;;  %8976 = vst [vmem:[#allocation72_spill] sm:$0xff] %v7163_v28 }
 0x124   : > { %1643 = vmatmul.mubr.f32.gmra.mrb[16].mxu1 %v7163_v28 }
 0x126   : > { %1578 = vmatmul.mubr.f32.gmra.mrb[44].mxu0 %v7062_v24 }
 0x127   : > { %1582 = vmatprep.mubr.f32.mxu0 %v7046_v63 }
 0x12a   : > { %1583 = vmatmul.mubr.f32.gmra.mrb[46].mxu0 %v7082_v37 }
 0x12b   : > { %1587 = vmatprep.mubr.f32.mxu0 %v7066_v53 }
 0x12e   : > { %1588 = vmatmul.mubr.f32.gmra.mrb[48].mxu0 %v7102_v55 }
 0x12f   : > { %1592 = vmatprep.mubr.f32.mxu0 %v7086_v58 }
 0x132   : > { %1593 = vmatmul.mubr.f32.gmra.mrb[50].mxu0 %v7119_v33 }
 0x133   : > { %1597 = vmatprep.mubr.f32.mxu0 %v6985_v9  ;;  %v1326_v9 = vld [vmem:[#allocation7 + $0x218] sm:$0xff] }
 0x134   : > { %v5402_v16 = vpack.c.bf16 %v1326_v9, %v1325_v30  ;;  %v1330_v9 = vld [vmem:[#allocation7 + $0x238] sm:$0xff]  ;;  %v7193_v30 = vsel %vm646_vm1, %v610_v15, %v611_v7 }
 0x136   : > { %1598 = vmatmul.mubr.f32.gmra.mrb[52].mxu0 %v7137_v46 }
 0x137   : > { %1712 = vmatprep.mubr.f32.mxu0 %v6817_v14  ;;  %v8977_v14 = vrot.slane %v6843_v29, 1 }
 0x139   : > { %v7169_v12 = vsel %vm646_vm1, %v613_v0, %v8977_v14  ;;  %v1327_v14 = vld [vmem:[#allocation7 + $0x220] sm:$0xff] }
 0x13a   : > { %1713 = vmatmul.mubr.f32.vlgmr.msra.gmra.mrb[54].mxu0 %v7155_v57  ;;  %5180 = vmatprep.mubr.f32.mxu1 %v7169_v12  ;;  %v5405_v6 = vpack.c.bf16 %v1328_v1, %v1327_v14  ;;  %v1332_v14 = vld [vmem:[#allocation7 + $0x248] sm:$0xff]  ;;  %v9000_v57 = vld [vmem:[#allocation22_spill] sm:$0xff] }
 0x13b   : > { %5400 = vmatpush1.bf16.msra.mxu0 %v5399_v19  ;;  %1717 = vmatprep.mubr.f32.mxu0 %v6828_v20  ;;  %v7185_v19 = vsel %vm646_vm1, %v645_v43, %v610_v15  ;;  %v1329_v20 = vld [vmem:[#allocation7 + $0x230] sm:$0xff] }
 0x13c   : > { %5401 = vmatprep.subr.bf16.mxu0 %v8979_v42  ;;  %8980 = vst [vmem:[#allocation74_spill] sm:$0xff] %v7185_v19  ;;  %v5408_v43 = vpack.c.bf16 %v1330_v9, %v1329_v20  ;;  %v1333_v15 = vld [vmem:[#allocation7 + $0x250] sm:$0xff]  ;;  %v1336_v9 = vld [vmem:[#allocation7 + $0x268] sm:$0xff] }
 0x13e   : > { %1718 = vmatmul.mubr.f32.gmra.mrb[56].mxu0 %v7177_v61  ;;  %v1387_v61 = vld [vmem:[#allocation7 + $0x400] sm:$0xff] }
 0x13f   : > { %1722 = vmatprep.mubr.f32.mxu0 %v6839_v26  ;;  %5403 = vmatpush1.bf16.msra.mxu0 %v5402_v16  ;;  %v612_v26 = vrot.slane %v6821_v17, 1  ;;  %v1331_v16 = vld [vmem:[#allocation7 + $0x240] sm:$0xff] }
 0x140   : > { %5404 = vmatprep.subr.bf16.mxu0 %v8979_v42 }
 0x141   : > { %v7201_v1 = vsel %vm646_vm1, %v611_v7, %v612_v26  ;;  %v7208_v20 = vsel %vm646_vm1, %v612_v26, %v613_v0  ;;  %v1335_v7 = vld [vmem:[#allocation7 + $0x260] sm:$0xff]  ;;  %v8981_v26 = vrot.slane %v6843_v29, 1  ;;  %v616_v0 = vrot.slane %v6865_v41, 1 }
 0x142   : > { %1723 = vmatmul.mubr.f32.gmra.mrb[4].mxu0 %v7185_v19  ;;  %v1334_v19 = vld [vmem:[#allocation7 + $0x258] sm:$0xff] }
 0x143   : > { %1727 = vmatprep.mubr.f32.mxu0 %v6850_v32  ;;  %5406 = vmatpush1.bf16.msra.mxu0 %v5405_v6  ;;  %v5411_v32 = vpack.c.bf16 %v1332_v14, %v1331_v16  ;;  %v5414_v6 = vpack.c.bf16 %v1334_v19, %v1333_v15  ;;  %v5417_v16 = vpack.c.bf16 %v1336_v9, %v1335_v7  ;;  %v1337_v14 = vld [vmem:[#allocation7 + $0x270] sm:$0xff]  ;;  %v1339_v15 = vld [vmem:[#allocation7 + $0x280] sm:$0xff]  ;;  %v617_v9 = vrot.slane %v6876_v47, 1 }
 0x144   : > { %5407 = vmatprep.subr.bf16.mxu0 %v8979_v42 }
 0x146   : > { %1728 = vmatmul.mubr.f32.gmra.mrb[6].mxu0 %v7193_v30 }
 0x147   : > { %1732 = vmatprep.mubr.f32.mxu0 %v6861_v38  ;;  %5409 = vmatpush1.bf16.msra.mxu0 %v5408_v43  ;;  %v615_v43 = vrot.slane %v6854_v35, 1 }
 0x148   : > { %5410 = vmatprep.subr.bf16.mxu0 %v8979_v42 }
 0x149   : > { %v7229_v7 = vsel %vm646_vm1, %v615_v43, %v616_v0 }
 0x14a   : > { %1733 = vmatmul.mubr.f32.gmra.mrb[8].mxu0 %v7201_v1 }
 0x14b   : > { %1737 = vmatprep.mubr.f32.mxu0 %v6872_v44  ;;  %5412 = vmatpush1.bf16.msra.mxu0 %v5411_v32  ;;  %v1338_v44 = vld [vmem:[#allocation7 + $0x278] sm:$0xff]  ;;  %v7221_v32 = vsel %vm646_vm1, %v8981_v26, %v615_v43 }
 0x14c   : > { %5413 = vmatprep.subr.bf16.mxu0 %v8979_v42  ;;  %v5420_v19 = vpack.c.bf16 %v1338_v44, %v1337_v14  ;;  %v1342_v44 = vld [vmem:[#allocation7 + $0x298] sm:$0xff]  ;;  %v7237_v14 = vsel %vm646_vm1, %v616_v0, %v617_v9 }
 0x14e   : > { %1738 = vmatmul.mubr.f32.gmra.mrb[10].mxu0 %v7208_v20 }
 0x14f   : > { %1742 = vmatprep.mubr.f32.mxu0 %v6883_v52  ;;  %5415 = vmatpush1.bf16.msra.mxu0 %v5414_v6  ;;  %v1340_v6 = vld [vmem:[#allocation7 + $0x288] sm:$0xff] }
 0x150   : > { %5416 = vmatprep.subr.bf16.mxu0 %v8979_v42  ;;  %v5423_v26 = vpack.c.bf16 %v1340_v6, %v1339_v15  ;;  %v1344_v15 = vld [vmem:[#allocation7 + $0x2a8] sm:$0xff] }
 0x152   : > { %1743 = vmatmul.mubr.f32.gmra.mrb[12].mxu0 %v7169_v12 }
 0x153   : > { %1747 = vmatprep.mubr.f32.mxu0 %v6894_v62  ;;  %5418 = vmatpush1.bf16.msra.mxu0 %v5417_v16  ;;  %v1341_v16 = vld [vmem:[#allocation7 + $0x290] sm:$0xff] }
 0x154   : > { %5419 = vmatprep.subr.bf16.mxu0 %v8979_v42  ;;  %v5426_v43 = vpack.c.bf16 %v1342_v44, %v1341_v16  ;;  %v1346_v16 = vld [vmem:[#allocation7 + $0x2b8] sm:$0xff] }
 0x156   : > { %1748 = vmatmul.mubr.f32.gmra.mrb[14].mxu0 %v7221_v32 }
 0x157   : > { %1752 = vmatprep.mubr.f32.mxu0 %v6905_v8  ;;  %5421 = vmatpush1.bf16.msra.mxu0 %v5420_v19  ;;  %v618_v8 = vrot.slane %v6887_v56, 1  ;;  %v1343_v19 = vld [vmem:[#allocation7 + $0x2a0] sm:$0xff] }
 0x158   : > { %5422 = vmatprep.subr.bf16.mxu0 %v8979_v42  ;;  %v5429_v0 = vpack.c.bf16 %v1344_v15, %v1343_v19  ;;  %v1348_v19 = vld [vmem:[#allocation7 + $0x2c8] sm:$0xff] }
 0x159   : > { %v7245_v6 = vsel %vm646_vm1, %v617_v9, %v618_v8 }
 0x15a   : > { %1753 = vmatmul.mubr.f32.gmra.mrb[16].mxu0 %v7229_v7 }
 0x15b   : > { %1757 = vmatprep.mubr.f32.mxu0 %v6916_v18  ;;  %5424 = vmatpush1.bf16.msra.mxu0 %v5423_v26  ;;  %v619_v18 = vrot.slane %v6898_v3, 1  ;;  %v1345_v26 = vld [vmem:[#allocation7 + $0x2b0] sm:$0xff] }
 0x15c   : > { %5425 = vmatprep.subr.bf16.mxu0 %v8979_v42  ;;  %v5432_v9 = vpack.c.bf16 %v1346_v16, %v1345_v26  ;;  %v1350_v26 = vld [vmem:[#allocation7 + $0x2d8] sm:$0xff] }
 0x15d   : > { %v7253_v44 = vsel %vm646_vm1, %v618_v8, %v619_v18 }
 0x15e   : > { %1758 = vmatmul.mubr.f32.gmra.mrb[18].mxu0 %v7237_v14 }
 0x15f   : > { %1762 = vmatprep.mubr.f32.mxu0 %v6927_v27  ;;  %5427 = vmatpush1.bf16.msra.mxu0 %v5426_v43  ;;  %v620_v27 = vrot.slane %v6909_v13, 1  ;;  %v1347_v43 = vld [vmem:[#allocation7 + $0x2c0] sm:$0xff] }
 0x160   : > { %5428 = vmatprep.subr.bf16.mxu0 %v8979_v42  ;;  %v5435_v8 = vpack.c.bf16 %v1348_v19, %v1347_v43  ;;  %v1352_v43 = vld [vmem:[#allocation7 + $0x2e8] sm:$0xff] }
 0x161   : > { %v7261_v15 = vsel %vm646_vm1, %v619_v18, %v620_v27 }
 0x162   : > { %1763 = vmatmul.mubr.f32.gmra.mrb[20].mxu0 %v7245_v6 }
 0x163   : > { %1767 = vmatprep.mubr.f32.mxu0 %v6938_v36  ;;  %5430 = vmatpush1.bf16.msra.mxu0 %v5429_v0  ;;  %v621_v36 = vrot.slane %v6920_v22, 1  ;;  %v1349_v0 = vld [vmem:[#allocation7 + $0x2d0] sm:$0xff] }
 0x164   : > { %5431 = vmatprep.subr.bf16.mxu0 %v8979_v42  ;;  %v5438_v18 = vpack.c.bf16 %v1350_v26, %v1349_v0  ;;  %v1354_v0 = vld [vmem:[#allocation7 + $0x2f8] sm:$0xff] }
 0x165   : > { %v7269_v16 = vsel %vm646_vm1, %v620_v27, %v621_v36 }
 0x166   : > { %1768 = vmatmul.mubr.f32.gmra.mrb[22].mxu0 %v7253_v44 }
 0x167   : > { %1772 = vmatprep.mubr.f32.mxu0 %v6949_v45  ;;  %5433 = vmatpush1.bf16.msra.mxu0 %v5432_v9  ;;  %v622_v45 = vrot.slane %v6931_v31, 1  ;;  %v1351_v9 = vld [vmem:[#allocation7 + $0x2e0] sm:$0xff] }
 0x168   : > { %5434 = vmatprep.subr.bf16.mxu0 %v8979_v42  ;;  %v5441_v27 = vpack.c.bf16 %v1352_v43, %v1351_v9  ;;  %v625_v9 = vrot.slane %v6964_v59, 1  ;;  %v626_v43 = vrot.slane %v6975_v2, 1 }
 0x169   : > { %v7277_v19 = vsel %vm646_vm1, %v621_v36, %v622_v45 }
 0x16a   : > { %1773 = vmatmul.mubr.f32.gmra.mrb[24].mxu0 %v7261_v15 }
 0x16b   : > { %1777 = vmatprep.mubr.f32.mxu0 %v6960_v54  ;;  %5436 = vmatpush1.bf16.msra.mxu0 %v5435_v8  ;;  %v623_v54 = vrot.slane %v6942_v40, 1  ;;  %v1353_v8 = vld [vmem:[#allocation7 + $0x2f0] sm:$0xff] }
 0x16c   : > { %5437 = vmatprep.subr.bf16.mxu0 %v8979_v42  ;;  %v5444_v36 = vpack.c.bf16 %v1354_v0, %v1353_v8  ;;  %v628_v8 = vrot.slane %v7004_v25, 1  ;;  %v1357_v25 = vld [vmem:[#allocation7 + $0x310] sm:$0xff] }
 0x16d   : > { %v7285_v26 = vsel %vm646_vm1, %v622_v45, %v623_v54 }
 0x16e   : > { %1778 = vmatmul.mubr.f32.gmra.mrb[26].mxu0 %v7269_v16 }
 0x16f   : > { %1782 = vmatprep.mubr.f32.mxu0 %v6971_v60  ;;  %5439 = vmatpush1.bf16.msra.mxu0 %v5438_v18  ;;  %v624_v60 = vrot.slane %v6953_v49, 1 }
 0x170   : > { %5440 = vmatprep.subr.bf16.mxu0 %v8979_v42 }
 0x171   : > { %v7293_v18 = vsel %vm646_vm1, %v623_v54, %v624_v60  ;;  %v7301_v45 = vsel %vm646_vm1, %v624_v60, %v625_v9  ;;  %v7308_v54 = vsel %vm646_vm1, %v625_v9, %v626_v43 }
 0x172   : > { %1783 = vmatmul.mubr.f32.gmra.mrb[28].mxu0 %v7277_v19 }
 0x173   : > { %1787 = vmatprep.mubr.f32.mxu0 %v6981_v5  ;;  %5442 = vmatpush1.bf16.msra.mxu0 %v5441_v27  ;;  %v627_v27 = vrot.slane %v6988_v11, 1  ;;  %v8986_v5 = vld [vmem:[#allocation53_spill] sm:$0xff] }
 0x174   : > { %5443 = vmatprep.subr.bf16.mxu0 %v8979_v42 }
 0x175   : > { %v7315_v60 = vsel %vm646_vm1, %v626_v43, %v627_v27  ;;  %v7322_v0 = vsel %vm646_vm1, %v627_v27, %v628_v8  ;;  %v630_v43 = vrot.slane %v7046_v63, 1 }
 0x176   : > { %1788 = vmatmul.mubr.f32.gmra.mrb[30].mxu0 %v7285_v26 }
 0x177   : > { %1792 = vmatprep.mubr.f32.mxu0 %v7000_v21  ;;  %5445 = vmatpush1.bf16.msra.mxu0 %v5444_v36  ;;  %v629_v36 = vrot.slane %v7026_v39, 1  ;;  %v1390_v39 = vld [vmem:[#allocation7 + $0x418] sm:$0xff] }
 0x178   : > { %5446 = vmatprep.subr.bf16.mxu0 %v8979_v42 }
 0x179   : > { %v7329_v9 = vsel %vm646_vm1, %v628_v8, %v629_v36  ;;  %v7336_v27 = vsel %vm646_vm1, %v629_v36, %v630_v43 }
 0x17a   : > { %1793 = vmatmul.mubr.f32.gmra.mrb[32].mxu0 %v7293_v18 }
 0x17b   : > { %1797 = vmatprep.mubr.f32.mxu0 %v7022_v34  ;;  %v8984_v34 = vld [vmem:[#allocation49_spill] sm:$0xff] }
 0x17e   : > { %1798 = vmatmul.mubr.f32.gmra.mrb[34].mxu0 %v7301_v45 }
 0x17f   : > { %1802 = vmatprep.mubr.f32.mxu0 %v7042_v48 }
 0x182   : > { %1803 = vmatmul.mubr.f32.gmra.mrb[36].mxu0 %v7308_v54 }
 0x183   : > { %1807 = vmatprep.mubr.f32.mxu0 %v7062_v24  ;;  %v8982_v24 = vld [vmem:[#allocation45_spill] sm:$0xff] }
 0x186   : > { %1808 = vmatmul.mubr.f32.gmra.mrb[38].mxu0 %v7315_v60 }
 0x187   : > { %1812 = vmatprep.mubr.f32.mxu0 %v7082_v37  ;;  %v631_v37 = vrot.slane %v7066_v53, 1  ;;  %v8996_v53 = vld [vmem:[#allocation70_spill] sm:$0xff] }
 0x189   : > { %v7343_v8 = vsel %vm646_vm1, %v630_v43, %v631_v37 }
 0x18a   : > { %1813 = vmatmul.mubr.f32.gmra.mrb[40].mxu0 %v7322_v0 }
 0x18b   : > { %1817 = vmatprep.mubr.f32.mxu0 %v7102_v55  ;;  %v632_v55 = vrot.slane %v7086_v58, 1 }
 0x18d   : > { %v7350_v36 = vsel %vm646_vm1, %v631_v37, %v632_v55 }
 0x18e   : > { %1818 = vmatmul.mubr.f32.gmra.mrb[42].mxu0 %v7329_v9 }
 0x18f   : > { %1822 = vmatprep.mubr.f32.mxu0 %v7119_v33  ;;  %v8983_v33 = vld [vmem:[#allocation41_spill] sm:$0xff] }
 0x190   : > { %v633_v48 = vrot.slane %v8983_v33, 1 }
 0x192   : > { %1823 = vmatmul.mubr.f32.gmra.mrb[44].mxu0 %v7336_v27  ;;  %v7357_v43 = vsel %vm646_vm1, %v632_v55, %v633_v48 }
 0x193   : > { %1827 = vmatprep.mubr.f32.mxu0 %v7137_v46  ;;  %v8985_v46 = vld [vmem:[#allocation42_spill] sm:$0xff] }
 0x194   : > { %v634_v21 = vrot.slane %v8985_v46, 1  ;;  %v8989_v46 = vld [vmem:[#allocation50_spill] sm:$0xff] }
 0x195   : > { %v636_v38 = vrot.slane %v8989_v46, 1  ;;  %v8994_v46 = vld [vmem:[#allocation67_spill] sm:$0xff] }
 0x196   : > { %1828 = vmatmul.mubr.f32.gmra.mrb[46].mxu0 %v7343_v8  ;;  %v7364_v37 = vsel %vm646_vm1, %v633_v48, %v634_v21  ;;  %v8990_v48 = vld [vmem:[#allocation61_spill] sm:$0xff] }
 0x197   : > { %1832 = vmatprep.mubr.f32.mxu0 %v8982_v24  ;;  %v8987_v24 = vld [vmem:[#allocation46_spill] sm:$0xff] }
 0x198   : > { %v635_v33 = vrot.slane %v8987_v24, 1 }
 0x19a   : > { %1833 = vmatmul.mubr.f32.gmra.mrb[48].mxu0 %v7350_v36  ;;  %v7371_v55 = vsel %vm646_vm1, %v634_v21, %v635_v33 }
 0x19b   : > { %1837 = vmatprep.mubr.f32.mxu0 %v8984_v34  ;;  %v8988_v34 = vld [vmem:[#allocation57_spill] sm:$0xff] }
 0x19e   : > { %1838 = vmatmul.mubr.f32.gmra.mrb[50].mxu0 %v7357_v43 }
 0x19f   : > { %1842 = vmatprep.mubr.f32.mxu0 %v8986_v5 }
 0x1a1   : > { %v1469_v62 = vpop.f32.mrb[0].mxu0 }
 0x1a2   : > { %v1471_v52 = vpop.f32.mrb[1].mxu0  ;;  %1843 = vmatmul.mubr.f32.gmra.mrb[52].mxu0 %v7364_v37  ;;  %v7378_v62 = vsel %vm646_vm1, %v635_v33, %v636_v38 }
 0x1a3   : > { %1847 = vmatprep.mubr.f32.mxu0 %v8988_v34  ;;  %v8991_v52 = vld [vmem:[#allocation54_spill] sm:$0xff]  ;;  %v8992_v34 = vld [vmem:[#allocation64_spill] sm:$0xff] }
 0x1a4   : > { %v637_v24 = vrot.slane %v8991_v52, 1 }
 0x1a5   : > { %v1474_v58 = vpop.f32.mrb[2].mxu0 }
 0x1a6   : > { %v1476_v5 = vpop.f32.mrb[3].mxu0  ;;  %1848 = vmatmul.mubr.f32.gmra.mrb[58].mxu0 %v7371_v55  ;;  %v7385_v21 = vsel %vm646_vm1, %v636_v38, %v637_v24  ;;  %v8993_v58 = vld [vmem:[#allocation58_spill] sm:$0xff] }
 0x1a7   : > { %1852 = vmatprep.mubr.f32.mxu0 %v8990_v48  ;;  %v638_v5 = vrot.slane %v8993_v58, 1  ;;  %v8995_v48 = vld [vmem:[#allocation62_spill] sm:$0xff] }
 0x1a8   : > { %v639_v52 = vrot.slane %v8995_v48, 1 }
 0x1a9   : > { %v7392_v33 = vsel %vm646_vm1, %v637_v24, %v638_v5 }
 0x1aa   : > { %1853 = vmatmul.mubr.f32.gmra.mrb[60].mxu0 %v7378_v62  ;;  %v7399_v38 = vsel %vm646_vm1, %v638_v5, %v639_v52 }
 0x1ab   : > { %1857 = vmatprep.mubr.f32.mxu0 %v8992_v34  ;;  %v8997_v34 = vld [vmem:[#allocation65_spill] sm:$0xff] }
 0x1ac   : > { %v640_v58 = vrot.slane %v8997_v34, 1  ;;  %v642_v34 = vrot.slane %v6767_v50, 1  ;;  %v9004_v50 = vld [vmem:[#allocation24_spill] sm:$0xff] }
 0x1ae   : > { %1858 = vmatmul.mubr.f32.gmra.mrb[62].mxu0 %v7385_v21  ;;  %v7406_v24 = vsel %vm646_vm1, %v639_v52, %v640_v58  ;;  %v1389_v52 = vld [vmem:[#allocation7 + $0x410] sm:$0xff] }
 0x1af   : > { %1862 = vmatprep.mubr.f32.mxu0 %v8994_v46  ;;  %8998 = vst [vmem:[#allocation41_spill] sm:$0xff] %v7406_v24  ;;  %v8999_v46 = vld [vmem:[#allocation68_spill] sm:$0xff] }
 0x1b0   : > { %v641_v48 = vrot.slane %v8999_v46, 1 }
 0x1b2   : > { %1863 = vmatmul.mubr.f32.gmra.mrb[64].mxu0 %v7392_v33  ;;  %v7413_v5 = vsel %vm646_vm1, %v640_v58, %v641_v48  ;;  %v7420_v46 = vsel %vm646_vm1, %v641_v48, %v642_v34  ;;  %v1391_v58 = vld [vmem:[#allocation7 + $0x420] sm:$0xff]  ;;  %v1356_v48 = vld [vmem:[#allocation7 + $0x308] sm:$0xff] }
 0x1b3   : > { %1867 = vmatprep.mubr.f32.mxu0 %v8996_v53  ;;  %v1388_v53 = vld [vmem:[#allocation7 + $0x408] sm:$0xff]  ;;  %9001 = vst [vmem:[#allocation42_spill] sm:$0xff] %v7413_v5  ;;  %9003 = vst [vmem:[#allocation46_spill] sm:$0xff] %v7420_v46 }
 0x1b4   : > { %v5494_v63 = vpack.c.bf16 %v1388_v53, %v1387_v61  ;;  %v9005_v53 = vld [vmem:[#allocation20_spill] sm:$0xff] }
 0x1b5   : > { %v9006_v61 = vrot.slane %v9005_v53, 1  ;;  %v1358_v53 = vld [vmem:[#allocation7 + $0x318] sm:$0xff] }
 0x1b6   : > { %1868 = vmatmul.mubr.f32.gmra.mrb[66].mxu0 %v7399_v38  ;;  %5495 = vmatprep.subr.bf16.mxu1 %v5494_v63 }
 0x1b7   : > { %1872 = vmatprep.mubr.f32.mxu0 %v7163_v28  ;;  %5497 = vmatpush3.bf16.msra.mxu1 %v5494_v63  ;;  %v9002_v28 = vld [vmem:[#allocation23_spill] sm:$0xff]  ;;  %v7428_v63 = vsel %vm646_vm1, %v642_v34, %v9006_v61  ;;  %v1395_v34 = vld [vmem:[#allocation7 + $0x440] sm:$0xff] }
 0x1b8   : > { %v1359_v61 = vld [vmem:[#allocation7 + $0x320] sm:$0xff] }
 0x1ba   : > { %1873 = vmatmul.mubr.f32.gmra.mrb[68].mxu0 %v7406_v24  ;;  %v1392_v24 = vld [vmem:[#allocation7 + $0x428] sm:$0xff] }
 0x1bb   : > { %1877 = vmatprep.mubr.f32.mxu0 %v9000_v57  ;;  %v5498_v57 = vpack.c.bf16 %v1390_v39, %v1389_v52  ;;  %v1393_v39 = vld [vmem:[#allocation7 + $0x430] sm:$0xff]  ;;  %v1394_v52 = vld [vmem:[#allocation7 + $0x438] sm:$0xff] }
 0x1bd   : > { %5499 = vmatprep.subr.bf16.mxu1 %v5498_v57 }
 0x1be   : > { %1878 = vmatmul.mubr.f32.gmra.mrb[70].mxu0 %v7413_v5  ;;  %5501 = vmatpush3.bf16.msra.mxu1 %v5498_v57  ;;  %v1355_v5 = vld [vmem:[#allocation7 + $0x300] sm:$0xff]  ;;  %v1396_v57 = vld [vmem:[#allocation7 + $0x448] sm:$0xff] }
 0x1bf   : > { %1882 = vmatprep.mubr.f32.mxu0 %v9002_v28  ;;  %v5502_v28 = vpack.c.bf16 %v1392_v24, %v1391_v58  ;;  %v5450_v24 = vpack.c.bf16 %v1358_v53, %v1357_v25  ;;  %v5510_v58 = vpack.c.bf16 %v1396_v57, %v1395_v34  ;;  %v1362_v25 = vld [vmem:[#allocation7 + $0x338] sm:$0xff]  ;;  %v1364_v53 = vld [vmem:[#allocation7 + $0x348] sm:$0xff]  ;;  %v1401_v34 = vld [vmem:[#allocation7 + $0x470] sm:$0xff] }
 0x1c0   : > { %v1402_v57 = vld [vmem:[#allocation7 + $0x478] sm:$0xff] }
 0x1c1   : > { %5503 = vmatprep.subr.bf16.mxu1 %v5502_v28 }
 0x1c2   : > { %1883 = vmatmul.mubr.f32.gmra.mrb[72].mxu0 %v7420_v46  ;;  %v5447_v46 = vpack.c.bf16 %v1356_v48, %v1355_v5  ;;  %5505 = vmatpush3.bf16.msra.mxu1 %v5502_v28  ;;  %v1397_v28 = vld [vmem:[#allocation7 + $0x450] sm:$0xff]  ;;  %v1398_v5 = vld [vmem:[#allocation7 + $0x458] sm:$0xff] }
 0x1c3   : > { %1887 = vmatprep.mubr.f32.mxu0 %v9004_v50  ;;  %v5506_v50 = vpack.c.bf16 %v1394_v52, %v1393_v39  ;;  %v5514_v48 = vpack.c.bf16 %v1398_v5, %v1397_v28  ;;  %v1399_v39 = vld [vmem:[#allocation7 + $0x460] sm:$0xff]  ;;  %v1368_v28 = vld [vmem:[#allocation7 + $0x368] sm:$0xff] }
 0x1c4   : > { %v1363_v52 = vld [vmem:[#allocation7 + $0x340] sm:$0xff] }
 0x1c5   : > { %5507 = vmatprep.subr.bf16.mxu1 %v5506_v50 }
 0x1c6   : > { %1888 = vmatmul.mubr.f32.gmra.mrb[74].mxu0 %v7428_v63  ;;  %5509 = vmatpush3.bf16.msra.mxu1 %v5506_v50  ;;  %v1400_v50 = vld [vmem:[#allocation7 + $0x468] sm:$0xff] }
 0x1c7   : > { %1957 = vmatprep.mubr.f32.mxu0 %v7193_v30  ;;  %5511 = vmatprep.subr.bf16.mxu1 %v5510_v58 }
 0x1ca   : > { %1958 = vmatmul.mubr.f32.vlgmr.msra.gmra.mrb[76].mxu0 %v6800_v4  ;;  %v5453_v4 = vpack.c.bf16 %v1360_v51, %v1359_v61  ;;  %5513 = vmatpush3.bf16.msra.mxu1 %v5510_v58  ;;  %v5518_v51 = vpack.c.bf16 %v1400_v50, %v1399_v39  ;;  %v1366_v58 = vld [vmem:[#allocation7 + $0x358] sm:$0xff]  ;;  %v1367_v61 = vld [vmem:[#allocation7 + $0x360] sm:$0xff] }
 0x1cb   : > { %5448 = vmatpush1.bf16.msra.mxu0 %v5447_v46  ;;  %1962 = vmatprep.mubr.f32.mxu0 %v7201_v1  ;;  %v1361_v46 = vld [vmem:[#allocation7 + $0x330] sm:$0xff]  ;;  %v5465_v5 = vpack.c.bf16 %v1368_v28, %v1367_v61  ;;  %v1382_v39 = vld [vmem:[#allocation7 + $0x3d8] sm:$0xff] }
 0x1cc   : > { %5449 = vmatprep.subr.bf16.mxu0 %v8979_v42  ;;  %5515 = vmatprep.subr.bf16.mxu1 %v5514_v48  ;;  %v1386_v50 = vld [vmem:[#allocation7 + $0x3f8] sm:$0xff]  ;;  %v9011_v61 = vld [vmem:[#allocation46_spill] sm:$0xff] }
 0x1cd   : > { %v402_v28 = vld [vmem:[%s7496_s16 + $0x58] sm:$0xff] }
 0x1ce   : > { %1963 = vmatmul.mubr.f32.gmra.mrb[78].mxu0 %v6811_v10  ;;  %v5456_v10 = vpack.c.bf16 %v1362_v25, %v1361_v46  ;;  %5517 = vmatpush3.bf16.msra.mxu1 %v5514_v48  ;;  %v1372_v46 = vld [vmem:[#allocation7 + $0x388] sm:$0xff] }
 0x1cf   : > { %1967 = vmatprep.mubr.f32.mxu0 %v7208_v20  ;;  %5451 = vmatpush1.bf16.msra.mxu0 %v5450_v24  ;;  %v5522_v24 = vpack.c.bf16 %v1402_v57, %v1401_v34  ;;  %v401_v57 = vld [vmem:[%s7496_s16 + $0x50] sm:$0xff] }
 0x1d0   : > { %5452 = vmatprep.subr.bf16.mxu0 %v8979_v42  ;;  %5519 = vmatprep.subr.bf16.mxu1 %v5518_v51 }
 0x1d2   : > { %1968 = vmatmul.mubr.f32.gmra.mrb[4].mxu0 %v6821_v17  ;;  %v5459_v17 = vpack.c.bf16 %v1364_v53, %v1363_v52  ;;  %5521 = vmatpush3.bf16.msra.mxu1 %v5518_v51  ;;  %v6460_v52 = vmov 0   ;;  %v393_v53 = vld [vmem:[%s7496_s16 + $0x10] sm:$0xff]  ;;  %v396_v51 = vld [vmem:[%s7496_s16 + $0x28] sm:$0xff] }
 0x1d3   : > { %1972 = vmatprep.mubr.f32.mxu0 %v7169_v12  ;;  %5454 = vmatpush1.bf16.msra.mxu0 %v5453_v4  ;;  %v1365_v12 = vld [vmem:[#allocation7 + $0x350] sm:$0xff]  ;;  %v1370_v4 = vld [vmem:[#allocation7 + $0x378] sm:$0xff] }
 0x1d4   : > { %5455 = vmatprep.subr.bf16.mxu0 %v8979_v42  ;;  %5523 = vmatprep.subr.bf16.mxu1 %v5522_v24 }
 0x1d5   : > { %6224 = vset.pattern.permute.xlu0 %v6460_v52  ;;  %6225 = vset.pattern.permute.xlu1 %v6460_v52  ;;  %v9018_v52 = vld [vmem:[#allocation28_spill] sm:$0xff] }
 0x1d6   : > { %1973 = vmatmul.mubr.f32.gmra.mrb[6].mxu0 %v6832_v23  ;;  %v5462_v23 = vpack.c.bf16 %v1366_v58, %v1365_v12  ;;  %5525 = vmatpush3.bf16.msra.mxu1 %v5522_v24  ;;  %v9007_v24 = vld [vmem:[#allocation44_spill] sm:$0xff]  ;;  %v9009_v58 = vld [vmem:[#allocation42_spill] sm:$0xff] }
 0x1d7   : > { %1977 = vmatprep.mubr.f32.mxu0 %v7221_v32  ;;  %5457 = vmatpush1.bf16.msra.mxu0 %v5456_v10  ;;  %v1384_v10 = vld [vmem:[#allocation7 + $0x3e8] sm:$0xff]  ;;  %v403_v12 = vld [vmem:[%s7496_s16 + $0x60] sm:$0xff] }
 0x1d8   : > { %5458 = vmatprep.subr.bf16.mxu0 %v8979_v42  ;;  %5526 = vmatprep.subr.bf16.mxu1 %v8979_v42 }
 0x1d9   : > { %5181 = vmatmul.mubr.f32.vlgmr.msra.gmra.mrb[18].mxu1 %v7221_v32  ;;  %2762 = vperm.xlu0 %6224, %v393_v53   ;;  %v6240_v53 = vld [vmem:[%s6723_s10 + $0x20] sm:$0xff] }
 0x1da   : > { %1978 = vmatmul.mubr.f32.gmra.mrb[8].mxu0 %v6843_v29  ;;  %v1369_v29 = vld [vmem:[#allocation7 + $0x370] sm:$0xff]  ;;  %5183 = vmatprep.mubr.f32.mxu1 %v7229_v7 }
 0x1db   : > { %1982 = vmatprep.mubr.f32.mxu0 %v7229_v7  ;;  %5460 = vmatpush1.bf16.msra.mxu0 %v5459_v17  ;;  %v5468_v48 = vpack.c.bf16 %v1370_v4, %v1369_v29  ;;  %v1374_v7 = vld [vmem:[#allocation7 + $0x398] sm:$0xff]  ;;  %v404_v4 = vld [vmem:[%s7496_s16 + $0x68] sm:$0xff] }
 0x1dc   : > { %5461 = vmatprep.subr.bf16.mxu0 %v8979_v42  ;;  %v9013_v29 = vld [vmem:[#allocation71_spill] sm:$0xff] }
 0x1dd   : > { %5184 = vmatmul.mubr.f32.gmra.mrb[20].mxu1 %v7237_v14 }
 0x1de   : > { %1983 = vmatmul.mubr.f32.gmra.mrb[10].mxu0 %v6854_v35  ;;  %v1371_v35 = vld [vmem:[#allocation7 + $0x380] sm:$0xff]  ;;  %5186 = vmatprep.mubr.f32.mxu1 %v7245_v6 }
 0x1df   : > { %1987 = vmatprep.mubr.f32.mxu0 %v7237_v14  ;;  %5463 = vmatpush1.bf16.msra.mxu0 %v5462_v23  ;;  %v5471_v32 = vpack.c.bf16 %v1372_v46, %v1371_v35  ;;  %v9010_v23 = vld [vmem:[#allocation48_spill] sm:$0xff]  ;;  %v9016_v46 = vld [vmem:[#allocation74_spill] sm:$0xff] }
 0x1e0   : > { %5464 = vmatprep.subr.bf16.mxu0 %v8979_v42  ;;  %v9015_v35 = vld [vmem:[#allocation56_spill] sm:$0xff] }
 0x1e1   : > { %5187 = vmatmul.mubr.f32.gmra.mrb[22].mxu1 %v7253_v44 }
 0x1e2   : > { %1988 = vmatmul.mubr.f32.gmra.mrb[12].mxu0 %v6865_v41  ;;  %v1373_v41 = vld [vmem:[#allocation7 + $0x390] sm:$0xff]  ;;  %5189 = vmatprep.mubr.f32.mxu1 %v7261_v15 }
 0x1e3   : > { %1992 = vmatprep.mubr.f32.mxu0 %v7245_v6  ;;  %5466 = vmatpush1.bf16.msra.mxu0 %v5465_v5  ;;  %v5474_v14 = vpack.c.bf16 %v1374_v7, %v1373_v41  ;;  %v1376_v6 = vld [vmem:[#allocation7 + $0x3a8] sm:$0xff]  ;;  %v9012_v5 = vld [vmem:[#allocation52_spill] sm:$0xff] }
 0x1e4   : > { %5467 = vmatprep.subr.bf16.mxu0 %v8979_v42  ;;  %v9017_v41 = vld [vmem:[#allocation60_spill] sm:$0xff] }
 0x1e5   : > { %5190 = vmatmul.mubr.f32.gmra.mrb[24].mxu1 %v7269_v16  ;;  %v411_v7 = vld [vmem:[%s7496_s16 + $0xa0] sm:$0xff] }
 0x1e6   : > { %1993 = vmatmul.mubr.f32.gmra.mrb[14].mxu0 %v6876_v47  ;;  %v1375_v47 = vld [vmem:[#allocation7 + $0x3a0] sm:$0xff]  ;;  %5192 = vmatprep.mubr.f32.mxu1 %v7277_v19 }
 0x1e7   : > { %1997 = vmatprep.mubr.f32.mxu0 %v7253_v44  ;;  %5469 = vmatpush1.bf16.msra.mxu0 %v5468_v48  ;;  %v5477_v44 = vpack.c.bf16 %v1376_v6, %v1375_v47  ;;  %v9014_v48 = vld [vmem:[#allocation73_spill] sm:$0xff]  ;;  %v415_v47 = vld [vmem:[%s7496_s16 + $0xc0] sm:$0xff]  ;;  %v414_v6 = vld [vmem:[%s7496_s16 + $0xb8] sm:$0xff] }
 0x1e8   : > { %5470 = vmatprep.subr.bf16.mxu0 %v8979_v42 }
 0x1e9   : > { %5193 = vmatmul.mubr.f32.gmra.mrb[26].mxu1 %v7285_v26 }
 0x1ea   : > { %1998 = vmatmul.mubr.f32.gmra.mrb[16].mxu0 %v6887_v56  ;;  %v1377_v56 = vld [vmem:[#allocation7 + $0x3b0] sm:$0xff]  ;;  %5195 = vmatprep.mubr.f32.mxu1 %v7293_v18 }
 0x1eb   : > { %2002 = vmatprep.mubr.f32.mxu0 %v7261_v15  ;;  %5472 = vmatpush1.bf16.msra.mxu0 %v5471_v32  ;;  %v1378_v15 = vld [vmem:[#allocation7 + $0x3b8] sm:$0xff] }
 0x1ec   : > { %5473 = vmatprep.subr.bf16.mxu0 %v8979_v42  ;;  %v5480_v25 = vpack.c.bf16 %v1378_v15, %v1377_v56  ;;  %v406_v32 = vld [vmem:[%s7496_s16 + $0x78] sm:$0xff]  ;;  %v416_v56 = vld [vmem:[%s7496_s16 + $0xc8] sm:$0xff]  ;;  %v419_v15 = vld [vmem:[%s7496_s16 + $0xe0] sm:$0xff] }
 0x1ed   : > { %5196 = vmatmul.mubr.f32.gmra.mrb[28].mxu1 %v7301_v45 }
 0x1ee   : > { %2003 = vmatmul.mubr.f32.gmra.mrb[18].mxu0 %v6898_v3  ;;  %v1379_v3 = vld [vmem:[#allocation7 + $0x3c0] sm:$0xff]  ;;  %5198 = vmatprep.mubr.f32.mxu1 %v7308_v54 }
 0x1ef   : > { %2007 = vmatprep.mubr.f32.mxu0 %v7269_v16  ;;  %5475 = vmatpush1.bf16.msra.mxu0 %v5474_v14  ;;  %v1380_v16 = vld [vmem:[#allocation7 + $0x3c8] sm:$0xff]  ;;  %v7555_v14 = vld [vmem:[%s6723_s10 + $0xb8] sm:$0xff] }
 0x1f0   : > { %5476 = vmatprep.subr.bf16.mxu0 %v8979_v42 }
 0x1f1   : > { %5199 = vmatmul.mubr.f32.gmra.mrb[30].mxu1 %v7315_v60 }
 0x1f2   : > { %2008 = vmatmul.mubr.f32.gmra.mrb[20].mxu0 %v6909_v13  ;;  %v5483_v13 = vpack.c.bf16 %v1380_v16, %v1379_v3  ;;  %5201 = vmatprep.mubr.f32.mxu1 %v7322_v0  ;;  %v421_v3 = vld [vmem:[%s7496_s16 + $0xf0] sm:$0xff]  ;;  %v7590_v16 = vld [vmem:[%s6723_s10 + $0xe0] sm:$0xff] }
 0x1f3   : > { %2012 = vmatprep.mubr.f32.mxu0 %v7277_v19  ;;  %5478 = vmatpush1.bf16.msra.mxu0 %v5477_v44  ;;  %v1381_v19 = vld [vmem:[#allocation7 + $0x3d0] sm:$0xff] }
 0x1f4   : > { %5479 = vmatprep.subr.bf16.mxu0 %v8979_v42  ;;  %v417_v44 = vld [vmem:[%s7496_s16 + $0xd0] sm:$0xff] }
 0x1f5   : > { %5202 = vmatmul.mubr.f32.gmra.mrb[32].mxu1 %v7329_v9 }
 0x1f6   : > { %2013 = vmatmul.mubr.f32.gmra.mrb[22].mxu0 %v6920_v22  ;;  %v5486_v22 = vpack.c.bf16 %v1382_v39, %v1381_v19  ;;  %5204 = vmatprep.mubr.f32.mxu1 %v7336_v27  ;;  %v7597_v19 = vld [vmem:[%s6723_s10 + $0xe8] sm:$0xff]  ;;  %v7603_v39 = vld [vmem:[%s6723_s10 + $0xf0] sm:$0xff] }
 0x1f7   : > { %2017 = vmatprep.mubr.f32.mxu0 %v7285_v26  ;;  %5481 = vmatpush1.bf16.msra.mxu0 %v5480_v25  ;;  %v1383_v26 = vld [vmem:[#allocation7 + $0x3e0] sm:$0xff]  ;;  %v418_v25 = vld [vmem:[%s7496_s16 + $0xd8] sm:$0xff] }
 0x1f8   : > { %5482 = vmatprep.subr.bf16.mxu0 %v8979_v42 }
 0x1f9   : > { %5205 = vmatmul.mubr.f32.gmra.mrb[34].mxu1 %v7343_v8 }
 0x1fa   : > { %2018 = vmatmul.mubr.f32.gmra.mrb[24].mxu0 %v6931_v31  ;;  %v5489_v31 = vpack.c.bf16 %v1384_v10, %v1383_v26  ;;  %5207 = vmatprep.mubr.f32.mxu1 %v7350_v36  ;;  %v7609_v26 = vld [vmem:[%s6723_s10 + $0xf8] sm:$0xff]  ;;  %v7614_v10 = vld [vmem:[%s6723_s10 + $0x100] sm:$0xff] }
 0x1fb   : > { %2022 = vmatprep.mubr.f32.mxu0 %v7293_v18  ;;  %5484 = vmatpush1.bf16.msra.mxu0 %v5483_v13  ;;  %v1385_v18 = vld [vmem:[#allocation7 + $0x3f0] sm:$0xff]  ;;  %v423_v13 = vld [vmem:[%s7496_s16 + $0x100] sm:$0xff] }
 0x1fc   : > { %5485 = vmatprep.subr.bf16.mxu0 %v8979_v42 }
 0x1fd   : > { %5208 = vmatmul.mubr.f32.gmra.mrb[36].mxu1 %v7357_v43 }
 0x1fe   : > { %2023 = vmatmul.mubr.f32.gmra.mrb[26].mxu0 %v6942_v40  ;;  %v5492_v40 = vpack.c.bf16 %v1386_v50, %v1385_v18  ;;  %5210 = vmatprep.mubr.f32.mxu1 %v7364_v37  ;;  %v7624_v18 = vld [vmem:[%s6723_s10 + $0x110] sm:$0xff]  ;;  %v6239_v50 = vld [vmem:[%s6723_s10 + $0x18] sm:$0xff] }
 0x1ff   : > { %2027 = vmatprep.mubr.f32.mxu0 %v7301_v45  ;;  %5487 = vmatpush1.bf16.msra.mxu0 %v5486_v22  ;;  %v394_v45 = vld [vmem:[%s7496_s16 + $0x18] sm:$0xff]  ;;  %v424_v22 = vld [vmem:[%s7496_s16 + $0x108] sm:$0xff] }
 0x200   : > { %5488 = vmatprep.subr.bf16.mxu0 %v8979_v42  ;;  %2767 = vperm.xlu0 %6224, %v394_v45   ;;  %v3722_v45 = vld [vmem:[#allocation9] sm:$0xff] }
 0x201   : > { %5211 = vmatmul.mubr.f32.gmra.mrb[38].mxu1 %v7371_v55 }
 0x202   : > { %2028 = vmatmul.mubr.f32.gmra.mrb[28].mxu0 %v6953_v49  ;;  %v395_v49 = vld [vmem:[%s7496_s16 + $0x20] sm:$0xff]  ;;  %5213 = vmatprep.mubr.f32.mxu1 %v7378_v62 }
 0x203   : > { %2032 = vmatprep.mubr.f32.mxu0 %v7308_v54  ;;  %5490 = vmatpush1.bf16.msra.mxu0 %v5489_v31  ;;  %v397_v54 = vld [vmem:[%s7496_s16 + $0x30] sm:$0xff]  ;;  %v7619_v31 = vld [vmem:[%s6723_s10 + $0x108] sm:$0xff] }
 0x204   : > { %5491 = vmatprep.subr.bf16.mxu0 %v8979_v42  ;;  %2772 = vperm.xlu1 %6225, %v395_v49   ;;  %v3723_v49 = vld [vmem:[#allocation9 + $0x8] sm:$0xff] }
 0x205   : > { %2782 = vperm.xlu0 %6224, %v397_v54   ;;  %5214 = vmatmul.mubr.f32.gmra.mrb[40].mxu1 %v7385_v21  ;;  %v3724_v54 = vld [vmem:[#allocation9 + $0x10] sm:$0xff] }
 0x206   : > { %2033 = vmatmul.mubr.f32.gmra.mrb[30].mxu0 %v6964_v59  ;;  %5216 = vmatprep.mubr.f32.mxu1 %v7392_v33 }
 0x207   : > { %2037 = vmatprep.mubr.f32.mxu0 %v7315_v60  ;;  %5493 = vmatpush1.bf16.msra.mxu0 %v5492_v40  ;;  %v399_v60 = vld [vmem:[%s7496_s16 + $0x40] sm:$0xff]  ;;  %v9019_v40 = vld [vmem:[#allocation29_spill] sm:$0xff] }
 0x208   : > { %2777 = vperm.xlu1 %6225, %v396_v51   ;;  %v6241_v51 = vld [vmem:[%s6723_s10 + $0x28] sm:$0xff] }
 0x209   : > { %2792 = vperm.xlu0 %6224, %v399_v60   ;;  %5217 = vmatmul.mubr.f32.gmra.mrb[42].mxu1 %v7399_v38  ;;  %v5527_v60 = vpack.c.bf16 %v3723_v49, %v3722_v45  ;;  %v3738_v45 = vld [vmem:[#allocation9 + $0x80] sm:$0xff]  ;;  %v3739_v49 = vld [vmem:[#allocation9 + $0x88] sm:$0xff] }
 0x20a   : > { %2038 = vmatmul.mubr.f32.gmra.mrb[32].mxu0 %v6975_v2 }
 0x20b   : > { %2042 = vmatprep.mubr.f32.mxu0 %v7322_v0  ;;  %v398_v0 = vld [vmem:[%s7496_s16 + $0x38] sm:$0xff]  ;;  %5528 = vmatpush1.bf16.msra.mxu1 %v5527_v60  ;;  %v9027_v60 = vld [vmem:[#allocation37_spill] sm:$0xff] }
 0x20c   : > { %2787 = vperm.xlu1 %6225, %v398_v0   ;;  %5529 = vmatprep.subr.bf16.mxu1 %v8979_v42 }
 0x20d   : > { %v1714_v59 = vpop.f32.mrb[54].mxu0  ;;  %2802 = vperm.xlu0 %6224, %v401_v57  }
 0x20e   : > { %v1716_v34 = vpop.f32.mrb[55].mxu0  ;;  %2043 = vmatmul.mubr.f32.gmra.mrb[34].mxu0 %v6988_v11  ;;  %v9008_v11 = vld [vmem:[#allocation41_spill] sm:$0xff]  ;;  %v7636_v59 = vpop.f32.mrb[0].mxu1 }
 0x20f   : > { %2047 = vmatprep.mubr.f32.mxu0 %v7329_v9  ;;  %5219 = vmatprep.mubr.f32.mxu1 %v9008_v11  ;;  %v400_v9 = vld [vmem:[%s7496_s16 + $0x48] sm:$0xff]  ;;  %v3725_v34 = vld [vmem:[#allocation9 + $0x18] sm:$0xff] }
 0x210   : > { %5220 = vmatmul.mubr.f32.gmra.mrb[44].mxu1 %v9009_v58  ;;  %2797 = vperm.xlu1 %6225, %v400_v9   ;;  %v5530_v57 = vpack.c.bf16 %v3725_v34, %v3724_v54  ;;  %v3727_v9 = vld [vmem:[#allocation9 + $0x28] sm:$0xff]  ;;  %v6248_v54 = vld [vmem:[%s6723_s10 + $0x60] sm:$0xff] }
 0x211   : > { %v1719_v2 = vpop.f32.mrb[56].mxu0  ;;  %2812 = vperm.xlu0 %6224, %v403_v12   ;;  %5222 = vmatprep.mubr.f32.mxu1 %v9011_v61  ;;  %v6249_v34 = vld [vmem:[%s6723_s10 + $0x68] sm:$0xff] }
 0x212   : > { %v1721_v17 = vpop.f32.mrb[57].mxu0  ;;  %2048 = vmatmul.mubr.f32.gmra.mrb[36].mxu0 %v9007_v24  ;;  %v1606_v2 = vpop.f32.mrb[1].mxu1  ;;  %v9020_v24 = vld [vmem:[#allocation30_spill] sm:$0xff]  ;;  %5531 = vmatpush1.bf16.msra.mxu1 %v5530_v57 }
 0x213   : > { %2052 = vmatprep.mubr.f32.mxu0 %v7336_v27  ;;  %v405_v27 = vld [vmem:[%s7496_s16 + $0x70] sm:$0xff]  ;;  %v7639_v0 = vpop.f32.mrb[2].mxu1  ;;  %5532 = vmatprep.subr.bf16.mxu1 %v8979_v42 }
 0x214   : > { %5223 = vmatmul.mubr.f32.gmra.mrb[46].mxu1 %v7428_v63  ;;  %2807 = vperm.xlu1 %6225, %v402_v28   ;;  %v1611_v17 = vpop.f32.mrb[3].mxu1  ;;  %v9028_v2 = vld [vmem:[#allocation38_spill] sm:$0xff] }
 0x215   : > { %2822 = vperm.xlu0 %6224, %v405_v27   ;;  %5225 = vmatprep.mubr.f32.mxu1 %v9013_v29  ;;  %v7643_v12 = vpop.f32.mrb[4].mxu1  ;;  %v6250_v57 = vld [vmem:[%s6723_s10 + $0x70] sm:$0xff]  ;;  %v9029_v17 = vld [vmem:[#allocation39_spill] sm:$0xff] }
 0x216   : > { %2053 = vmatmul.mubr.f32.gmra.mrb[38].mxu0 %v9010_v23  ;;  %v1616_v23 = vpop.f32.mrb[5].mxu1 }
 0x217   : > { %2057 = vmatprep.mubr.f32.mxu0 %v7343_v8  ;;  %v407_v8 = vld [vmem:[%s7496_s16 + $0x80] sm:$0xff]  ;;  %v6253_v23 = vld [vmem:[%s6723_s10 + $0x88] sm:$0xff] }
 0x218   : > { %5226 = vmatmul.mubr.f32.gmra.mrb[48].mxu1 %v9014_v48  ;;  %2817 = vperm.xlu1 %6225, %v404_v4   ;;  %v3729_v4 = vld [vmem:[#allocation9 + $0x38] sm:$0xff] }
 0x219   : > { %2832 = vperm.xlu0 %6224, %v407_v8   ;;  %5228 = vmatprep.mubr.f32.mxu1 %v9016_v46 }
 0x21a   : > { %2058 = vmatmul.mubr.f32.gmra.mrb[40].mxu0 %v9012_v5  ;;  %v9021_v5 = vld [vmem:[#allocation31_spill] sm:$0xff] }
 0x21b   : > { %2062 = vmatprep.mubr.f32.mxu0 %v7350_v36  ;;  %v409_v36 = vld [vmem:[%s7496_s16 + $0x90] sm:$0xff] }
 0x21c   : > { %5229 = vmatmul.mubr.f32.gmra.mrb[50].mxu1 %v7193_v30  ;;  %2827 = vperm.xlu1 %6225, %v406_v32   ;;  %v410_v30 = vld [vmem:[%s7496_s16 + $0x98] sm:$0xff] }
 0x21d   : > { %2842 = vperm.xlu0 %6224, %v409_v36   ;;  %5231 = vmatprep.mubr.f32.mxu1 %v7201_v1  ;;  %v413_v1 = vld [vmem:[%s7496_s16 + $0xb0] sm:$0xff] }
 0x21e   : > { %2063 = vmatmul.mubr.f32.gmra.mrb[42].mxu0 %v9015_v35 }
 0x21f   : > { %2067 = vmatprep.mubr.f32.mxu0 %v7357_v43  ;;  %v408_v43 = vld [vmem:[%s7496_s16 + $0x88] sm:$0xff] }
 0x220   : > { %5232 = vmatmul.mubr.f32.gmra.mrb[52].mxu1 %v7208_v20  ;;  %2837 = vperm.xlu1 %6225, %v408_v43   ;;  %v412_v20 = vld [vmem:[%s7496_s16 + $0xa8] sm:$0xff]  ;;  %v3730_v43 = vld [vmem:[#allocation9 + $0x40] sm:$0xff] }
 0x221   : > { %2852 = vperm.xlu0 %6224, %v411_v7   ;;  %v3731_v7 = vld [vmem:[#allocation9 + $0x48] sm:$0xff] }
 0x222   : > { %2068 = vmatmul.mubr.f32.gmra.mrb[44].mxu0 %v9017_v41  ;;  %v9022_v41 = vld [vmem:[#allocation32_spill] sm:$0xff] }
 0x223   : > { %2072 = vmatprep.mubr.f32.mxu0 %v7364_v37  ;;  %v7562_v37 = vld [vmem:[%s6723_s10 + $0xc0] sm:$0xff] }
 0x224   : > { %2847 = vperm.xlu1 %6225, %v410_v30   ;;  %v6244_v30 = vld [vmem:[%s6723_s10 + $0x40] sm:$0xff] }
 0x225   : > { %2862 = vperm.xlu0 %6224, %v413_v1   ;;  %v5539_v1 = vpack.c.bf16 %v3731_v7, %v3730_v43 }
 0x226   : > { %2073 = vmatmul.mubr.f32.gmra.mrb[46].mxu0 %v7555_v14 }
 0x227   : > { %2077 = vmatprep.mubr.f32.mxu0 %v7371_v55  ;;  %v7569_v55 = vld [vmem:[%s6723_s10 + $0xc8] sm:$0xff] }
 0x228   : > { %2857 = vperm.xlu1 %6225, %v412_v20   ;;  %v9023_v20 = vld [vmem:[#allocation33_spill] sm:$0xff] }
 0x229   : > { %2872 = vperm.xlu0 %6224, %v415_v47   ;;  %v3732_v47 = vld [vmem:[#allocation9 + $0x50] sm:$0xff] }
 0x22a   : > { %2078 = vmatmul.mubr.f32.gmra.mrb[48].mxu0 %v7562_v37 }
 0x22b   : > { %2082 = vmatprep.mubr.f32.mxu0 %v7378_v62  ;;  %v7576_v62 = vld [vmem:[%s6723_s10 + $0xd0] sm:$0xff] }
 0x22c   : > { %2867 = vperm.xlu1 %6225, %v414_v6   ;;  %v3733_v6 = vld [vmem:[#allocation9 + $0x58] sm:$0xff] }
 0x22d   : > { %2882 = vperm.xlu0 %6224, %v417_v44   ;;  %v6245_v44 = vld [vmem:[%s6723_s10 + $0x48] sm:$0xff] }
 0x22e   : > { %2083 = vmatmul.mubr.f32.gmra.mrb[50].mxu0 %v7569_v55 }
 0x22f   : > { %2087 = vmatprep.mubr.f32.mxu0 %v7385_v21  ;;  %v7583_v21 = vld [vmem:[%s6723_s10 + $0xd8] sm:$0xff] }
 0x230   : > { %2877 = vperm.xlu1 %6225, %v416_v56   ;;  %v5542_v56 = vpack.c.bf16 %v3733_v6, %v3732_v47  ;;  %v9036_v6 = vld [vmem:[#allocation63_spill] sm:$0xff] }
 0x231   : > { %2892 = vperm.xlu0 %6224, %v419_v15   ;;  %v9024_v15 = vld [vmem:[#allocation34_spill] sm:$0xff] }
 0x232   : > { %2088 = vmatmul.mubr.f32.gmra.mrb[52].mxu0 %v7576_v62 }
 0x233   : > { %2092 = vmatprep.mubr.f32.mxu0 %v7392_v33  ;;  %v420_v33 = vld [vmem:[%s7496_s16 + $0xe8] sm:$0xff] }
 0x234   : > { %2887 = vperm.xlu1 %6225, %v418_v25   ;;  %v3734_v25 = vld [vmem:[#allocation9 + $0x60] sm:$0xff] }
 0x235   : > { %2902 = vperm.xlu0 %6224, %v421_v3   ;;  %v3735_v3 = vld [vmem:[#allocation9 + $0x68] sm:$0xff] }
 0x236   : > { %2093 = vmatmul.mubr.f32.gmra.mrb[58].mxu0 %v7583_v21 }
 0x237   : > { %2097 = vmatprep.mubr.f32.mxu0 %v7399_v38  ;;  %v422_v38 = vld [vmem:[%s7496_s16 + $0xf8] sm:$0xff]  ;;  %s6118_s16 = smul.u32 48, %s9121_s19 }
 0x238   : > { %2897 = vperm.xlu1 %6225, %v420_v33   ;;  %v6246_v33 = vld [vmem:[%s6723_s10 + $0x50] sm:$0xff] }
 0x239   : > { %2912 = vperm.xlu0 %6224, %v423_v13   ;;  %v5545_v13 = vpack.c.bf16 %v3735_v3, %v3734_v25  ;;  %s4914_s30 = sadd.s32 %s6118_s16, %s6117_s26 }
 0x23a   : > { %2098 = vmatmul.mubr.f32.gmra.mrb[60].mxu0 %v7590_v16  ;;  %s5053_s18 = sshll.u32 %s4914_s30, 7 }
 0x23b   : > { %2102 = vmatprep.mubr.f32.mxu0 %v9008_v11  ;;  %v3726_v11 = vld [vmem:[#allocation9 + $0x20] sm:$0xff]  ;;  %s8694_s20 = scalar_lea.hbm %s9122_s14, %s5053_s18 }
 0x23c   : > { %2907 = vperm.xlu1 %6225, %v422_v38   ;;  %v5533_v28 = vpack.c.bf16 %v3727_v9, %v3726_v11  ;;  %v9025_v38 = vld [vmem:[#allocation35_spill] sm:$0xff]  ;;  %v9030_v11 = vld [vmem:[#allocation40_spill] sm:$0xff] }
 0x23d   : > { %v6252_v9 = vld [vmem:[%s6723_s10 + $0x80] sm:$0xff] }
 0x23e   : > { %2103 = vmatmul.mubr.f32.gmra.mrb[62].mxu0 %v7597_v19  ;;  %5534 = vmatpush1.bf16.msra.mxu1 %v5533_v28  ;;  %v9032_v28 = vld [vmem:[#allocation47_spill] sm:$0xff] }
 0x23f   : > { %2107 = vmatprep.mubr.f32.mxu0 %v9009_v58  ;;  %v6242_v58 = vld [vmem:[%s6723_s10 + $0x30] sm:$0xff]  ;;  %5535 = vmatprep.subr.bf16.mxu1 %v8979_v42 }
 0x240   : > { %2917 = vperm.xlu1 %6225, %v424_v22   ;;  %v3736_v22 = vld [vmem:[#allocation9 + $0x70] sm:$0xff] }
 0x242   : > { %2108 = vmatmul.mubr.f32.gmra.mrb[64].mxu0 %v7603_v39 }
 0x243   : > { %2112 = vmatprep.mubr.f32.mxu0 %v9011_v61  ;;  %v7646_v61 = vpop.f32.mrb[6].mxu1 }
 0x244   : > { %v1621_v27 = vpop.f32.mrb[7].mxu1 }
 0x245   : > { %v7650_v8 = vpop.f32.mrb[8].mxu1  ;;  %v6254_v27 = vld [vmem:[%s6723_s10 + $0x90] sm:$0xff] }
 0x246   : > { %2113 = vmatmul.mubr.f32.gmra.mrb[66].mxu0 %v7609_v26  ;;  %v1626_v35 = vpop.f32.mrb[9].mxu1 }
 0x247   : > { %2117 = vmatprep.mubr.f32.mxu0 %v7428_v63  ;;  %v7629_v63 = vld [vmem:[%s6723_s10 + $0x118] sm:$0xff] }
 0x24a   : > { %2118 = vmatmul.mubr.f32.gmra.mrb[68].mxu0 %v7614_v10 }
 0x24b   : > { %2122 = vmatprep.mubr.f32.mxu0 %v9013_v29  ;;  %v3728_v29 = vld [vmem:[#allocation9 + $0x30] sm:$0xff] }
 0x24c   : > { %v5536_v32 = vpack.c.bf16 %v3729_v4, %v3728_v29  ;;  %v9033_v4 = vld [vmem:[#allocation51_spill] sm:$0xff] }
 0x24e   : > { %2123 = vmatmul.mubr.f32.gmra.mrb[70].mxu0 %v7619_v31  ;;  %5537 = vmatpush1.bf16.msra.mxu1 %v5536_v32 }
 0x24f   : > { %2127 = vmatprep.mubr.f32.mxu0 %v9014_v48  ;;  %v6243_v48 = vld [vmem:[%s6723_s10 + $0x38] sm:$0xff]  ;;  %5538 = vmatprep.subr.bf16.mxu1 %v8979_v42 }
 0x252   : > { %2128 = vmatmul.mubr.f32.gmra.mrb[80].mxu0 %v7624_v18  ;;  %5540 = vmatpush1.bf16.msra.mxu1 %v5539_v1  ;;  %v6257_v1 = vld [vmem:[%s6723_s10 + $0xa8] sm:$0xff] }
 0x253   : > { %2132 = vmatprep.mubr.f32.mxu0 %v9016_v46  ;;  %v7653_v46 = vpop.f32.mrb[10].mxu1  ;;  %5541 = vmatprep.subr.bf16.mxu1 %v8979_v42 }
 0x254   : > { %v1631_v36 = vpop.f32.mrb[11].mxu1 }
 0x255   : > { %v9034_v36 = vld [vmem:[#allocation55_spill] sm:$0xff] }
 0x256   : > { %2133 = vmatmul.mubr.f32.gmra.mrb[82].mxu0 %v7629_v63  ;;  %5543 = vmatpush1.bf16.msra.mxu1 %v5542_v56  ;;  %v9037_v56 = vld [vmem:[#allocation66_spill] sm:$0xff] }
 0x257   : > { %2202 = vmatprep.mubr.f32.mxu0 %v6239_v50  ;;  %5544 = vmatprep.subr.bf16.mxu1 %v8979_v42  ;;  %v3737_v50 = vld [vmem:[#allocation9 + $0x78] sm:$0xff] }
 0x25a   : > { %2203 = vmatmul.mubr.f32.vlgmr.msra.gmra.mrb[84].mxu0 %v9018_v52  ;;  %v6247_v52 = vld [vmem:[%s6723_s10 + $0x58] sm:$0xff]  ;;  %5546 = vmatpush1.bf16.msra.mxu1 %v5545_v13 }
 0x25b   : > { %2207 = vmatprep.mubr.f32.mxu0 %v6240_v53  ;;  %v5548_v53 = vpack.c.bf16 %v3737_v50, %v3736_v22  ;;  %5547 = vmatprep.subr.bf16.mxu1 %v8979_v42  ;;  %v3741_v13 = vld [vmem:[#allocation9 + $0x98] sm:$0xff]  ;;  %v9038_v22 = vld [vmem:[#allocation69_spill] sm:$0xff] }
 0x25e   : > { %2208 = vmatmul.mubr.f32.gmra.mrb[86].mxu0 %v9019_v40  ;;  %v9026_v40 = vld [vmem:[#allocation36_spill] sm:$0xff]  ;;  %5549 = vmatpush1.bf16.msra.mxu1 %v5548_v53 }
 0x25f   : > { %2212 = vmatprep.mubr.f32.mxu0 %v6241_v51  ;;  %v5551_v51 = vpack.c.bf16 %v3739_v49, %v3738_v45  ;;  %5550 = vmatprep.subr.bf16.mxu1 %v8979_v42  ;;  %v3743_v45 = vld [vmem:[#allocation9 + $0xa8] sm:$0xff] }
 0x260   : > { %v9039_v49 = vld [vmem:[#allocation45_spill] sm:$0xff] }
 0x262   : > { %2213 = vmatmul.mubr.f32.gmra.mrb[4].mxu0 %v9020_v24  ;;  %5552 = vmatpush1.bf16.msra.mxu1 %v5551_v51  ;;  %v6251_v24 = vld [vmem:[%s6723_s10 + $0x78] sm:$0xff] }
 0x263   : > { %2217 = vmatprep.mubr.f32.mxu0 %v6242_v58  ;;  %5553 = vmatprep.subr.bf16.mxu1 %v8979_v42  ;;  %v9031_v58 = vld [vmem:[#allocation43_spill] sm:$0xff] }
 0x264   : > { %v3745_v51 = vld [vmem:[#allocation9 + $0xb8] sm:$0xff] }
 0x266   : > { %2218 = vmatmul.mubr.f32.gmra.mrb[6].mxu0 %v9021_v5 }
 0x267   : > { %2222 = vmatprep.mubr.f32.mxu0 %v6243_v48  ;;  %v6255_v48 = vld [vmem:[%s6723_s10 + $0x98] sm:$0xff] }
 0x26a   : > { %2223 = vmatmul.mubr.f32.gmra.mrb[8].mxu0 %v9022_v41  ;;  %v6256_v41 = vld [vmem:[%s6723_s10 + $0xa0] sm:$0xff] }
 0x26b   : > { %2227 = vmatprep.mubr.f32.mxu0 %v6244_v30  ;;  %v9035_v30 = vld [vmem:[#allocation59_spill] sm:$0xff] }
 0x26e   : > { %2228 = vmatmul.mubr.f32.gmra.mrb[10].mxu0 %v9023_v20 }
 0x26f   : > { %2232 = vmatprep.mubr.f32.mxu0 %v6245_v44  ;;  %v6258_v44 = vld [vmem:[%s6723_s10 + $0xb0] sm:$0xff] }
 0x272   : > { %2233 = vmatmul.mubr.f32.gmra.mrb[12].mxu0 %v9024_v15  ;;  %v7693_v15 = vpop.f32.mrb[12].mxu1 }
 0x273   : > { %2237 = vmatprep.mubr.f32.mxu0 %v6246_v33  ;;  %v1636_v25 = vpop.f32.mrb[13].mxu1  ;;  %v3740_v33 = vld [vmem:[#allocation9 + $0x90] sm:$0xff] }
 0x274   : > { %v1639_v3 = vpop.f32.mrb[14].mxu1  ;;  %v5554_v50 = vpack.c.bf16 %v3741_v13, %v3740_v33  ;;  %v9051_v25 = vld [vmem:[#allocation25_spill] sm:$0xff]  ;;  %v6261_v13 = vld [vmem:[%s6723_s10 + $0x10] sm:$0xff] }
 0x275   : > { %v6260_v3 = vld [vmem:[%s6723_s10 + $0x8] sm:$0xff] }
 0x276   : > { %2238 = vmatmul.mubr.f32.gmra.mrb[14].mxu0 %v9025_v38  ;;  %v1641_v38 = vpop.f32.mrb[15].mxu1  ;;  %5555 = vmatpush1.bf16.msra.mxu1 %v5554_v50 }
 0x277   : > { %2242 = vmatprep.mubr.f32.mxu0 %v6247_v52  ;;  %v1644_v52 = vpop.f32.mrb[16].mxu1  ;;  %5556 = vmatprep.subr.bf16.mxu1 %v8979_v42 }
 0x278   : > { %v1646_v53 = vpop.f32.mrb[17].mxu1 }
 0x27a   : > { %2243 = vmatmul.mubr.f32.gmra.mrb[16].mxu0 %v9026_v40  ;;  %v3742_v40 = vld [vmem:[#allocation9 + $0xa0] sm:$0xff] }
 0x27b   : > { %2247 = vmatprep.mubr.f32.mxu0 %v6248_v54  ;;  %v3744_v54 = vld [vmem:[#allocation9 + $0xb0] sm:$0xff] }
 0x27e   : > { %2248 = vmatmul.mubr.f32.gmra.mrb[18].mxu0 %v9027_v60  ;;  %v9040_v60 = vld [vmem:[#allocation49_spill] sm:$0xff] }
 0x27f   : > { %2252 = vmatprep.mubr.f32.mxu0 %v6249_v34  ;;  %v5560_v34 = vpack.c.bf16 %v3745_v51, %v3744_v54 }
 0x282   : > { %2253 = vmatmul.mubr.f32.gmra.mrb[20].mxu0 %v9028_v2 }
 0x283   : > { %2257 = vmatprep.mubr.f32.mxu0 %v6250_v57  ;;  %v3746_v57 = vld [vmem:[#allocation9 + $0xc0] sm:$0xff] }
 0x286   : > { %2258 = vmatmul.mubr.f32.gmra.mrb[22].mxu0 %v9029_v17  ;;  %v3747_v17 = vld [vmem:[#allocation9 + $0xc8] sm:$0xff] }
 0x287   : > { %2262 = vmatprep.mubr.f32.mxu0 %v6251_v24  ;;  %v9041_v24 = vld [vmem:[#allocation53_spill] sm:$0xff] }
 0x28a   : > { %2263 = vmatmul.mubr.f32.gmra.mrb[24].mxu0 %v9030_v11 }
 0x28b   : > { %2267 = vmatprep.mubr.f32.mxu0 %v6252_v9 }
 0x28e   : > { %2268 = vmatmul.mubr.f32.gmra.mrb[26].mxu0 %v9031_v58  ;;  %v3749_v58 = vld [vmem:[#allocation9 + $0xd8] sm:$0xff] }
 0x28f   : > { %2272 = vmatprep.mubr.f32.mxu0 %v6253_v23  ;;  %v9042_v23 = vld [vmem:[#allocation57_spill] sm:$0xff] }
 0x292   : > { %2273 = vmatmul.mubr.f32.gmra.mrb[28].mxu0 %v9032_v28 }
 0x293   : > { %2277 = vmatprep.mubr.f32.mxu0 %v6254_v27 }
 0x295   : > { %v1884_v5 = vpop.f32.mrb[72].mxu0 }
 0x296   : > { %v1886_v29 = vpop.f32.mrb[73].mxu0  ;;  %2278 = vmatmul.mubr.f32.gmra.mrb[30].mxu0 %v9033_v4  ;;  %v9043_v4 = vld [vmem:[#allocation61_spill] sm:$0xff] }
 0x297   : > { %2282 = vmatprep.mubr.f32.mxu0 %v6255_v48  ;;  %v3751_v29 = vld [vmem:[#allocation9 + $0xe8] sm:$0xff] }
 0x299   : > { %v1889_v35 = vpop.f32.mrb[74].mxu0 }
 0x29a   : > { %v1891_v32 = vpop.f32.mrb[75].mxu0  ;;  %2283 = vmatmul.mubr.f32.gmra.mrb[32].mxu0 %v9034_v36  ;;  %v3752_v35 = vld [vmem:[#allocation9 + $0xf0] sm:$0xff] }
 0x29b   : > { %2287 = vmatprep.mubr.f32.mxu0 %v6256_v41  ;;  %v3753_v32 = vld [vmem:[#allocation9 + $0xf8] sm:$0xff] }
 0x29c   : > { %v5572_v36 = vpack.c.bf16 %v3753_v32, %v3752_v35 }
 0x29d   : > { %v1959_v43 = vpop.f32.mrb[76].mxu0 }
 0x29e   : > { %v1961_v7 = vpop.f32.mrb[77].mxu0  ;;  %2288 = vmatmul.mubr.f32.gmra.mrb[34].mxu0 %v9035_v30 }
 0x29f   : > { %2292 = vmatprep.mubr.f32.mxu0 %v6257_v1  ;;  %v9045_v7 = vld [vmem:[#allocation67_spill] sm:$0xff]  ;;  %v9047_v1 = vld [vmem:[#allocation72_spill] sm:$0xff] }
 0x2a1   : > { %v1964_v20 = vpop.f32.mrb[78].mxu0 }
 0x2a2   : > { %v1966_v47 = vpop.f32.mrb[79].mxu0  ;;  %2293 = vmatmul.mubr.f32.gmra.mrb[36].mxu0 %v9036_v6  ;;  %v9048_v20 = vld [vmem:[#allocation22_spill] sm:$0xff]  ;;  %v9049_v6 = vld [vmem:[#allocation23_spill] sm:$0xff] }
 0x2a3   : > { %2297 = vmatprep.mubr.f32.mxu0 %v6258_v44  ;;  %v6259_v44 = vld [vmem:[%s6723_s10] sm:$0xff] }
 0x2a6   : > { %2298 = vmatmul.mubr.f32.gmra.mrb[38].mxu0 %v9037_v56 }
 0x2a7   : > { %2302 = vmatprep.mubr.f32.mxu0 %v7555_v14  ;;  %v5557_v14 = vpack.c.bf16 %v3743_v45, %v3742_v40 }
 0x2a9   : > { %5558 = vmatpush1.bf16.msra.mxu1 %v5557_v14 }
 0x2aa   : > { %2303 = vmatmul.mubr.f32.gmra.mrb[40].mxu0 %v9038_v22  ;;  %5559 = vmatprep.subr.bf16.mxu1 %v8979_v42 }
 0x2ab   : > { %2307 = vmatprep.mubr.f32.mxu0 %v7562_v37 }
 0x2ac   : > { %v5182_v37 = vpop.f32.mrb[18].mxu1 }
 0x2ad   : > { %5561 = vmatpush1.bf16.msra.mxu1 %v5560_v34  ;;  %v2449_v2 = vpop.f32.mrb[19].mxu1 }
 0x2ae   : > { %2308 = vmatmul.mubr.f32.gmra.mrb[42].mxu0 %v9039_v49  ;;  %5562 = vmatprep.subr.bf16.mxu1 %v8979_v42 }
 0x2af   : > { %2312 = vmatprep.mubr.f32.mxu0 %v7569_v55  ;;  %v5563_v55 = vpack.c.bf16 %v3747_v17, %v3746_v57 }
 0x2b0   : > { %v7707_v11 = vpop.f32.mrb[20].mxu1 }
 0x2b1   : > { %v7709_v9 = vpop.f32.mrb[21].mxu1  ;;  %5564 = vmatpush1.bf16.msra.mxu1 %v5563_v55 }
 0x2b2   : > { %2313 = vmatmul.mubr.f32.gmra.mrb[44].mxu0 %v9040_v60  ;;  %5565 = vmatprep.subr.bf16.mxu1 %v8979_v42 }
 0x2b3   : > { %2317 = vmatprep.mubr.f32.mxu0 %v7576_v62  ;;  %v3748_v62 = vld [vmem:[#allocation9 + $0xd0] sm:$0xff] }
 0x2b4   : > { %v5566_v28 = vpack.c.bf16 %v3749_v58, %v3748_v62  ;;  %v7714_v27 = vpop.f32.mrb[22].mxu1 }
 0x2b5   : > { %v7716_v5 = vpop.f32.mrb[23].mxu1 }
 0x2b6   : > { %2318 = vmatmul.mubr.f32.gmra.mrb[46].mxu0 %v9041_v24  ;;  %5567 = vmatpush1.bf16.msra.mxu1 %v5566_v28 }
 0x2b7   : > { %2322 = vmatprep.mubr.f32.mxu0 %v7583_v21  ;;  %5568 = vmatprep.subr.bf16.mxu1 %v8979_v42  ;;  %v3750_v21 = vld [vmem:[#allocation9 + $0xe0] sm:$0xff] }
 0x2b8   : > { %v5569_v48 = vpack.c.bf16 %v3751_v29, %v3750_v21  ;;  %v7724_v41 = vpop.f32.mrb[24].mxu1 }
 0x2b9   : > { %v7726_v43 = vpop.f32.mrb[25].mxu1 }
 0x2ba   : > { %2323 = vmatmul.mubr.f32.gmra.mrb[48].mxu0 %v9042_v23  ;;  %5570 = vmatpush1.bf16.msra.mxu1 %v5569_v48 }
 0x2bb   : > { %2327 = vmatprep.mubr.f32.mxu0 %v7590_v16  ;;  %5571 = vmatprep.subr.bf16.mxu1 %v8979_v42  ;;  %v9044_v16 = vld [vmem:[#allocation64_spill] sm:$0xff] }
 0x2bc   : > { %v7733_v30 = vpop.f32.mrb[26].mxu1 }
 0x2be   : > { %2328 = vmatmul.mubr.f32.gmra.mrb[50].mxu0 %v9043_v4  ;;  %5573 = vmatpush1.bf16.msra.mxu1 %v5572_v36  ;;  %v7801_v36 = vld [vmem:[%s8755_s3] ss:$0 sm:$0xff] }
 0x2bf   : > { %2332 = vmatprep.mubr.f32.mxu0 %v7597_v19  ;;  %5574 = vmatprep.subr.bf16.mxu1 %v8979_v42  ;;  %v9046_v19 = vld [vmem:[#allocation70_spill] sm:$0xff] }
 0x2c2   : > { %2333 = vmatmul.mubr.f32.gmra.mrb[52].mxu0 %v9044_v16 }
 0x2c3   : > { %2337 = vmatprep.mubr.f32.mxu0 %v7603_v39  ;;  %v7735_v39 = vpop.f32.mrb[27].mxu1 }
 0x2c4   : > { %v7741_v47 = vpop.f32.mrb[28].mxu1 }
 0x2c6   : > { %2338 = vmatmul.mubr.f32.gmra.mrb[58].mxu0 %v9045_v7 }
 0x2c7   : > { %2342 = vmatprep.mubr.f32.mxu0 %v7609_v26  ;;  %v7743_v26 = vpop.f32.mrb[29].mxu1 }
 0x2c8   : > { %v7749_v56 = vpop.f32.mrb[30].mxu1 }
 0x2ca   : > { %2343 = vmatmul.mubr.f32.gmra.mrb[60].mxu0 %v9046_v19 }
 0x2cb   : > { %2347 = vmatprep.mubr.f32.mxu0 %v7614_v10  ;;  %v9050_v10 = vld [vmem:[#allocation24_spill] sm:$0xff] }
 0x2ce   : > { %2348 = vmatmul.mubr.f32.gmra.mrb[62].mxu0 %v9047_v1  ;;  %v7807_v1 = vld [vmem:[%s8756_s4] ss:$0 sm:$0xff] }
 0x2cf   : > { %2352 = vmatprep.mubr.f32.mxu0 %v7619_v31  ;;  %v7751_v31 = vpop.f32.mrb[31].mxu1 }
 0x2d0   : > { %v7756_v33 = vpop.f32.mrb[32].mxu1 }
 0x2d1   : > { %v7759_v38 = vpop.f32.mrb[33].mxu1 }
 0x2d2   : > { %2353 = vmatmul.mubr.f32.gmra.mrb[64].mxu0 %v9048_v20  ;;  %v7762_v22 = vpop.f32.mrb[34].mxu1 }
 0x2d3   : > { %2357 = vmatprep.mubr.f32.mxu0 %v7624_v18  ;;  %v9052_v18 = vld [vmem:[#allocation26_spill] sm:$0xff]  ;;  %v7764_v50 = vpop.f32.mrb[35].mxu1 }
 0x2d4   : > { %v7766_v52 = vpop.f32.mrb[36].mxu1 }
 0x2d5   : > { %v7768_v53 = vpop.f32.mrb[37].mxu1 }
 0x2d6   : > { %2358 = vmatmul.mubr.f32.gmra.mrb[66].mxu0 %v9049_v6  ;;  %v7770_v40 = vpop.f32.mrb[38].mxu1 }
 0x2d7   : > { %2362 = vmatprep.mubr.f32.mxu0 %v7629_v63  ;;  %v9053_v63 = vld [vmem:[#allocation27_spill] sm:$0xff]  ;;  %v7772_v45 = vpop.f32.mrb[39].mxu1 }
 0x2d8   : > { %v7774_v49 = vpop.f32.mrb[40].mxu1 }
 0x2d9   : > { %v7776_v14 = vpop.f32.mrb[41].mxu1 }
 0x2da   : > { %2363 = vmatmul.mubr.f32.gmra.mrb[68].mxu0 %v9050_v10 }
 0x2db   : > { %2367 = vmatprep.mubr.f32.mxu0 %v6259_v44 }
 0x2dc   : > { %v7778_v54 = vpop.f32.mrb[42].mxu1 }
 0x2dd   : > { %v7780_v51 = vpop.f32.mrb[43].mxu1 }
 0x2de   : > { %2368 = vmatmul.mubr.f32.gmra.mrb[70].mxu0 %v9051_v25 }
 0x2df   : > { %2372 = vmatprep.mubr.f32.mxu0 %v6260_v3  ;;  %v2763_v3 = vpop.permute.xlu0 %2762 }
 0x2e2   : > { %2373 = vmatmul.mubr.f32.gmra.mrb[88].mxu0 %v9052_v18 }
 0x2e3   : > { %2377 = vmatprep.mubr.f32.mxu0 %v6261_v13  ;;  %v7782_v60 = vpop.f32.mrb[44].mxu1 }
 0x2e4   : > { %v7784_v34 = vpop.f32.mrb[45].mxu1 }
 0x2e6   : > { %2378 = vmatmul.mubr.f32.gmra.mrb[90].mxu0 %v9053_v63 }
 0x2e7   : > { %v7786_v37 = vpop.f32.mrb[46].mxu1 }
 0x2e8   : > { %v7788_v2 = vpop.f32.mrb[47].mxu1 }
 0x2eb   : > { %v7790_v24 = vpop.f32.mrb[48].mxu1 }
 0x2ec   : > { %v7792_v55 = vpop.f32.mrb[49].mxu1 }
 0x2ef   : > { %v7794_v21 = vpop.f32.mrb[50].mxu1 }
 0x2f0   : > { %v7796_v29 = vpop.f32.mrb[51].mxu1 }
 0x2f3   : > { %v5233_v48 = vpop.f32.mrb[52].mxu1 }
 0x2f4   : > { %v2619_v32 = vpop.f32.mrb[53].mxu1  ;;  %v2768_v48 = vpop.permute.xlu0 %2767 }
 0x325   : > { %v2129_v57 = vpop.f32.mrb[80].mxu0 }
 0x326   : > { %v2131_v17 = vpop.f32.mrb[81].mxu0 }
 0x329   : > { %v2134_v62 = vpop.f32.mrb[82].mxu0 }
 0x32a   : > { %v2136_v58 = vpop.f32.mrb[83].mxu0 }
 0x32d   : > { %v2204_v23 = vpop.f32.mrb[84].mxu0 }
 0x32e   : > { %v2206_v28 = vpop.f32.mrb[85].mxu0 }
 0x32f   : > { %v3754_v28 = vld [vmem:[#allocation9 + $0x100] sm:$0xff] }
 0x331   : > { %v2209_v4 = vpop.f32.mrb[86].mxu0 }
 0x332   : > { %v2211_v35 = vpop.f32.mrb[87].mxu0  ;;  %v3755_v4 = vld [vmem:[#allocation9 + $0x108] sm:$0xff] }
 0x335   : > { %v2214_v16 = vpop.f32.mrb[4].mxu0 }
 0x336   : > { %v2460_v7 = vadd.f32 %v7709_v9, %v2214_v16  ;;  %v2216_v19 = vpop.f32.mrb[5].mxu0 }
 0x337   : > { %v2773_v19 = vpop.permute.xlu1 %2772 }
 0x338   : > { %v2637_v20 = vmul.f32 %v7801_v36, %v2460_v7 }
 0x339   : > { %v2219_v6 = vpop.f32.mrb[6].mxu0 }
 0x33a   : > { %v2680_v10 = vadd.f32 %v7807_v1, %v2637_v20  ;;  %v2465_v44 = vadd.f32 %v7707_v11, %v2219_v6  ;;  %v2221_v25 = vpop.f32.mrb[7].mxu0  ;;  %v5575_v20 = vpack.c.bf16 %v3755_v4, %v3754_v28 }
 0x33b   : > { %v3756_v25 = vld [vmem:[#allocation9 + $0x110] sm:$0xff] }
 0x33c   : > { %v2716_v18 = vmax.f32 %v2680_v10, 0.0  ;;  %v2638_v13 = vmul.f32 %v7801_v36, %v2465_v44 }
 0x33d   : > { %v2224_v63 = vpop.f32.mrb[8].mxu0 }
 0x33e   : > { %v2681_v9 = vadd.f32 %v7807_v1, %v2638_v13  ;;  %v2470_v57 = vadd.f32 %v7716_v5, %v2224_v63  ;;  %v2226_v17 = vpop.f32.mrb[9].mxu0  ;;  %v2932_v62 = vmul.f32 %v2763_v3, %v2716_v18  ;;  %v3757_v3 = vld [vmem:[#allocation9 + $0x118] sm:$0xff] }
 0x340   : > { %v2717_v58 = vmax.f32 %v2681_v9, 0.0  ;;  %v2639_v23 = vmul.f32 %v7801_v36, %v2470_v57  ;;  %v3040_v6 = vrot.slane %v2932_v62, 7 }
 0x341   : > { %v2229_v35 = vpop.f32.mrb[10].mxu0 }
 0x342   : > { %v2682_v11 = vadd.f32 %v7807_v1, %v2639_v23  ;;  %v2475_v32 = vadd.f32 %v7714_v27, %v2229_v35  ;;  %v2231_v16 = vpop.f32.mrb[11].mxu0  ;;  %v2933_v7 = vmul.f32 %v2768_v48, %v2717_v58  ;;  %v5578_v58 = vpack.c.bf16 %v3757_v3, %v3756_v25  ;;  %v3758_v48 = vld [vmem:[#allocation9 + $0x120] sm:$0xff]  ;;  %v3759_v35 = vld [vmem:[#allocation9 + $0x128] sm:$0xff] }
 0x344   : > { %v2718_v10 = vmax.f32 %v2682_v11, 0.0  ;;  %v2640_v5 = vmul.f32 %v7801_v36, %v2475_v32  ;;  %v3041_v44 = vrot.slane %v2933_v7, 7  ;;  %3930 = vmatprep.mubr.f32.mxu1 %v2933_v7  ;;  %v2778_v11 = vpop.permute.xlu1 %2777  ;;  %v3185_v32 = vrot.slane %v2933_v7, 1 }
 0x345   : > { %v2234_v18 = vpop.f32.mrb[12].mxu0 }
 0x346   : > { %v2683_v13 = vadd.f32 %v7807_v1, %v2640_v5  ;;  %v2480_v63 = vadd.f32 %v7726_v43, %v2234_v18  ;;  %v2236_v9 = vpop.f32.mrb[13].mxu0  ;;  %v3106_v27 = vsel %vm501_vm0, %v3040_v6, %v3041_v44  ;;  %v2934_v17 = vmul.f32 %v2773_v19, %v2718_v10 }
 0x347   : > { %3931 = vmatmul.mubr.f32.vlgmr.msra.gmra.mrb[54].mxu1 %v3106_v27  ;;  %v3761_v9 = vld [vmem:[#allocation9 + $0x138] sm:$0xff] }
 0x348   : > { %v2719_v62 = vmax.f32 %v2683_v13, 0.0  ;;  %v2641_v23 = vmul.f32 %v7801_v36, %v2480_v63  ;;  %v3186_v28 = vrot.slane %v2934_v17, 1  ;;  %3935 = vmatprep.mubr.f32.mxu1 %v2934_v17  ;;  %5576 = vmatpush1.bf16.msra.mxu1 %v5575_v20  ;;  %v3042_v4 = vrot.slane %v2934_v17, 7  ;;  %v2783_v13 = vpop.permute.xlu0 %2782  ;;  %v3760_v63 = vld [vmem:[#allocation9 + $0x130] sm:$0xff] }
 0x349   : > { %v2239_v16 = vpop.f32.mrb[14].mxu0  ;;  %5577 = vmatprep.subr.bf16.mxu1 %v8979_v42  ;;  %v5581_v20 = vpack.c.bf16 %v3759_v35, %v3758_v48 }
 0x34a   : > { %v2684_v43 = vadd.f32 %v7807_v1, %v2641_v23  ;;  %v2485_v19 = vadd.f32 %v7724_v41, %v2239_v16  ;;  %v2241_v6 = vpop.f32.mrb[15].mxu0  ;;  %v3105_v10 = vsel %vm501_vm0, %v3041_v44, %v3042_v4  ;;  %v7829_v5 = vmul.f32 %v2778_v11, %v2719_v62  ;;  %v2788_v16 = vpop.permute.xlu1 %2787 }
 0x34b   : > { %3936 = vmatmul.mubr.f32.gmra.mrb[56].mxu1 %v3105_v10  ;;  %v7833_v25 = vsel %vm646_vm1, %v3185_v32, %v3186_v28 }
 0x34c   : > { %v2720_v7 = vmax.f32 %v2684_v43, 0.0  ;;  %v2642_v3 = vmul.f32 %v7801_v36, %v2485_v19  ;;  %3940 = vmatprep.mubr.f32.mxu1 %v7829_v5  ;;  %5579 = vmatpush1.bf16.msra.mxu1 %v5578_v58  ;;  %v3043_v41 = vrot.slane %v7829_v5, 7  ;;  %v8854_v18 = vrot.slane %v7829_v5, 1  ;;  %v3763_v19 = vld [vmem:[#allocation9 + $0x148] sm:$0xff] }
 0x34d   : > { %v2244_v44 = vpop.f32.mrb[16].mxu0  ;;  %5580 = vmatprep.subr.bf16.mxu1 %v8979_v42 }
 0x34e   : > { %v7840_v27 = vmul.f32 %v2783_v13, %v2720_v7  ;;  %v2685_v17 = vadd.f32 %v7807_v1, %v2642_v3  ;;  %v2490_v62 = vadd.f32 %v7735_v39, %v2244_v44  ;;  %v2246_v23 = vpop.f32.mrb[17].mxu0  ;;  %v3104_v58 = vsel %vm501_vm0, %v3042_v4, %v3043_v41  ;;  %v3762_v4 = vld [vmem:[#allocation9 + $0x140] sm:$0xff] }
 0x34f   : > { %3941 = vmatmul.mubr.f32.gmra.mrb[58].mxu1 %v3104_v58  ;;  %v7850_v48 = vsel %vm646_vm1, %v3186_v28, %v8854_v18  ;;  %v5584_v39 = vpack.c.bf16 %v3761_v9, %v3760_v63  ;;  %v5587_v63 = vpack.c.bf16 %v3763_v19, %v3762_v4  ;;  %v2793_v9 = vpop.permute.xlu0 %2792  ;;  %v2798_v19 = vpop.permute.xlu1 %2797 }
 0x350   : > { %v2721_v35 = vmax.f32 %v2685_v17, 0.0  ;;  %v2643_v11 = vmul.f32 %v7801_v36, %v2490_v62  ;;  %3945 = vmatprep.mubr.f32.mxu1 %v7840_v27  ;;  %v3044_v32 = vrot.slane %v7840_v27, 7  ;;  %5582 = vmatpush1.bf16.msra.mxu1 %v5581_v20  ;;  %v3765_v62 = vld [vmem:[#allocation9 + $0x158] sm:$0xff] }
 0x351   : > { %v2249_v43 = vpop.f32.mrb[18].mxu0  ;;  %5583 = vmatprep.subr.bf16.mxu1 %v8979_v42 }
 0x352   : > { %v7856_v6 = vmul.f32 %v2788_v16, %v2721_v35  ;;  %v2686_v28 = vadd.f32 %v7807_v1, %v2643_v11  ;;  %v2495_v10 = vadd.f32 %v7733_v30, %v2249_v43  ;;  %v2251_v7 = vpop.f32.mrb[19].mxu0  ;;  %v7862_v3 = vsel %vm501_vm0, %v3043_v41, %v3044_v32  ;;  %v3764_v30 = vld [vmem:[#allocation9 + $0x150] sm:$0xff] }
 0x353   : > { %3946 = vmatmul.mubr.f32.gmra.mrb[60].mxu1 %v7862_v3  ;;  %v5590_v4 = vpack.c.bf16 %v3765_v62, %v3764_v30 }
 0x354   : > { %v2722_v20 = vmax.f32 %v2686_v28, 0.0  ;;  %v2644_v13 = vmul.f32 %v7801_v36, %v2495_v10  ;;  %3950 = vmatprep.mubr.f32.mxu1 %v7856_v6  ;;  %v3045_v44 = vrot.slane %v7856_v6, 7  ;;  %5585 = vmatpush1.bf16.msra.mxu1 %v5584_v39  ;;  %v3767_v10 = vld [vmem:[#allocation9 + $0x168] sm:$0xff] }
 0x355   : > { %v2254_v17 = vpop.f32.mrb[20].mxu0  ;;  %5586 = vmatprep.subr.bf16.mxu1 %v8979_v42 }
 0x356   : > { %v7869_v23 = vmul.f32 %v2793_v9, %v2722_v20  ;;  %v2687_v41 = vadd.f32 %v7807_v1, %v2644_v13  ;;  %v2500_v58 = vadd.f32 %v7743_v26, %v2254_v17  ;;  %v2256_v35 = vpop.f32.mrb[21].mxu0  ;;  %v7875_v11 = vsel %vm501_vm0, %v3044_v32, %v3045_v44  ;;  %v3766_v26 = vld [vmem:[#allocation9 + $0x160] sm:$0xff] }
 0x357   : > { %3951 = vmatmul.mubr.f32.gmra.mrb[62].mxu1 %v7875_v11  ;;  %v5593_v62 = vpack.c.bf16 %v3767_v10, %v3766_v26  ;;  %v3769_v35 = vld [vmem:[#allocation9 + $0x178] sm:$0xff] }
 0x358   : > { %v2723_v39 = vmax.f32 %v2687_v41, 0.0  ;;  %v2645_v16 = vmul.f32 %v7801_v36, %v2500_v58  ;;  %3955 = vmatprep.mubr.f32.mxu1 %v7869_v23  ;;  %v3046_v43 = vrot.slane %v7869_v23, 7  ;;  %5588 = vmatpush1.bf16.msra.mxu1 %v5587_v63  ;;  %v2803_v41 = vpop.permute.xlu0 %2802 }
 0x359   : > { %v2259_v28 = vpop.f32.mrb[22].mxu0  ;;  %5589 = vmatprep.subr.bf16.mxu1 %v8979_v42 }
 0x35a   : > { %v7882_v7 = vmul.f32 %v2798_v19, %v2723_v39  ;;  %v2688_v32 = vadd.f32 %v7807_v1, %v2645_v16  ;;  %v2505_v20 = vadd.f32 %v7741_v47, %v2259_v28  ;;  %v2261_v13 = vpop.f32.mrb[23].mxu0  ;;  %v7888_v9 = vsel %vm501_vm0, %v3045_v44, %v3046_v43  ;;  %v3768_v47 = vld [vmem:[#allocation9 + $0x170] sm:$0xff] }
 0x35b   : > { %3956 = vmatmul.mubr.f32.gmra.mrb[64].mxu1 %v7888_v9 }
 0x35c   : > { %v2724_v63 = vmax.f32 %v2688_v32, 0.0  ;;  %v2646_v17 = vmul.f32 %v7801_v36, %v2505_v20  ;;  %3960 = vmatprep.mubr.f32.mxu1 %v7882_v7  ;;  %v3047_v30 = vrot.slane %v7882_v7, 7  ;;  %5591 = vmatpush1.bf16.msra.mxu1 %v5590_v4  ;;  %v5596_v32 = vpack.c.bf16 %v3769_v35, %v3768_v47  ;;  %v2808_v20 = vpop.permute.xlu1 %2807 }
 0x35d   : > { %v2264_v58 = vpop.f32.mrb[24].mxu0  ;;  %5592 = vmatprep.subr.bf16.mxu1 %v8979_v42 }
 0x35e   : > { %v7895_v39 = vmul.f32 %v2803_v41, %v2724_v63  ;;  %v2689_v44 = vadd.f32 %v7807_v1, %v2646_v17  ;;  %v2510_v16 = vadd.f32 %v7751_v31, %v2264_v58  ;;  %v2266_v19 = vpop.f32.mrb[25].mxu0  ;;  %v7901_v28 = vsel %vm501_vm0, %v3046_v43, %v3047_v30  ;;  %v3770_v31 = vld [vmem:[#allocation9 + $0x180] sm:$0xff]  ;;  %v3771_v63 = vld [vmem:[#allocation9 + $0x188] sm:$0xff] }
 0x35f   : > { %3961 = vmatmul.mubr.f32.gmra.mrb[66].mxu1 %v7901_v28  ;;  %v2813_v19 = vpop.permute.xlu0 %2812 }
 0x360   : > { %v2725_v4 = vmax.f32 %v2689_v44, 0.0  ;;  %v2647_v26 = vmul.f32 %v7801_v36, %v2510_v16  ;;  %3965 = vmatprep.mubr.f32.mxu1 %v7895_v39  ;;  %v3048_v10 = vrot.slane %v7895_v39, 7  ;;  %5594 = vmatpush1.bf16.msra.mxu1 %v5593_v62  ;;  %v5599_v16 = vpack.c.bf16 %v3771_v63, %v3770_v31 }
 0x361   : > { %v2269_v13 = vpop.f32.mrb[26].mxu0  ;;  %5595 = vmatprep.subr.bf16.mxu1 %v8979_v42 }
 0x362   : > { %v7908_v17 = vmul.f32 %v2808_v20, %v2725_v4  ;;  %v2690_v43 = vadd.f32 %v7807_v1, %v2647_v26  ;;  %v2515_v41 = vadd.f32 %v7749_v56, %v2269_v13  ;;  %v2271_v58 = vpop.f32.mrb[27].mxu0  ;;  %v7914_v44 = vsel %vm501_vm0, %v3047_v30, %v3048_v10  ;;  %v3772_v56 = vld [vmem:[#allocation9 + $0x190] sm:$0xff]  ;;  %v3773_v26 = vld [vmem:[#allocation9 + $0x198] sm:$0xff] }
 0x363   : > { %3966 = vmatmul.mubr.f32.gmra.mrb[68].mxu1 %v7914_v44  ;;  %v5602_v58 = vpack.c.bf16 %v3773_v26, %v3772_v56 }
 0x364   : > { %v2726_v62 = vmax.f32 %v2690_v43, 0.0  ;;  %v2648_v47 = vmul.f32 %v7801_v36, %v2515_v41  ;;  %3970 = vmatprep.mubr.f32.mxu1 %v7908_v17  ;;  %v3049_v35 = vrot.slane %v7908_v17, 7  ;;  %5597 = vmatpush1.bf16.msra.mxu1 %v5596_v32 }
 0x365   : > { %v2274_v4 = vpop.f32.mrb[28].mxu0  ;;  %5598 = vmatprep.subr.bf16.mxu1 %v8979_v42 }
 0x366   : > { %v7921_v20 = vmul.f32 %v2813_v19, %v2726_v62  ;;  %v2691_v30 = vadd.f32 %v7807_v1, %v2648_v47  ;;  %v2520_v13 = vadd.f32 %v7759_v38, %v2274_v4  ;;  %v2276_v43 = vpop.f32.mrb[29].mxu0  ;;  %v7927_v41 = vsel %vm501_vm0, %v3048_v10, %v3049_v35  ;;  %v2818_v62 = vpop.permute.xlu1 %2817  ;;  %v3774_v38 = vld [vmem:[#allocation9 + $0x1a0] sm:$0xff]  ;;  %v3775_v19 = vld [vmem:[#allocation9 + $0x1a8] sm:$0xff] }
 0x367   : > { %3971 = vmatmul.mubr.f32.gmra.mrb[70].mxu1 %v7927_v41 }
 0x368   : > { %v2727_v32 = vmax.f32 %v2691_v30, 0.0  ;;  %v2649_v31 = vmul.f32 %v7801_v36, %v2520_v13  ;;  %3975 = vmatprep.mubr.f32.mxu1 %v7921_v20  ;;  %v3050_v63 = vrot.slane %v7921_v20, 7  ;;  %5600 = vmatpush1.bf16.msra.mxu1 %v5599_v16 }
 0x369   : > { %v2279_v47 = vpop.f32.mrb[30].mxu0  ;;  %5601 = vmatprep.subr.bf16.mxu1 %v8979_v42 }
 0x36a   : > { %v7934_v4 = vmul.f32 %v2818_v62, %v2727_v32  ;;  %v2692_v10 = vadd.f32 %v7807_v1, %v2649_v31  ;;  %v2525_v30 = vadd.f32 %v7756_v33, %v2279_v47  ;;  %v2281_v43 = vpop.f32.mrb[31].mxu0  ;;  %v7940_v13 = vsel %vm501_vm0, %v3049_v35, %v3050_v63  ;;  %v2823_v62 = vpop.permute.xlu0 %2822  ;;  %v3776_v33 = vld [vmem:[#allocation9 + $0x1b0] sm:$0xff]  ;;  %v3777_v47 = vld [vmem:[#allocation9 + $0x1b8] sm:$0xff] }
 0x36b   : > { %3976 = vmatmul.mubr.f32.gmra.mrb[72].mxu1 %v7940_v13  ;;  %v5605_v32 = vpack.c.bf16 %v3775_v19, %v3774_v38 }
 0x36c   : > { %9055 = vst [vmem:[#allocation50_spill] sm:$0xff] %v7934_v4  ;;  %v2728_v16 = vmax.f32 %v2692_v10, 0.0  ;;  %v2650_v56 = vmul.f32 %v7801_v36, %v2525_v30  ;;  %3980 = vmatprep.mubr.f32.mxu1 %v7934_v4  ;;  %v3051_v26 = vrot.slane %v7934_v4, 7  ;;  %5603 = vmatpush1.bf16.msra.mxu1 %v5602_v58 }
 0x36d   : > { %v2284_v31 = vpop.f32.mrb[32].mxu0  ;;  %5604 = vmatprep.subr.bf16.mxu1 %v8979_v42 }
 0x36e   : > { %v7947_v43 = vmul.f32 %v2823_v62, %v2728_v16  ;;  %v2693_v35 = vadd.f32 %v7807_v1, %v2650_v56  ;;  %v2530_v10 = vadd.f32 %v7764_v50, %v2284_v31  ;;  %v2286_v18 = vpop.f32.mrb[33].mxu0  ;;  %v7953_v30 = vsel %vm501_vm0, %v3050_v63, %v3051_v26  ;;  %v2828_v62 = vpop.permute.xlu1 %2827  ;;  %v3778_v50 = vld [vmem:[#allocation9 + $0x1c0] sm:$0xff] }
 0x36f   : > { %3981 = vmatmul.mubr.f32.gmra.mrb[74].mxu1 %v7953_v30  ;;  %v5608_v16 = vpack.c.bf16 %v3777_v47, %v3776_v33  ;;  %v3779_v18 = vld [vmem:[#allocation9 + $0x1c8] sm:$0xff] }
 0x370   : > { %9056 = vst [vmem:[#allocation54_spill] sm:$0xff] %v7947_v43  ;;  %v2729_v58 = vmax.f32 %v2693_v35, 0.0  ;;  %v2651_v38 = vmul.f32 %v7801_v36, %v2530_v10  ;;  %3985 = vmatprep.mubr.f32.mxu1 %v7947_v43  ;;  %v3052_v19 = vrot.slane %v7947_v43, 7  ;;  %5606 = vmatpush1.bf16.msra.mxu1 %v5605_v32 }
 0x371   : > { %v2289_v56 = vpop.f32.mrb[34].mxu0  ;;  %5607 = vmatprep.subr.bf16.mxu1 %v8979_v42 }
 0x372   : > { %v7960_v31 = vmul.f32 %v2828_v62, %v2729_v58  ;;  %v2694_v63 = vadd.f32 %v7807_v1, %v2651_v38  ;;  %v2535_v35 = vadd.f32 %v7762_v22, %v2289_v56  ;;  %v2291_v4 = vpop.f32.mrb[35].mxu0  ;;  %v7966_v10 = vsel %vm501_vm0, %v3051_v26, %v3052_v19  ;;  %v2833_v62 = vpop.permute.xlu0 %2832  ;;  %v3780_v22 = vld [vmem:[#allocation9 + $0x1d0] sm:$0xff] }
 0x373   : > { %9058 = vst [vmem:[#allocation62_spill] sm:$0xff] %v7966_v10  ;;  %3986 = vmatmul.mubr.f32.gmra.mrb[76].mxu1 %v7966_v10  ;;  %v5611_v58 = vpack.c.bf16 %v3779_v18, %v3778_v50  ;;  %v3781_v4 = vld [vmem:[#allocation9 + $0x1d8] sm:$0xff] }
 0x374   : > { %9057 = vst [vmem:[#allocation58_spill] sm:$0xff] %v7960_v31  ;;  %v2730_v32 = vmax.f32 %v2694_v63, 0.0  ;;  %v2652_v33 = vmul.f32 %v7801_v36, %v2535_v35  ;;  %3990 = vmatprep.mubr.f32.mxu1 %v7960_v31  ;;  %v3053_v47 = vrot.slane %v7960_v31, 7  ;;  %5609 = vmatpush1.bf16.msra.mxu1 %v5608_v16 }
 0x375   : > { %v2294_v38 = vpop.f32.mrb[36].mxu0  ;;  %5610 = vmatprep.subr.bf16.mxu1 %v8979_v42 }
 0x376   : > { %v7973_v56 = vmul.f32 %v2833_v62, %v2730_v32  ;;  %v2695_v26 = vadd.f32 %v7807_v1, %v2652_v33  ;;  %v2540_v63 = vadd.f32 %v7768_v53, %v2294_v38  ;;  %v2296_v43 = vpop.f32.mrb[37].mxu0  ;;  %v7979_v35 = vsel %vm501_vm0, %v3052_v19, %v3053_v47  ;;  %v2838_v62 = vpop.permute.xlu1 %2837  ;;  %v3782_v53 = vld [vmem:[#allocation9 + $0x1e0] sm:$0xff] }
 0x377   : > { %9060 = vst [vmem:[#allocation68_spill] sm:$0xff] %v7979_v35  ;;  %3991 = vmatmul.mubr.f32.gmra.mrb[78].mxu1 %v7979_v35  ;;  %v5614_v32 = vpack.c.bf16 %v3781_v4, %v3780_v22  ;;  %v3783_v43 = vld [vmem:[#allocation9 + $0x1e8] sm:$0xff] }
 0x378   : > { %9059 = vst [vmem:[#allocation65_spill] sm:$0xff] %v7973_v56  ;;  %v2731_v16 = vmax.f32 %v2695_v26, 0.0  ;;  %v2653_v50 = vmul.f32 %v7801_v36, %v2540_v63  ;;  %3995 = vmatprep.mubr.f32.mxu1 %v7973_v56  ;;  %v3054_v18 = vrot.slane %v7973_v56, 7  ;;  %5612 = vmatpush1.bf16.msra.mxu1 %v5611_v58 }
 0x379   : > { %v2299_v33 = vpop.f32.mrb[38].mxu0  ;;  %5613 = vmatprep.subr.bf16.mxu1 %v8979_v42 }
 0x37a   : > { %v7986_v38 = vmul.f32 %v2838_v62, %v2731_v16  ;;  %v2696_v19 = vadd.f32 %v7807_v1, %v2653_v50  ;;  %v2545_v26 = vadd.f32 %v7766_v52, %v2299_v33  ;;  %v2301_v31 = vpop.f32.mrb[39].mxu0  ;;  %v7992_v63 = vsel %vm501_vm0, %v3053_v47, %v3054_v18  ;;  %v2843_v62 = vpop.permute.xlu0 %2842  ;;  %v3784_v52 = vld [vmem:[#allocation9 + $0x1f0] sm:$0xff] }
 0x37b   : > { %9061 = vst [vmem:[#allocation20_spill] sm:$0xff] %v7992_v63  ;;  %3996 = vmatmul.mubr.f32.gmra.mrb[80].mxu1 %v7992_v63  ;;  %v5617_v16 = vpack.c.bf16 %v3783_v43, %v3782_v53  ;;  %v3785_v31 = vld [vmem:[#allocation9 + $0x1f8] sm:$0xff] }
 0x37c   : > { %v2732_v58 = vmax.f32 %v2696_v19, 0.0  ;;  %v2654_v22 = vmul.f32 %v7801_v36, %v2545_v26  ;;  %4000 = vmatprep.mubr.f32.mxu1 %v7986_v38  ;;  %v3055_v4 = vrot.slane %v7986_v38, 7  ;;  %5615 = vmatpush1.bf16.msra.mxu1 %v5614_v32 }
 0x37d   : > { %v2304_v50 = vpop.f32.mrb[40].mxu0  ;;  %5616 = vmatprep.subr.bf16.mxu1 %v8979_v42 }
 0x37e   : > { %v7999_v33 = vmul.f32 %v2843_v62, %v2732_v58  ;;  %v2697_v47 = vadd.f32 %v7807_v1, %v2654_v22  ;;  %v2550_v19 = vadd.f32 %v7772_v45, %v2304_v50  ;;  %v2306_v56 = vpop.f32.mrb[41].mxu0  ;;  %v8005_v26 = vsel %vm501_vm0, %v3054_v18, %v3055_v4  ;;  %v2848_v62 = vpop.permute.xlu1 %2847 }
 0x37f   : > { %9062 = vst [vmem:[#allocation44_spill] sm:$0xff] %v8005_v26  ;;  %4001 = vmatmul.mubr.f32.gmra.mrb[82].mxu1 %v8005_v26  ;;  %v5620_v58 = vpack.c.bf16 %v3785_v31, %v3784_v52  ;;  %v2853_v31 = vpop.permute.xlu0 %2852 }
 0x380   : > { %v2733_v32 = vmax.f32 %v2697_v47, 0.0  ;;  %v2655_v53 = vmul.f32 %v7801_v36, %v2550_v19  ;;  %4005 = vmatprep.mubr.f32.mxu1 %v7999_v33  ;;  %v3056_v43 = vrot.slane %v7999_v33, 7  ;;  %5618 = vmatpush1.bf16.msra.mxu1 %v5617_v16 }
 0x381   : > { %v2309_v22 = vpop.f32.mrb[42].mxu0  ;;  %5619 = vmatprep.subr.bf16.mxu1 %v8979_v42 }
 0x382   : > { %v8012_v45 = vmul.f32 %v2848_v62, %v2733_v32  ;;  %v2698_v56 = vadd.f32 %v7807_v1, %v2655_v53  ;;  %v2555_v18 = vadd.f32 %v7770_v40, %v2309_v22  ;;  %v2311_v50 = vpop.f32.mrb[43].mxu0  ;;  %v8018_v47 = vsel %vm501_vm0, %v3055_v4, %v3056_v43 }
 0x383   : > { %9063 = vst [vmem:[#allocation41_spill] sm:$0xff] %v8018_v47  ;;  %4006 = vmatmul.mubr.f32.gmra.mrb[84].mxu1 %v8018_v47  ;;  %v2858_v50 = vpop.permute.xlu1 %2857 }
 0x384   : > { %v2734_v19 = vmax.f32 %v2698_v56, 0.0  ;;  %v2656_v16 = vmul.f32 %v7801_v36, %v2555_v18  ;;  %4010 = vmatprep.mubr.f32.mxu1 %v8012_v45  ;;  %v3057_v52 = vrot.slane %v8012_v45, 7  ;;  %5621 = vmatpush1.bf16.msra.mxu1 %v5620_v58 }
 0x385   : > { %v2314_v32 = vpop.f32.mrb[44].mxu0  ;;  %5622 = vmatprep.subr.bf16.mxu1 %v8979_v42 }
 0x386   : > { %v8025_v40 = vmul.f32 %v2853_v31, %v2734_v19  ;;  %v2699_v53 = vadd.f32 %v7807_v1, %v2656_v16  ;;  %v2560_v4 = vadd.f32 %v7776_v14, %v2314_v32  ;;  %v2316_v62 = vpop.f32.mrb[45].mxu0  ;;  %v8031_v22 = vsel %vm501_vm0, %v3056_v43, %v3057_v52 }
 0x387   : > { %9065 = vst [vmem:[#allocation48_spill] sm:$0xff] %v8031_v22  ;;  %4011 = vmatmul.mubr.f32.gmra.mrb[86].mxu1 %v8031_v22 }
 0x388   : > { %9064 = vst [vmem:[#allocation42_spill] sm:$0xff] %v8025_v40  ;;  %v2735_v56 = vmax.f32 %v2699_v53, 0.0  ;;  %v2657_v58 = vmul.f32 %v7801_v36, %v2560_v4  ;;  %4015 = vmatprep.mubr.f32.mxu1 %v8025_v40  ;;  %v3058_v18 = vrot.slane %v8025_v40, 7 }
 0x389   : > { %v2319_v19 = vpop.f32.mrb[46].mxu0 }
 0x38a   : > { %v8037_v31 = vmul.f32 %v2858_v50, %v2735_v56  ;;  %v2700_v14 = vadd.f32 %v7807_v1, %v2657_v58  ;;  %v2565_v16 = vadd.f32 %v7774_v49, %v2319_v19  ;;  %v2321_v32 = vpop.f32.mrb[47].mxu0  ;;  %v8043_v43 = vsel %vm501_vm0, %v3057_v52, %v3058_v18  ;;  %v2863_v56 = vpop.permute.xlu0 %2862 }
 0x38b   : > { %9067 = vst [vmem:[#allocation52_spill] sm:$0xff] %v8043_v43  ;;  %4016 = vmatmul.mubr.f32.gmra.mrb[88].mxu1 %v8043_v43 }
 0x38c   : > { %9066 = vst [vmem:[#allocation46_spill] sm:$0xff] %v8037_v31  ;;  %v2736_v53 = vmax.f32 %v2700_v14, 0.0  ;;  %v2658_v4 = vmul.f32 %v7801_v36, %v2565_v16  ;;  %4020 = vmatprep.mubr.f32.mxu1 %v8037_v31  ;;  %v3059_v62 = vrot.slane %v8037_v31, 7 }
 0x38d   : > { %v2324_v50 = vpop.f32.mrb[48].mxu0 }
 0x38e   : > { %v8049_v40 = vmul.f32 %v2863_v56, %v2736_v53  ;;  %v2701_v49 = vadd.f32 %v7807_v1, %v2658_v4  ;;  %v2570_v58 = vadd.f32 %v7780_v51, %v2324_v50  ;;  %v2326_v19 = vpop.f32.mrb[49].mxu0  ;;  %v8055_v52 = vsel %vm501_vm0, %v3058_v18, %v3059_v62  ;;  %v2868_v53 = vpop.permute.xlu1 %2867 }
 0x38f   : > { %9069 = vst [vmem:[#allocation73_spill] sm:$0xff] %v8055_v52  ;;  %4021 = vmatmul.mubr.f32.gmra.mrb[90].mxu1 %v8055_v52 }
 0x390   : > { %9068 = vst [vmem:[#allocation71_spill] sm:$0xff] %v8049_v40  ;;  %v2737_v14 = vmax.f32 %v2701_v49, 0.0  ;;  %v2659_v16 = vmul.f32 %v7801_v36, %v2570_v58  ;;  %4025 = vmatprep.mubr.f32.mxu1 %v8049_v40  ;;  %v3060_v32 = vrot.slane %v8049_v40, 7 }
 0x391   : > { %v2329_v56 = vpop.f32.mrb[50].mxu0 }
 0x392   : > { %v8061_v31 = vmul.f32 %v2868_v53, %v2737_v14  ;;  %v2702_v51 = vadd.f32 %v7807_v1, %v2659_v16  ;;  %v2575_v4 = vadd.f32 %v7778_v54, %v2329_v56  ;;  %v2331_v50 = vpop.f32.mrb[51].mxu0  ;;  %v8067_v18 = vsel %vm501_vm0, %v3059_v62, %v3060_v32  ;;  %v2873_v14 = vpop.permute.xlu0 %2872 }
 0x393   : > { %9071 = vst [vmem:[#allocation74_spill] sm:$0xff] %v8067_v18  ;;  %4026 = vmatmul.mubr.f32.gmra.mrb[92].mxu1 %v8067_v18 }
 0x394   : > { %9070 = vst [vmem:[#allocation56_spill] sm:$0xff] %v8061_v31  ;;  %v2738_v49 = vmax.f32 %v2702_v51, 0.0  ;;  %v2660_v58 = vmul.f32 %v7801_v36, %v2575_v4  ;;  %4030 = vmatprep.mubr.f32.mxu1 %v8061_v31  ;;  %v3061_v19 = vrot.slane %v8061_v31, 7 }
 0x395   : > { %v2334_v53 = vpop.f32.mrb[52].mxu0 }
 0x396   : > { %v8073_v40 = vmul.f32 %v2873_v14, %v2738_v49  ;;  %v2703_v54 = vadd.f32 %v7807_v1, %v2660_v58  ;;  %v2580_v16 = vadd.f32 %v7784_v34, %v2334_v53  ;;  %v2336_v56 = vpop.f32.mrb[53].mxu0  ;;  %v8079_v62 = vsel %vm501_vm0, %v3060_v32, %v3061_v19  ;;  %v2878_v49 = vpop.permute.xlu1 %2877 }
 0x397   : > { %9072 = vst [vmem:[#allocation60_spill] sm:$0xff] %v8079_v62  ;;  %4031 = vmatmul.mubr.f32.gmra.mrb[94].mxu1 %v8079_v62 }
 0x398   : > { %v2739_v51 = vmax.f32 %v2703_v54, 0.0  ;;  %v2661_v4 = vmul.f32 %v7801_v36, %v2580_v16  ;;  %4035 = vmatprep.mubr.f32.mxu1 %v8073_v40  ;;  %v3062_v50 = vrot.slane %v8073_v40, 7 }
 0x399   : > { %v2339_v14 = vpop.f32.mrb[58].mxu0 }
 0x39a   : > { %v8085_v31 = vmul.f32 %v2878_v49, %v2739_v51  ;;  %v2704_v34 = vadd.f32 %v7807_v1, %v2661_v4  ;;  %v5782_v58 = vadd.f32 %v2339_v14, %v7636_v59  ;;  %v2341_v53 = vpop.f32.mrb[59].mxu0  ;;  %v8091_v32 = vsel %vm501_vm0, %v3061_v19, %v3062_v50  ;;  %v2883_v51 = vpop.permute.xlu0 %2882 }
 0x39b   : > { %4036 = vmatmul.mubr.f32.gmra.mrb[96].mxu1 %v8091_v32  ;;  %v3786_v53 = vld [vmem:[#allocation9 + $0x200] sm:$0xff] }
 0x39c   : > { %9073 = vst [vmem:[#allocation28_spill] sm:$0xff] %v8085_v31  ;;  %v2740_v54 = vmax.f32 %v2704_v34, 0.0  ;;  %v8095_v16 = vadd.f32 %v5782_v58, %v7782_v60  ;;  %4040 = vmatprep.mubr.f32.mxu1 %v8085_v31  ;;  %v3063_v56 = vrot.slane %v8085_v31, 7  ;;  %v3789_v31 = vld [vmem:[#allocation9 + $0x218] sm:$0xff] }
 0x39d   : > { %v2344_v49 = vpop.f32.mrb[60].mxu0 }
 0x39e   : > { %v8099_v4 = vmul.f32 %v2883_v51, %v2740_v54  ;;  %v5783_v59 = vadd.f32 %v2344_v49, %v7639_v0  ;;  %v2346_v14 = vpop.f32.mrb[61].mxu0  ;;  %v8104_v19 = vsel %vm501_vm0, %v3062_v50, %v3063_v56  ;;  %v3787_v54 = vld [vmem:[#allocation9 + $0x208] sm:$0xff] }
 0x39f   : > { %9074 = vst [vmem:[#allocation29_spill] sm:$0xff] %v8104_v19  ;;  %4041 = vmatmul.mubr.f32.gmra.mrb[98].mxu1 %v8104_v19  ;;  %v5623_v49 = vpack.c.bf16 %v3787_v54, %v3786_v53  ;;  %v3788_v14 = vld [vmem:[#allocation9 + $0x210] sm:$0xff]  ;;  %v3791_v53 = vld [vmem:[#allocation9 + $0x228] sm:$0xff] }
 0x3a0   : > { %v8108_v60 = vadd.f32 %v5783_v59, %v7788_v2  ;;  %4045 = vmatprep.mubr.f32.mxu1 %v8099_v4  ;;  %v8875_v34 = vrot.slane %v8099_v4, 7 }
 0x3a1   : > { %v2349_v58 = vpop.f32.mrb[62].mxu0 }
 0x3a2   : > { %v5784_v51 = vadd.f32 %v2349_v58, %v7643_v12  ;;  %v2351_v0 = vpop.f32.mrb[63].mxu0  ;;  %v8117_v50 = vsel %vm501_vm0, %v3063_v56, %v8875_v34 }
 0x3a3   : > { %9075 = vst [vmem:[#allocation30_spill] sm:$0xff] %v8117_v50  ;;  %4046 = vmatmul.mubr.f32.gmra.mrb[100].mxu1 %v8117_v50  ;;  %v8126_v0 = vpop.permute.xlu1 %2887 }
 0x3a4   : > { %v8121_v2 = vadd.f32 %v5784_v51, %v7786_v37  ;;  %4115 = vmatprep.mubr.f32.mxu1 %v7862_v3  ;;  %v5626_v37 = vpack.c.bf16 %v3789_v31, %v3788_v14  ;;  %v3790_v3 = vld [vmem:[#allocation9 + $0x220] sm:$0xff]  ;;  %v3792_v14 = vld [vmem:[#allocation9 + $0x230] sm:$0xff] }
 0x3a5   : > { %v2354_v59 = vpop.f32.mrb[64].mxu0  ;;  %v5629_v31 = vpack.c.bf16 %v3791_v53, %v3790_v3 }
 0x3a6   : > { %v5785_v12 = vadd.f32 %v2354_v59, %v7646_v61  ;;  %v2356_v58 = vpop.f32.mrb[65].mxu0 }
 0x3a7   : > { %4116 = vmatmul.mubr.f32.vlgmr.msra.gmra.mrb[54].mxu1 %v7833_v25  ;;  %v3188_v25 = vrot.slane %v7840_v27, 1  ;;  %v8134_v58 = vpop.permute.xlu0 %2892 }
 0x3a8   : > { %v2600_v56 = vadd.f32 %v5785_v12, %v7792_v55  ;;  %4120 = vmatprep.mubr.f32.mxu1 %v7875_v11  ;;  %5624 = vmatpush1.bf16.msra.mxu1 %v5623_v49  ;;  %v8141_v12 = vpop.permute.xlu1 %2897 }
 0x3a9   : > { %v2359_v51 = vpop.f32.mrb[66].mxu0  ;;  %5625 = vmatprep.subr.bf16.mxu1 %v8979_v42 }
 0x3aa   : > { %v2665_v54 = vmul.f32 %v7801_v36, %v2600_v56  ;;  %v5786_v61 = vadd.f32 %v2359_v51, %v7650_v8  ;;  %v2361_v59 = vpop.f32.mrb[67].mxu0  ;;  %v3793_v8 = vld [vmem:[#allocation9 + $0x238] sm:$0xff] }
 0x3ab   : > { %4121 = vmatmul.mubr.f32.gmra.mrb[56].mxu1 %v7850_v48  ;;  %v5632_v53 = vpack.c.bf16 %v3793_v8, %v3792_v14 }
 0x3ac   : > { %v2708_v55 = vadd.f32 %v7807_v1, %v2665_v54  ;;  %v2605_v11 = vadd.f32 %v5786_v61, %v7790_v24  ;;  %4125 = vmatprep.mubr.f32.mxu1 %v7888_v9  ;;  %5627 = vmatpush1.bf16.msra.mxu1 %v5626_v37  ;;  %v9076_v54 = vrot.slane %v7829_v5, 1  ;;  %v3189_v9 = vrot.slane %v7856_v6, 1  ;;  %v2903_v61 = vpop.permute.xlu0 %2902 }
 0x3ad   : > { %v2364_v49 = vpop.f32.mrb[68].mxu0  ;;  %5628 = vmatprep.subr.bf16.mxu1 %v8979_v42 }
 0x3ae   : > { %v2666_v56 = vmul.f32 %v7801_v36, %v2605_v11  ;;  %v5787_v51 = vadd.f32 %v2364_v49, %v7653_v46  ;;  %v2366_v48 = vpop.f32.mrb[69].mxu0  ;;  %v3247_v24 = vsel %vm646_vm1, %v9076_v54, %v3188_v25  ;;  %v2744_v37 = vmax.f32 %v2708_v55, 0.0  ;;  %v3794_v46 = vld [vmem:[#allocation9 + $0x240] sm:$0xff]  ;;  %v3795_v11 = vld [vmem:[#allocation9 + $0x248] sm:$0xff] }
 0x3af   : > { %4126 = vmatmul.mubr.f32.gmra.mrb[58].mxu1 %v3247_v24  ;;  %v3191_v24 = vrot.slane %v7882_v7, 1 }
 0x3b0   : > { %v2610_v3 = vadd.f32 %v5787_v51, %v7796_v29  ;;  %4130 = vmatprep.mubr.f32.mxu1 %v7901_v28  ;;  %5630 = vmatpush1.bf16.msra.mxu1 %v5629_v31  ;;  %v2709_v5 = vadd.f32 %v7807_v1, %v2666_v56  ;;  %v8158_v29 = vsel %vm646_vm1, %v3188_v25, %v3189_v9  ;;  %v3190_v31 = vrot.slane %v7869_v23, 1  ;;  %v2908_v51 = vpop.permute.xlu1 %2907  ;;  %v3796_v25 = vld [vmem:[#allocation9 + $0x250] sm:$0xff] }
 0x3b1   : > { %v2369_v59 = vpop.f32.mrb[70].mxu0  ;;  %5631 = vmatprep.subr.bf16.mxu1 %v8979_v42  ;;  %v8161_v14 = vmul.f32 %v2903_v61, %v2744_v37 }
 0x3b2   : > { %v2667_v49 = vmul.f32 %v7801_v36, %v2610_v3  ;;  %v5788_v48 = vadd.f32 %v2369_v59, %v7693_v15  ;;  %v2371_v55 = vpop.f32.mrb[71].mxu0  ;;  %v2745_v8 = vmax.f32 %v2709_v5, 0.0  ;;  %v5635_v15 = vpack.c.bf16 %v3795_v11, %v3794_v46  ;;  %v3797_v3 = vld [vmem:[#allocation9 + $0x258] sm:$0xff] }
 0x3b3   : > { %4131 = vmatmul.mubr.f32.gmra.mrb[60].mxu1 %v8158_v29  ;;  %v5638_v55 = vpack.c.bf16 %v3797_v3, %v3796_v25 }
 0x3b4   : > { %v2710_v54 = vadd.f32 %v7807_v1, %v2667_v49  ;;  %v2615_v56 = vadd.f32 %v5788_v48, %v7794_v21  ;;  %4135 = vmatprep.mubr.f32.mxu1 %v7914_v44  ;;  %5633 = vmatpush1.bf16.msra.mxu1 %v5632_v53  ;;  %v8169_v37 = vmul.f32 %v2908_v51, %v2745_v8  ;;  %v2913_v48 = vpop.permute.xlu0 %2912  ;;  %v8874_v53 = vrot.slane %v8161_v14, 1  ;;  %v3798_v8 = vld [vmem:[#allocation9 + $0x260] sm:$0xff] }
 0x3b5   : > { %5634 = vmatprep.subr.bf16.mxu1 %v8979_v42  ;;  %v2374_v61 = vpop.f32.mrb[88].mxu0  ;;  %v8174_v49 = vsel %vm646_vm1, %v3189_v9, %v3190_v31  ;;  %v8185_v9 = vsel %vm646_vm1, %v3190_v31, %v3191_v24 }
 0x3b6   : > { %9077 = vst [vmem:[#allocation31_spill] sm:$0xff] %v8169_v37  ;;  %v2746_v59 = vmax.f32 %v2710_v54, 0.0  ;;  %v2668_v5 = vmul.f32 %v7801_v36, %v2615_v56  ;;  %v2376_v21 = vpop.f32.mrb[89].mxu0  ;;  %v3213_v46 = vrot.slane %v8169_v37, 1  ;;  %v3799_v36 = vld [vmem:[#allocation9 + $0x268] sm:$0xff]  ;;  %v3192_v54 = vrot.slane %v7895_v39, 1 }
 0x3b7   : > { %4136 = vmatmul.mubr.f32.gmra.mrb[62].mxu1 %v8174_v49  ;;  %v8873_v25 = vrot.slane %v8169_v37, 7  ;;  %v3200_v37 = vrot.slane %v7999_v33, 1 }
 0x3b8   : > { %v2711_v11 = vadd.f32 %v7807_v1, %v2668_v5  ;;  %4140 = vmatprep.mubr.f32.mxu1 %v7927_v41  ;;  %5636 = vmatpush1.bf16.msra.mxu1 %v5635_v15  ;;  %v8181_v51 = vmul.f32 %v2913_v48, %v2746_v59  ;;  %v8193_v1 = vsel %vm646_vm1, %v8874_v53, %v3213_v46  ;;  %v2918_v59 = vpop.permute.xlu1 %2917  ;;  %v9084_v53 = vld [vmem:[#allocation54_spill] sm:$0xff] }
 0x3b9   : > { %5637 = vmatprep.subr.bf16.mxu1 %v8979_v42  ;;  %9079 = vst [vmem:[#allocation33_spill] sm:$0xff] %v8193_v1  ;;  %v2379_v56 = vpop.f32.mrb[90].mxu0  ;;  %v5641_v5 = vpack.c.bf16 %v3799_v36, %v3798_v8  ;;  %v8213_v8 = vsel %vm646_vm1, %v3191_v24, %v3192_v54  ;;  %v3196_v34 = vrot.slane %v9084_v53, 1  ;;  %v9086_v1 = vld [vmem:[#allocation65_spill] sm:$0xff] }
 0x3ba   : > { %9078 = vst [vmem:[#allocation32_spill] sm:$0xff] %v8181_v51  ;;  %v2747_v15 = vmax.f32 %v2711_v11, 0.0  ;;  %v3070_v3 = vrot.slane %v8181_v51, 7  ;;  %v3214_v61 = vrot.slane %v8181_v51, 1  ;;  %v2381_v31 = vpop.f32.mrb[91].mxu0  ;;  %v3800_v56 = vld [vmem:[#allocation9 + $0x270] sm:$0xff] }
 0x3bb   : > { %4141 = vmatmul.mubr.f32.gmra.mrb[64].mxu1 %v8185_v9  ;;  %v3801_v31 = vld [vmem:[#allocation9 + $0x278] sm:$0xff]  ;;  %v3199_v51 = vrot.slane %v7986_v38, 1 }
 0x3bc   : > { %4145 = vmatprep.mubr.f32.mxu1 %v7940_v13  ;;  %5639 = vmatpush1.bf16.msra.mxu1 %v5638_v55  ;;  %v8204_v21 = vsel %vm501_vm0, %v8873_v25, %v3070_v3  ;;  %v8208_v48 = vsel %vm646_vm1, %v3213_v46, %v3214_v61  ;;  %v2963_v11 = vmul.f32 %v2918_v59, %v2747_v15  ;;  %v3193_v55 = vrot.slane %v7908_v17, 1  ;;  %v3802_v15 = vld [vmem:[#allocation9 + $0x280] sm:$0xff]  ;;  %v3803_v59 = vld [vmem:[#allocation9 + $0x288] sm:$0xff] }
 0x3bd   : > { %9080 = vst [vmem:[#allocation34_spill] sm:$0xff] %v8204_v21  ;;  %9081 = vst [vmem:[#allocation35_spill] sm:$0xff] %v8208_v48  ;;  %5640 = vmatprep.subr.bf16.mxu1 %v8979_v42  ;;  %v5644_v3 = vpack.c.bf16 %v3801_v31, %v3800_v56  ;;  %v3805_v56 = vld [vmem:[#allocation9 + $0x298] sm:$0xff]  ;;  %v3198_v21 = vrot.slane %v9086_v1, 1 }
 0x3be   : > { %v3215_v36 = vrot.slane %v2963_v11, 1  ;;  %v8225_v24 = vsel %vm646_vm1, %v3192_v54, %v3193_v55  ;;  %v3194_v11 = vrot.slane %v7921_v20, 1 }
 0x3bf   : > { %4146 = vmatmul.mubr.f32.gmra.mrb[66].mxu1 %v8213_v8 }
 0x3c0   : > { %4150 = vmatprep.mubr.f32.mxu1 %v7953_v30  ;;  %5642 = vmatpush1.bf16.msra.mxu1 %v5641_v5  ;;  %v8220_v46 = vsel %vm646_vm1, %v3214_v61, %v3215_v36  ;;  %v5647_v5 = vpack.c.bf16 %v3803_v59, %v3802_v15  ;;  %v3804_v61 = vld [vmem:[#allocation9 + $0x290] sm:$0xff]  ;;  %v8233_v31 = vsel %vm646_vm1, %v3193_v55, %v3194_v11  ;;  %v3807_v15 = vld [vmem:[#allocation9 + $0x2a8] sm:$0xff] }
 0x3c1   : > { %9082 = vst [vmem:[#allocation36_spill] sm:$0xff] %v8220_v46  ;;  %5643 = vmatprep.subr.bf16.mxu1 %v8979_v42  ;;  %v9083_v36 = vld [vmem:[#allocation50_spill] sm:$0xff]  ;;  %v5650_v54 = vpack.c.bf16 %v3805_v56, %v3804_v61  ;;  %v3809_v61 = vld [vmem:[#allocation9 + $0x2b8] sm:$0xff]  ;;  %v9117_v57 = vld [vmem:[#allocation33_spill] sm:$0xff] }
 0x3c2   : > { %v3195_v25 = vrot.slane %v9083_v36, 1  ;;  %v9085_v46 = vld [vmem:[#allocation58_spill] sm:$0xff] }
 0x3c3   : > { %4151 = vmatmul.mubr.f32.gmra.mrb[68].mxu1 %v8225_v24  ;;  %v3197_v48 = vrot.slane %v9085_v46, 1 }
 0x3c4   : > { %4155 = vmatprep.mubr.f32.mxu1 %v7966_v10  ;;  %5645 = vmatpush1.bf16.msra.mxu1 %v5644_v3  ;;  %v3806_v3 = vld [vmem:[#allocation9 + $0x2a0] sm:$0xff]  ;;  %v8241_v59 = vsel %vm646_vm1, %v3194_v11, %v3195_v25  ;;  %v8249_v56 = vsel %vm646_vm1, %v3195_v25, %v3196_v34 }
 0x3c5   : > { %5646 = vmatprep.subr.bf16.mxu1 %v8979_v42  ;;  %v5653_v55 = vpack.c.bf16 %v3807_v15, %v3806_v3  ;;  %v3811_v3 = vld [vmem:[#allocation9 + $0x2c8] sm:$0xff]  ;;  %v8257_v15 = vsel %vm646_vm1, %v3196_v34, %v3197_v48 }
 0x3c7   : > { %4156 = vmatmul.mubr.f32.gmra.mrb[70].mxu1 %v8233_v31 }
 0x3c8   : > { %4160 = vmatprep.mubr.f32.mxu1 %v7979_v35  ;;  %5648 = vmatpush1.bf16.msra.mxu1 %v5647_v5  ;;  %v3808_v5 = vld [vmem:[#allocation9 + $0x2b0] sm:$0xff] }
 0x3c9   : > { %5649 = vmatprep.subr.bf16.mxu1 %v8979_v42  ;;  %v5656_v11 = vpack.c.bf16 %v3809_v61, %v3808_v5  ;;  %v3813_v5 = vld [vmem:[#allocation9 + $0x2d8] sm:$0xff]  ;;  %v8265_v61 = vsel %vm646_vm1, %v3197_v48, %v3198_v21 }
 0x3cb   : > { %4161 = vmatmul.mubr.f32.gmra.mrb[72].mxu1 %v8241_v59 }
 0x3cc   : > { %4165 = vmatprep.mubr.f32.mxu1 %v7992_v63  ;;  %5651 = vmatpush1.bf16.msra.mxu1 %v5650_v54  ;;  %v3810_v54 = vld [vmem:[#allocation9 + $0x2c0] sm:$0xff] }
 0x3cd   : > { %5652 = vmatprep.subr.bf16.mxu1 %v8979_v42  ;;  %v5659_v25 = vpack.c.bf16 %v3811_v3, %v3810_v54  ;;  %v3815_v54 = vld [vmem:[#allocation9 + $0x2e8] sm:$0xff]  ;;  %v8273_v3 = vsel %vm646_vm1, %v3198_v21, %v3199_v51 }
 0x3cf   : > { %4166 = vmatmul.mubr.f32.gmra.mrb[74].mxu1 %v8249_v56 }
 0x3d0   : > { %4170 = vmatprep.mubr.f32.mxu1 %v8005_v26  ;;  %5654 = vmatpush1.bf16.msra.mxu1 %v5653_v55  ;;  %v3812_v55 = vld [vmem:[#allocation9 + $0x2d0] sm:$0xff] }
 0x3d1   : > { %5655 = vmatprep.subr.bf16.mxu1 %v8979_v42  ;;  %v5662_v34 = vpack.c.bf16 %v3813_v5, %v3812_v55  ;;  %v3817_v55 = vld [vmem:[#allocation9 + $0x2f8] sm:$0xff]  ;;  %v8281_v5 = vsel %vm646_vm1, %v3199_v51, %v3200_v37  ;;  %v6262_v51 = vld [vmem:[%s8755_s3] ss:$0 sm:$0xff] }
 0x3d2   : > { %v2664_v63 = vmul.f32 %v6262_v51, %v8121_v2  ;;  %v3206_v2 = vrot.slane %v8073_v40, 1 }
 0x3d3   : > { %4171 = vmatmul.mubr.f32.gmra.mrb[76].mxu1 %v8257_v15 }
 0x3d4   : > { %4175 = vmatprep.mubr.f32.mxu1 %v8018_v47  ;;  %5657 = vmatpush1.bf16.msra.mxu1 %v5656_v11  ;;  %v3814_v11 = vld [vmem:[#allocation9 + $0x2e0] sm:$0xff] }
 0x3d5   : > { %5658 = vmatprep.subr.bf16.mxu1 %v8979_v42  ;;  %v5665_v48 = vpack.c.bf16 %v3815_v54, %v3814_v11  ;;  %v9087_v11 = vld [vmem:[#allocation42_spill] sm:$0xff] }
 0x3d6   : > { %v3202_v54 = vrot.slane %v9087_v11, 1 }
 0x3d7   : > { %4176 = vmatmul.mubr.f32.gmra.mrb[78].mxu1 %v8265_v61 }
 0x3d8   : > { %4180 = vmatprep.mubr.f32.mxu1 %v8031_v22  ;;  %5660 = vmatpush1.bf16.msra.mxu1 %v5659_v25  ;;  %v3816_v25 = vld [vmem:[#allocation9 + $0x2f0] sm:$0xff]  ;;  %v3201_v22 = vrot.slane %v8012_v45, 1 }
 0x3d9   : > { %5661 = vmatprep.subr.bf16.mxu1 %v8979_v42  ;;  %v5668_v21 = vpack.c.bf16 %v3817_v55, %v3816_v25  ;;  %v6263_v55 = vld [vmem:[%s8756_s4] ss:$0 sm:$0xff] }
 0x3da   : > { %v2707_v10 = vadd.f32 %v6263_v55, %v2664_v63 }
 0x3db   : > { %4181 = vmatmul.mubr.f32.gmra.mrb[80].mxu1 %v8273_v3 }
 0x3dc   : > { %4185 = vmatprep.mubr.f32.mxu1 %v8043_v43  ;;  %5663 = vmatpush1.bf16.msra.mxu1 %v5662_v34  ;;  %v8289_v34 = vsel %vm646_vm1, %v3200_v37, %v3201_v22  ;;  %v2662_v43 = vmul.f32 %v6262_v51, %v8095_v16  ;;  %v9088_v37 = vld [vmem:[#allocation46_spill] sm:$0xff]  ;;  %v2663_v16 = vmul.f32 %v6262_v51, %v8108_v60  ;;  %v9090_v60 = vld [vmem:[#allocation56_spill] sm:$0xff] }
 0x3dd   : > { %5664 = vmatprep.subr.bf16.mxu1 %v8979_v42  ;;  %v3203_v25 = vrot.slane %v9088_v37, 1 }
 0x3de   : > { %v2706_v26 = vadd.f32 %v6263_v55, %v2663_v16 }
 0x3df   : > { %4186 = vmatmul.mubr.f32.gmra.mrb[82].mxu1 %v8281_v5 }
 0x3e0   : > { %4190 = vmatprep.mubr.f32.mxu1 %v8055_v52  ;;  %5666 = vmatpush1.bf16.msra.mxu1 %v5665_v48  ;;  %v8301_v48 = vsel %vm646_vm1, %v3201_v22, %v3202_v54  ;;  %v2705_v52 = vadd.f32 %v6263_v55, %v2662_v43 }
 0x3e1   : > { %5667 = vmatprep.subr.bf16.mxu1 %v8979_v42 }
 0x3e2   : > { %v2741_v47 = vmax.f32 %v2705_v52, 0.0 }
 0x3e3   : > { %4191 = vmatmul.mubr.f32.gmra.mrb[84].mxu1 %v8289_v34 }
 0x3e4   : > { %4195 = vmatprep.mubr.f32.mxu1 %v8067_v18  ;;  %5669 = vmatpush1.bf16.msra.mxu1 %v5668_v21  ;;  %v8312_v21 = vsel %vm646_vm1, %v3202_v54, %v3203_v25  ;;  %v9089_v18 = vld [vmem:[#allocation71_spill] sm:$0xff]  ;;  %v8324_v35 = vmul.f32 %v8126_v0, %v2741_v47  ;;  %v2742_v54 = vmax.f32 %v2706_v26, 0.0  ;;  %v9091_v26 = vld [vmem:[#allocation28_spill] sm:$0xff] }
 0x3e5   : > { %5670 = vmatprep.subr.bf16.mxu1 %v8979_v42  ;;  %v3204_v22 = vrot.slane %v9089_v18, 1  ;;  %v3207_v0 = vrot.slane %v9091_v26, 1 }
 0x3e6   : > { %v8334_v51 = vmul.f32 %v8134_v58, %v2742_v54  ;;  %v3065_v47 = vrot.slane %v8324_v35, 7  ;;  %v9092_v58 = vrot.slane %v8099_v4, 7 }
 0x3e7   : > { %4196 = vmatmul.mubr.f32.gmra.mrb[86].mxu1 %v8301_v48  ;;  %v8320_v43 = vsel %vm646_vm1, %v3203_v25, %v3204_v22  ;;  %v2743_v25 = vmax.f32 %v2707_v10, 0.0 }
 0x3e8   : > { %4200 = vmatprep.mubr.f32.mxu1 %v8079_v62  ;;  %v3205_v62 = vrot.slane %v9090_v60, 1  ;;  %v8352_v10 = vsel %vm501_vm0, %v9092_v58, %v3065_v47  ;;  %v3066_v16 = vrot.slane %v8334_v51, 7  ;;  %v3209_v58 = vrot.slane %v8324_v35, 1 }
 0x3e9   : > { %v8345_v55 = vmul.f32 %v8141_v12, %v2743_v25  ;;  %9093 = vst [vmem:[#allocation37_spill] sm:$0xff] %v8352_v10 }
 0x3ea   : > { %v8330_v52 = vsel %vm646_vm1, %v3204_v22, %v3205_v62  ;;  %v8341_v63 = vsel %vm646_vm1, %v3205_v62, %v3206_v2  ;;  %v8358_v62 = vsel %vm646_vm1, %v3206_v2, %v3207_v0  ;;  %v3208_v22 = vrot.slane %v8099_v4, 1 }
 0x3eb   : > { %4201 = vmatmul.mubr.f32.gmra.mrb[88].mxu1 %v8312_v21  ;;  %v8364_v12 = vsel %vm501_vm0, %v3065_v47, %v3066_v16  ;;  %v8893_v54 = vrot.slane %v8345_v55, 7  ;;  %v3818_v47 = vld [vmem:[#allocation9 + $0x300] sm:$0xff] }
 0x3ec   : > { %4205 = vmatprep.mubr.f32.mxu1 %v8091_v32  ;;  %9094 = vst [vmem:[#allocation38_spill] sm:$0xff] %v8364_v12  ;;  %v8370_v25 = vsel %vm646_vm1, %v3207_v0, %v3208_v22  ;;  %v8385_v0 = vsel %vm646_vm1, %v3208_v22, %v3209_v58 }
 0x3ed   : > { %v8378_v2 = vsel %vm501_vm0, %v3066_v16, %v8893_v54  ;;  %v3822_v54 = vld [vmem:[#allocation9 + $0x320] sm:$0xff] }
 0x3ee   : > { %9095 = vst [vmem:[#allocation39_spill] sm:$0xff] %v8378_v2 }
 0x3ef   : > { %4206 = vmatmul.mubr.f32.gmra.mrb[90].mxu1 %v8320_v43 }
 0x3f0   : > { %4210 = vmatprep.mubr.f32.mxu1 %v8104_v19  ;;  %v3821_v19 = vld [vmem:[#allocation9 + $0x318] sm:$0xff] }
 0x3f3   : > { %4211 = vmatmul.mubr.f32.gmra.mrb[92].mxu1 %v8330_v52 }
 0x3f4   : > { %4215 = vmatprep.mubr.f32.mxu1 %v8117_v50  ;;  %v3820_v50 = vld [vmem:[#allocation9 + $0x310] sm:$0xff] }
 0x3f5   : > { %v5674_v16 = vpack.c.bf16 %v3821_v19, %v3820_v50  ;;  %v3826_v19 = vld [vmem:[#allocation9 + $0x340] sm:$0xff]  ;;  %v3827_v50 = vld [vmem:[#allocation9 + $0x348] sm:$0xff] }
 0x3f7   : > { %4216 = vmatmul.mubr.f32.gmra.mrb[94].mxu1 %v8341_v63 }
 0x3f8   : > { %4220 = vmatprep.mubr.f32.mxu1 %v8352_v10  ;;  %v3819_v10 = vld [vmem:[#allocation9 + $0x308] sm:$0xff] }
 0x3fb   : > { %4221 = vmatmul.mubr.f32.gmra.mrb[96].mxu1 %v8358_v62 }
 0x3fc   : > { %4225 = vmatprep.mubr.f32.mxu1 %v8364_v12  ;;  %v5671_v12 = vpack.c.bf16 %v3819_v10, %v3818_v47  ;;  %v3825_v10 = vld [vmem:[#allocation9 + $0x338] sm:$0xff]  ;;  %v3832_v47 = vld [vmem:[#allocation9 + $0x370] sm:$0xff] }
 0x3ff   : > { %4226 = vmatmul.mubr.f32.gmra.mrb[98].mxu1 %v8370_v25 }
 0x400   : > { %4230 = vmatprep.mubr.f32.mxu1 %v8378_v2  ;;  %v3823_v2 = vld [vmem:[#allocation9 + $0x328] sm:$0xff] }
 0x401   : > { %v5677_v22 = vpack.c.bf16 %v3823_v2, %v3822_v54  ;;  %v3831_v54 = vld [vmem:[#allocation9 + $0x368] sm:$0xff] }
 0x403   : > { %4231 = vmatmul.mubr.f32.gmra.mrb[100].mxu1 %v8385_v0 }
 0x404   : > { %4300 = vmatprep.mubr.f32.mxu1 %v8158_v29  ;;  %v3824_v29 = vld [vmem:[#allocation9 + $0x330] sm:$0xff] }
 0x407   : > { %4301 = vmatmul.mubr.f32.vlgmr.msra.gmra.mrb[54].mxu1 %v7840_v27  ;;  %v5680_v27 = vpack.c.bf16 %v3825_v10, %v3824_v29  ;;  %v3834_v29 = vld [vmem:[#allocation9 + $0x380] sm:$0xff]  ;;  %v3835_v10 = vld [vmem:[#allocation9 + $0x388] sm:$0xff] }
 0x408   : > { %4305 = vmatprep.mubr.f32.mxu1 %v8174_v49  ;;  %5672 = vmatpush1.bf16.msra.mxu1 %v5671_v12  ;;  %v3828_v49 = vld [vmem:[#allocation9 + $0x350] sm:$0xff]  ;;  %v3830_v12 = vld [vmem:[#allocation9 + $0x360] sm:$0xff] }
 0x409   : > { %5673 = vmatprep.subr.bf16.mxu1 %v8979_v42  ;;  %v5689_v2 = vpack.c.bf16 %v3831_v54, %v3830_v12  ;;  %v3840_v12 = vld [vmem:[#allocation9 + $0x3b0] sm:$0xff]  ;;  %v3841_v54 = vld [vmem:[#allocation9 + $0x3b8] sm:$0xff] }
 0x40b   : > { %4306 = vmatmul.mubr.f32.gmra.mrb[56].mxu1 %v7856_v6  ;;  %v5683_v6 = vpack.c.bf16 %v3827_v50, %v3826_v19  ;;  %v3836_v19 = vld [vmem:[#allocation9 + $0x390] sm:$0xff]  ;;  %v3837_v50 = vld [vmem:[#allocation9 + $0x398] sm:$0xff] }
 0x40c   : > { %4310 = vmatprep.mubr.f32.mxu1 %v8185_v9  ;;  %5675 = vmatpush1.bf16.msra.mxu1 %v5674_v16  ;;  %v3829_v9 = vld [vmem:[#allocation9 + $0x358] sm:$0xff] }
 0x40d   : > { %5676 = vmatprep.subr.bf16.mxu1 %v8979_v42  ;;  %v3833_v16 = vld [vmem:[#allocation9 + $0x378] sm:$0xff] }
 0x40f   : > { %4311 = vmatmul.mubr.f32.gmra.mrb[58].mxu1 %v7869_v23  ;;  %v5686_v23 = vpack.c.bf16 %v3829_v9, %v3828_v49  ;;  %v3838_v49 = vld [vmem:[#allocation9 + $0x3a0] sm:$0xff]  ;;  %v3839_v9 = vld [vmem:[#allocation9 + $0x3a8] sm:$0xff] }
 0x410   : > { %4315 = vmatprep.mubr.f32.mxu1 %v8213_v8  ;;  %5678 = vmatpush1.bf16.msra.mxu1 %v5677_v22  ;;  %v5692_v22 = vpack.c.bf16 %v3833_v16, %v3832_v47  ;;  %v3842_v47 = vld [vmem:[#allocation9 + $0x3c0] sm:$0xff]  ;;  %v3843_v16 = vld [vmem:[#allocation9 + $0x3c8] sm:$0xff] }
 0x411   : > { %5679 = vmatprep.subr.bf16.mxu1 %v8979_v42 }
 0x413   : > { %4316 = vmatmul.mubr.f32.gmra.mrb[60].mxu1 %v7882_v7 }
 0x414   : > { %4320 = vmatprep.mubr.f32.mxu1 %v8225_v24  ;;  %5681 = vmatpush1.bf16.msra.mxu1 %v5680_v27  ;;  %v5695_v27 = vpack.c.bf16 %v3835_v10, %v3834_v29  ;;  %v3844_v29 = vld [vmem:[#allocation9 + $0x3d0] sm:$0xff]  ;;  %v3845_v10 = vld [vmem:[#allocation9 + $0x3d8] sm:$0xff] }
 0x415   : > { %5682 = vmatprep.subr.bf16.mxu1 %v8979_v42 }
 0x417   : > { %4321 = vmatmul.mubr.f32.gmra.mrb[62].mxu1 %v7895_v39 }
 0x418   : > { %4325 = vmatprep.mubr.f32.mxu1 %v8233_v31  ;;  %5684 = vmatpush1.bf16.msra.mxu1 %v5683_v6  ;;  %v5698_v6 = vpack.c.bf16 %v3837_v50, %v3836_v19  ;;  %v3846_v19 = vld [vmem:[#allocation9 + $0x3e0] sm:$0xff]  ;;  %v3847_v50 = vld [vmem:[#allocation9 + $0x3e8] sm:$0xff] }
 0x419   : > { %5685 = vmatprep.subr.bf16.mxu1 %v8979_v42 }
 0x41b   : > { %4326 = vmatmul.mubr.f32.gmra.mrb[64].mxu1 %v7908_v17 }
 0x41c   : > { %4330 = vmatprep.mubr.f32.mxu1 %v8241_v59  ;;  %5687 = vmatpush1.bf16.msra.mxu1 %v5686_v23  ;;  %v5701_v23 = vpack.c.bf16 %v3839_v9, %v3838_v49  ;;  %v3848_v49 = vld [vmem:[#allocation9 + $0x3f0] sm:$0xff]  ;;  %v3849_v9 = vld [vmem:[#allocation9 + $0x3f8] sm:$0xff] }
 0x41d   : > { %5688 = vmatprep.subr.bf16.mxu1 %v8979_v42 }
 0x41f   : > { %4331 = vmatmul.mubr.f32.gmra.mrb[66].mxu1 %v7921_v20 }
 0x420   : > { %4335 = vmatprep.mubr.f32.mxu1 %v8249_v56  ;;  %5690 = vmatpush1.bf16.msra.mxu1 %v5689_v2  ;;  %v5704_v2 = vpack.c.bf16 %v3841_v54, %v3840_v12  ;;  %v3851_v12 = vld [vmem:[#allocation9 + $0x408] sm:$0xff]  ;;  %v5716_v54 = vpack.c.bf16 %v3849_v9, %v3848_v49  ;;  %v3856_v9 = vld [vmem:[#allocation9 + $0x430] sm:$0xff] }
 0x421   : > { %5691 = vmatprep.subr.bf16.mxu1 %v8979_v42 }
 0x423   : > { %4336 = vmatmul.mubr.f32.gmra.mrb[68].mxu1 %v9083_v36 }
 0x424   : > { %4340 = vmatprep.mubr.f32.mxu1 %v8257_v15  ;;  %5693 = vmatpush1.bf16.msra.mxu1 %v5692_v22  ;;  %v5707_v22 = vpack.c.bf16 %v3843_v16, %v3842_v47  ;;  %v3211_v16 = vrot.slane %v8345_v55, 1 }
 0x425   : > { %5694 = vmatprep.subr.bf16.mxu1 %v8979_v42 }
 0x427   : > { %4341 = vmatmul.mubr.f32.gmra.mrb[70].mxu1 %v9084_v53 }
 0x428   : > { %4345 = vmatprep.mubr.f32.mxu1 %v8265_v61  ;;  %5696 = vmatpush1.bf16.msra.mxu1 %v5695_v27  ;;  %v5710_v27 = vpack.c.bf16 %v3845_v10, %v3844_v29  ;;  %v9096_v29 = vrot.slane %v8161_v14, 1  ;;  %v3852_v10 = vld [vmem:[#allocation9 + $0x410] sm:$0xff] }
 0x429   : > { %5697 = vmatprep.subr.bf16.mxu1 %v8979_v42 }
 0x42b   : > { %4346 = vmatmul.mubr.f32.gmra.mrb[72].mxu1 %v9085_v46 }
 0x42c   : > { %4350 = vmatprep.mubr.f32.mxu1 %v8273_v3  ;;  %5699 = vmatpush1.bf16.msra.mxu1 %v5698_v6  ;;  %v5713_v6 = vpack.c.bf16 %v3847_v50, %v3846_v19  ;;  %v3854_v50 = vld [vmem:[#allocation9 + $0x420] sm:$0xff] }
 0x42d   : > { %5700 = vmatprep.subr.bf16.mxu1 %v8979_v42 }
 0x42f   : > { %4351 = vmatmul.mubr.f32.gmra.mrb[74].mxu1 %v9086_v1 }
 0x430   : > { %4355 = vmatprep.mubr.f32.mxu1 %v8281_v5  ;;  %5702 = vmatpush1.bf16.msra.mxu1 %v5701_v23  ;;  %v3850_v23 = vld [vmem:[#allocation9 + $0x400] sm:$0xff] }
 0x431   : > { %5703 = vmatprep.subr.bf16.mxu1 %v8979_v42 }
 0x433   : > { %4356 = vmatmul.mubr.f32.gmra.mrb[76].mxu1 %v7986_v38 }
 0x434   : > { %4360 = vmatprep.mubr.f32.mxu1 %v8289_v34  ;;  %5705 = vmatpush1.bf16.msra.mxu1 %v5704_v2  ;;  %v5718_v2 = vpack.c.bf16 %v3851_v12, %v3850_v23  ;;  %v3857_v23 = vld [vmem:[#allocation9 + $0x438] sm:$0xff] }
 0x435   : > { %5706 = vmatprep.subr.bf16.mxu1 %v8979_v42  ;;  %v5730_v12 = vpack.c.bf16 %v3857_v23, %v3856_v9 }
 0x437   : > { %4361 = vmatmul.mubr.f32.gmra.mrb[78].mxu1 %v7999_v33 }
 0x438   : > { %4365 = vmatprep.mubr.f32.mxu1 %v8301_v48  ;;  %5708 = vmatpush1.bf16.msra.mxu1 %v5707_v22 }
 0x439   : > { %5709 = vmatprep.subr.bf16.mxu1 %v8979_v42 }
 0x43b   : > { %4366 = vmatmul.mubr.f32.gmra.mrb[80].mxu1 %v8012_v45 }
 0x43c   : > { %4370 = vmatprep.mubr.f32.mxu1 %v8312_v21  ;;  %5711 = vmatpush1.bf16.msra.mxu1 %v5710_v27  ;;  %v3853_v27 = vld [vmem:[#allocation9 + $0x418] sm:$0xff] }
 0x43d   : > { %5712 = vmatprep.subr.bf16.mxu1 %v8979_v42  ;;  %v5722_v19 = vpack.c.bf16 %v3853_v27, %v3852_v10  ;;  %v9101_v10 = vld [vmem:[#allocation41_spill] sm:$0xff] }
 0x43e   : > { %v9104_v27 = vld [vmem:[#allocation73_spill] sm:$0xff] }
 0x43f   : > { %4371 = vmatmul.mubr.f32.gmra.mrb[82].mxu1 %v9087_v11 }
 0x440   : > { %4375 = vmatprep.mubr.f32.mxu1 %v8320_v43  ;;  %5714 = vmatpush1.bf16.msra.mxu1 %v5713_v6  ;;  %v3855_v6 = vld [vmem:[#allocation9 + $0x428] sm:$0xff] }
 0x441   : > { %5715 = vmatprep.subr.bf16.mxu1 %v8979_v42  ;;  %v3210_v42 = vrot.slane %v8334_v51, 1  ;;  %v5726_v49 = vpack.c.bf16 %v3855_v6, %v3854_v50  ;;  %v9116_v50 = vld [vmem:[#allocation34_spill] sm:$0xff] }
 0x443   : > { %4376 = vmatmul.mubr.f32.gmra.mrb[84].mxu1 %v9088_v37  ;;  %v8450_v47 = vsel %vm646_vm1, %v3209_v58, %v3210_v42  ;;  %v8457_v22 = vsel %vm646_vm1, %v3210_v42, %v3211_v16  ;;  %v8465_v58 = vsel %vm646_vm1, %v3211_v16, %v9096_v29  ;;  %v3863_v42 = vld [vmem:[#allocation9 + $0x468] sm:$0xff]  ;;  %v3865_v16 = vld [vmem:[#allocation9 + $0x478] sm:$0xff]  ;;  %v9097_v29 = vld [vmem:[#allocation62_spill] sm:$0xff] }
 0x444   : > { %4380 = vmatprep.mubr.f32.mxu1 %v8330_v52  ;;  %5717 = vmatpush1.bf16.msra.mxu1 %v5716_v54  ;;  %v3859_v54 = vld [vmem:[#allocation9 + $0x448] sm:$0xff] }
 0x445   : > { %5719 = vmatprep.subr.bf16.mxu1 %v5718_v2 }
 0x447   : > { %4381 = vmatmul.mubr.f32.gmra.mrb[86].mxu1 %v9089_v18 }
 0x448   : > { %4385 = vmatprep.mubr.f32.mxu1 %v8341_v63 }
 0x44b   : > { %4386 = vmatmul.mubr.f32.gmra.mrb[88].mxu1 %v9090_v60 }
 0x44c   : > { %4390 = vmatprep.mubr.f32.mxu1 %v8358_v62 }
 0x44f   : > { %4391 = vmatmul.mubr.f32.gmra.mrb[90].mxu1 %v8073_v40 }
 0x450   : > { %4395 = vmatprep.mubr.f32.mxu1 %v8370_v25 }
 0x453   : > { %4396 = vmatmul.mubr.f32.gmra.mrb[92].mxu1 %v9091_v26 }
 0x454   : > { %4400 = vmatprep.mubr.f32.mxu1 %v8385_v0 }
 0x457   : > { %4401 = vmatmul.mubr.f32.gmra.mrb[94].mxu1 %v8099_v4 }
 0x458   : > { %4405 = vmatprep.mubr.f32.mxu1 %v8450_v47 }
 0x45b   : > { %4406 = vmatmul.mubr.f32.gmra.mrb[96].mxu1 %v8324_v35 }
 0x45c   : > { %4410 = vmatprep.mubr.f32.mxu1 %v8457_v22 }
 0x45f   : > { %4411 = vmatmul.mubr.f32.gmra.mrb[98].mxu1 %v8334_v51 }
 0x460   : > { %4415 = vmatprep.mubr.f32.mxu1 %v8465_v58 }
 0x463   : > { %4416 = vmatmul.mubr.f32.gmra.mrb[100].mxu1 %v8345_v55 }
 0x464   : > { %4485 = vmatprep.mubr.f32.mxu1 %v7882_v7  ;;  %v3858_v7 = vld [vmem:[#allocation9 + $0x440] sm:$0xff] }
 0x467   : > { %4486 = vmatmul.mubr.f32.vlgmr.msra.gmra.mrb[54].mxu1 %v7901_v28  ;;  %v3860_v28 = vld [vmem:[#allocation9 + $0x450] sm:$0xff] }
 0x468   : > { %4490 = vmatprep.mubr.f32.mxu1 %v7895_v39  ;;  %5721 = vmatpush3.bf16.msra.mxu1 %v5718_v2  ;;  %v5734_v39 = vpack.c.bf16 %v3859_v54, %v3858_v7  ;;  %v3861_v2 = vld [vmem:[#allocation9 + $0x458] sm:$0xff] }
 0x469   : > { %5723 = vmatprep.subr.bf16.mxu1 %v5722_v19 }
 0x46b   : > { %4491 = vmatmul.mubr.f32.gmra.mrb[56].mxu1 %v7914_v44  ;;  %v3862_v44 = vld [vmem:[#allocation9 + $0x460] sm:$0xff] }
 0x46c   : > { %4495 = vmatprep.mubr.f32.mxu1 %v7908_v17  ;;  %5725 = vmatpush3.bf16.msra.mxu1 %v5722_v19  ;;  %v5738_v17 = vpack.c.bf16 %v3861_v2, %v3860_v28  ;;  %v9115_v19 = vld [vmem:[#allocation32_spill] sm:$0xff] }
 0x46d   : > { %5727 = vmatprep.subr.bf16.mxu1 %v5726_v49 }
 0x46f   : > { %4496 = vmatmul.mubr.f32.gmra.mrb[58].mxu1 %v7927_v41  ;;  %v3864_v41 = vld [vmem:[#allocation9 + $0x470] sm:$0xff] }
 0x470   : > { %4500 = vmatprep.mubr.f32.mxu1 %v7921_v20  ;;  %5729 = vmatpush3.bf16.msra.mxu1 %v5726_v49  ;;  %v5742_v20 = vpack.c.bf16 %v3863_v42, %v3862_v44 }
 0x471   : > { %5731 = vmatprep.subr.bf16.mxu1 %v5730_v12 }
 0x473   : > { %4501 = vmatmul.mubr.f32.gmra.mrb[60].mxu1 %v7940_v13  ;;  %v5746_v13 = vpack.c.bf16 %v3865_v16, %v3864_v41 }
 0x474   : > { %4505 = vmatprep.mubr.f32.mxu1 %v9083_v36  ;;  %5733 = vmatpush3.bf16.msra.mxu1 %v5730_v12  ;;  %v9098_v36 = vld [vmem:[#allocation68_spill] sm:$0xff] }
 0x475   : > { %5735 = vmatprep.subr.bf16.mxu1 %v5734_v39 }
 0x477   : > { %4506 = vmatmul.mubr.f32.gmra.mrb[62].mxu1 %v7953_v30  ;;  %v9099_v30 = vld [vmem:[#allocation20_spill] sm:$0xff] }
 0x478   : > { %4510 = vmatprep.mubr.f32.mxu1 %v9084_v53  ;;  %5737 = vmatpush3.bf16.msra.mxu1 %v5734_v39  ;;  %v9100_v53 = vld [vmem:[#allocation44_spill] sm:$0xff] }
 0x479   : > { %5739 = vmatprep.subr.bf16.mxu1 %v5738_v17 }
 0x47b   : > { %4511 = vmatmul.mubr.f32.gmra.mrb[64].mxu1 %v9097_v29 }
 0x47c   : > { %4515 = vmatprep.mubr.f32.mxu1 %v9085_v46  ;;  %5741 = vmatpush3.bf16.msra.mxu1 %v5738_v17  ;;  %v9102_v46 = vld [vmem:[#allocation48_spill] sm:$0xff] }
 0x47d   : > { %5743 = vmatprep.subr.bf16.mxu1 %v5742_v20 }
 0x47f   : > { %4516 = vmatmul.mubr.f32.gmra.mrb[66].mxu1 %v9098_v36 }
 0x480   : > { %4520 = vmatprep.mubr.f32.mxu1 %v9086_v1  ;;  %5745 = vmatpush3.bf16.msra.mxu1 %v5742_v20  ;;  %v9103_v1 = vld [vmem:[#allocation52_spill] sm:$0xff] }
 0x481   : > { %5747 = vmatprep.subr.bf16.mxu1 %v5746_v13 }
 0x483   : > { %4521 = vmatmul.mubr.f32.gmra.mrb[68].mxu1 %v9099_v30 }
 0x484   : > { %4525 = vmatprep.mubr.f32.mxu1 %v7986_v38  ;;  %5749 = vmatpush3.bf16.msra.mxu1 %v5746_v13  ;;  %v9105_v38 = vld [vmem:[#allocation74_spill] sm:$0xff] }
 0x487   : > { %4526 = vmatmul.mubr.f32.gmra.mrb[70].mxu1 %v9100_v53 }
 0x488   : > { %4530 = vmatprep.mubr.f32.mxu1 %v7999_v33  ;;  %v9106_v33 = vld [vmem:[#allocation60_spill] sm:$0xff] }
 0x48b   : > { %4531 = vmatmul.mubr.f32.gmra.mrb[72].mxu1 %v9101_v10 }
 0x48c   : > { %4535 = vmatprep.mubr.f32.mxu1 %v8012_v45  ;;  %v9107_v45 = vld [vmem:[#allocation29_spill] sm:$0xff] }
 0x48f   : > { %4536 = vmatmul.mubr.f32.gmra.mrb[74].mxu1 %v9102_v46 }
 0x490   : > { %4540 = vmatprep.mubr.f32.mxu1 %v9087_v11  ;;  %v9108_v11 = vld [vmem:[#allocation30_spill] sm:$0xff] }
 0x493   : > { %4541 = vmatmul.mubr.f32.gmra.mrb[76].mxu1 %v9103_v1 }
 0x494   : > { %4545 = vmatprep.mubr.f32.mxu1 %v9088_v37  ;;  %v9110_v37 = vld [vmem:[#allocation38_spill] sm:$0xff] }
 0x497   : > { %4546 = vmatmul.mubr.f32.gmra.mrb[78].mxu1 %v9104_v27 }
 0x498   : > { %4550 = vmatprep.mubr.f32.mxu1 %v9089_v18  ;;  %v9109_v18 = vld [vmem:[#allocation37_spill] sm:$0xff] }
 0x49b   : > { %4551 = vmatmul.mubr.f32.gmra.mrb[80].mxu1 %v9105_v38 }
 0x49c   : > { %4555 = vmatprep.mubr.f32.mxu1 %v9090_v60 }
 0x49f   : > { %4556 = vmatmul.mubr.f32.gmra.mrb[82].mxu1 %v9106_v33 }
 0x4a0   : > { %4560 = vmatprep.mubr.f32.mxu1 %v8073_v40  ;;  %v3068_v40 = vrot.slane %v8161_v14, 7 }
 0x4a3   : > { %4561 = vmatmul.mubr.f32.gmra.mrb[84].mxu1 %v8091_v32  ;;  %v9111_v32 = vld [vmem:[#allocation39_spill] sm:$0xff] }
 0x4a4   : > { %4565 = vmatprep.mubr.f32.mxu1 %v9091_v26 }
 0x4a7   : > { %4566 = vmatmul.mubr.f32.gmra.mrb[86].mxu1 %v9107_v45 }
 0x4a8   : > { %4570 = vmatprep.mubr.f32.mxu1 %v8099_v4  ;;  %v9112_v4 = vrot.slane %v8345_v55, 7 }
 0x4aa   : > { %v3079_v60 = vsel %vm501_vm0, %v9112_v4, %v3068_v40 }
 0x4ab   : > { %4571 = vmatmul.mubr.f32.gmra.mrb[88].mxu1 %v9108_v11  ;;  %v8589_v11 = vld [vmem:[%s8758_s6] ss:$0 sm:$0xff] }
 0x4ac   : > { %4575 = vmatprep.mubr.f32.mxu1 %v8324_v35  ;;  %v9113_v35 = vld [vmem:[#allocation31_spill] sm:$0xff] }
 0x4af   : > { %4576 = vmatmul.mubr.f32.gmra.mrb[90].mxu1 %v9109_v18 }
 0x4b0   : > { %4580 = vmatprep.mubr.f32.mxu1 %v8334_v51  ;;  %v9114_v51 = vrot.slane %v9113_v35, 7 }
 0x4b2   : > { %v3078_v26 = vsel %vm501_vm0, %v3068_v40, %v9114_v51  ;;  %v8595_v40 = vld [vmem:[%s9120_s15] ss:$0 sm:$0xff] }
 0x4b3   : > { %4581 = vmatmul.mubr.f32.gmra.mrb[92].mxu1 %v9110_v37 }
 0x4b4   : > { %4585 = vmatprep.mubr.f32.mxu1 %v8345_v55 }
 0x4b7   : > { %4586 = vmatmul.mubr.f32.gmra.mrb[94].mxu1 %v9111_v32 }
 0x4b8   : > { %4590 = vmatprep.mubr.f32.mxu1 %v8161_v14  ;;  %v9118_v14 = vld [vmem:[#allocation35_spill] sm:$0xff] }
 0x4bb   : > { %4591 = vmatmul.mubr.f32.gmra.mrb[96].mxu1 %v3079_v60 }
 0x4bc   : > { %4595 = vmatprep.mubr.f32.mxu1 %v9113_v35 }
 0x4bf   : > { %4596 = vmatmul.mubr.f32.gmra.mrb[98].mxu1 %v3078_v26 }
 0x4c0   : > { %4600 = vmatprep.mubr.f32.mxu1 %v9115_v19 }
 0x4c3   : > { %4601 = vmatmul.mubr.f32.gmra.mrb[100].mxu1 %v9116_v50 }
 0x4c4   : > { %5266 = vmatprep.mubr.f32.mxu1 %v8213_v8  ;;  %v9119_v8 = vld [vmem:[#allocation36_spill] sm:$0xff] }
 0x4c7   : > { %5267 = vmatmul.mubr.f32.vlgmr.msra.gmra.mrb[102].mxu1 %v8225_v24 }
 0x4c8   : > { %5269 = vmatprep.mubr.f32.mxu1 %v8233_v31 }
 0x4cb   : > { %5270 = vmatmul.mubr.f32.gmra.mrb[104].mxu1 %v8241_v59 }
 0x4cc   : > { %5272 = vmatprep.mubr.f32.mxu1 %v8249_v56 }
 0x4cf   : > { %5273 = vmatmul.mubr.f32.gmra.mrb[106].mxu1 %v8257_v15 }
 0x4d0   : > { %5275 = vmatprep.mubr.f32.mxu1 %v8265_v61 }
 0x4d3   : > { %5276 = vmatmul.mubr.f32.gmra.mrb[108].mxu1 %v8273_v3 }
 0x4d4   : > { %5278 = vmatprep.mubr.f32.mxu1 %v8281_v5 }
 0x4d7   : > { %5279 = vmatmul.mubr.f32.gmra.mrb[110].mxu1 %v8289_v34 }
 0x4d8   : > { %5281 = vmatprep.mubr.f32.mxu1 %v8301_v48 }
 0x4db   : > { %5282 = vmatmul.mubr.f32.gmra.mrb[112].mxu1 %v8312_v21 }
 0x4dc   : > { %5284 = vmatprep.mubr.f32.mxu1 %v8320_v43 }
 0x4df   : > { %5285 = vmatmul.mubr.f32.gmra.mrb[114].mxu1 %v8330_v52 }
 0x4e0   : > { %5287 = vmatprep.mubr.f32.mxu1 %v8341_v63 }
 0x4e3   : > { %5288 = vmatmul.mubr.f32.gmra.mrb[116].mxu1 %v8358_v62 }
 0x4e4   : > { %5290 = vmatprep.mubr.f32.mxu1 %v8370_v25 }
 0x4e7   : > { %5291 = vmatmul.mubr.f32.gmra.mrb[118].mxu1 %v8385_v0 }
 0x4e8   : > { %5293 = vmatprep.mubr.f32.mxu1 %v8450_v47 }
 0x4eb   : > { %5294 = vmatmul.mubr.f32.gmra.mrb[120].mxu1 %v8457_v22 }
 0x4ec   : > { %5296 = vmatprep.mubr.f32.mxu1 %v8465_v58 }
 0x4ef   : > { %5297 = vmatmul.mubr.f32.gmra.mrb[122].mxu1 %v9117_v57 }
 0x4f0   : > { %5299 = vmatprep.mubr.f32.mxu1 %v9118_v14 }
 0x4f3   : > { %5300 = vmatmul.mubr.f32.gmra.mrb[124].mxu1 %v9119_v8 }
 0x53a   : > { %v4487_v24 = vpop.f32.mrb[54].mxu1 }
 0x53b   : > { %v4489_v31 = vpop.f32.mrb[55].mxu1 }
 0x53e   : > { %v4492_v59 = vpop.f32.mrb[56].mxu1 }
 0x53f   : > { %v4494_v56 = vpop.f32.mrb[57].mxu1 }
 0x542   : > { %v4497_v15 = vpop.f32.mrb[58].mxu1 }
 0x543   : > { %v4499_v61 = vpop.f32.mrb[59].mxu1 }
 0x546   : > { %v4502_v3 = vpop.f32.mrb[60].mxu1 }
 0x547   : > { %v4504_v5 = vpop.f32.mrb[61].mxu1 }
 0x54a   : > { %v8548_v34 = vpop.f32.mrb[62].mxu1 }
 0x54b   : > { %v4509_v48 = vpop.f32.mrb[63].mxu1 }
 0x54e   : > { %v4512_v21 = vpop.f32.mrb[64].mxu1 }
 0x54f   : > { %v4514_v43 = vpop.f32.mrb[65].mxu1 }
 0x552   : > { %v8550_v52 = vpop.f32.mrb[66].mxu1 }
 0x553   : > { %v4519_v63 = vpop.f32.mrb[67].mxu1 }
 0x556   : > { %v8552_v55 = vpop.f32.mrb[68].mxu1 }
 0x557   : > { %v4524_v62 = vpop.f32.mrb[69].mxu1 }
 0x55a   : > { %v8554_v25 = vpop.f32.mrb[70].mxu1 }
 0x55b   : > { %v4529_v0 = vpop.f32.mrb[71].mxu1 }
 0x55e   : > { %v8556_v47 = vpop.f32.mrb[72].mxu1 }
 0x55f   : > { %v4534_v22 = vpop.f32.mrb[73].mxu1 }
 0x562   : > { %v8558_v58 = vpop.f32.mrb[74].mxu1 }
 0x563   : > { %v4539_v6 = vpop.f32.mrb[75].mxu1 }
 0x566   : > { %v8560_v49 = vpop.f32.mrb[76].mxu1 }
 0x567   : > { %v4544_v9 = vpop.f32.mrb[77].mxu1 }
 0x56a   : > { %v8562_v23 = vpop.f32.mrb[78].mxu1 }
 0x56b   : > { %v4549_v12 = vpop.f32.mrb[79].mxu1 }
 0x56e   : > { %v8564_v7 = vpop.f32.mrb[80].mxu1 }
 0x56f   : > { %v4554_v54 = vpop.f32.mrb[81].mxu1 }
 0x572   : > { %v8566_v39 = vpop.f32.mrb[82].mxu1 }
 0x573   : > { %v4559_v28 = vpop.f32.mrb[83].mxu1 }
 0x576   : > { %v8568_v2 = vpop.f32.mrb[84].mxu1 }
 0x577   : > { %v4564_v17 = vpop.f32.mrb[85].mxu1 }
 0x57a   : > { %v8570_v44 = vpop.f32.mrb[86].mxu1 }
 0x57b   : > { %v4569_v42 = vpop.f32.mrb[87].mxu1 }
 0x57e   : > { %v8572_v20 = vpop.f32.mrb[88].mxu1 }
 0x57f   : > { %v4574_v41 = vpop.f32.mrb[89].mxu1 }
 0x582   : > { %v8574_v16 = vpop.f32.mrb[90].mxu1 }
 0x583   : > { %v4579_v29 = vpop.f32.mrb[91].mxu1 }
 0x586   : > { %v8576_v13 = vpop.f32.mrb[92].mxu1 }
 0x587   : > { %v4584_v36 = vpop.f32.mrb[93].mxu1 }
 0x58a   : > { %v8578_v30 = vpop.f32.mrb[94].mxu1 }
 0x58b   : > { %v4589_v53 = vpop.f32.mrb[95].mxu1 }
 0x58e   : > { %v8580_v10 = vpop.f32.mrb[96].mxu1 }
 0x58f   : > { %v4594_v46 = vpop.f32.mrb[97].mxu1 }
 0x592   : > { %v8582_v1 = vpop.f32.mrb[98].mxu1 }
 0x593   : > { %v4599_v27 = vpop.f32.mrb[99].mxu1 }
 0x596   : > { %v8584_v38 = vpop.f32.mrb[100].mxu1 }
 0x597   : > { %v4604_v33 = vpop.f32.mrb[101].mxu1 }
 0x59a   : > { %v5268_v45 = vpop.f32.mrb[102].mxu1 }
 0x59b   : > { %v4678_v18 = vadd.f32 %v5268_v45, %v4492_v59  ;;  %v4672_v37 = vpop.f32.mrb[103].mxu1 }
 0x59c   : > { %v4673_v32 = vadd.f32 %v4672_v37, %v4487_v24 }
 0x59d   : > { %v4799_v4 = vmul.f32 %v8589_v11, %v4678_v18 }
 0x59e   : > { %v4798_v60 = vmul.f32 %v8589_v11, %v4673_v32  ;;  %v5271_v35 = vpop.f32.mrb[104].mxu1 }
 0x59f   : > { %v4830_v51 = vadd.f32 %v8595_v40, %v4799_v4  ;;  %v4688_v26 = vadd.f32 %v5271_v35, %v4502_v3  ;;  %v4682_v19 = vpop.f32.mrb[105].mxu1 }
 0x5a0   : > { %v4829_v50 = vadd.f32 %v8595_v40, %v4798_v60  ;;  %v4683_v57 = vadd.f32 %v4682_v19, %v4497_v15 }
 0x5a1   : > { %v4854_v14 = vmax.f32 %v4830_v51, 0.0  ;;  %v4801_v8 = vmul.f32 %v8589_v11, %v4688_v26 }
 0x5a2   : > { %v4853_v31 = vmax.f32 %v4829_v50, 0.0  ;;  %v4800_v59 = vmul.f32 %v8589_v11, %v4683_v57  ;;  %v5274_v56 = vpop.f32.mrb[106].mxu1 }
 0x5a3   : > { %4878 = vst [vmem:[%s8603_s17 + $0x8] sm:$0xff] %v4854_v14  ;;  %v4832_v24 = vadd.f32 %v8595_v40, %v4801_v8  ;;  %v4698_v61 = vadd.f32 %v5274_v56, %v4512_v21  ;;  %v4692_v3 = vpop.f32.mrb[107].mxu1 }
 0x5a4   : > { %4877 = vst [vmem:[%s8603_s17] sm:$0xff] %v4853_v31  ;;  %v4831_v15 = vadd.f32 %v8595_v40, %v4800_v59  ;;  %v4693_v5 = vadd.f32 %v4692_v3, %v8548_v34 }
 0x5a5   : > { %v4856_v48 = vmax.f32 %v4832_v24, 0.0  ;;  %v4803_v43 = vmul.f32 %v8589_v11, %v4698_v61 }
 0x5a6   : > { %v4855_v63 = vmax.f32 %v4831_v15, 0.0  ;;  %v4802_v62 = vmul.f32 %v8589_v11, %v4693_v5  ;;  %v5277_v0 = vpop.f32.mrb[108].mxu1 }
 0x5a7   : > { %4880 = vst [vmem:[%s8603_s17 + $0x18] sm:$0xff] %v4856_v48  ;;  %v4834_v22 = vadd.f32 %v8595_v40, %v4803_v43  ;;  %v4708_v21 = vadd.f32 %v5277_v0, %v8552_v55  ;;  %v4702_v6 = vpop.f32.mrb[109].mxu1 }
 0x5a8   : > { %4879 = vst [vmem:[%s8603_s17 + $0x10] sm:$0xff] %v4855_v63  ;;  %v4833_v9 = vadd.f32 %v8595_v40, %v4802_v62  ;;  %v4703_v34 = vadd.f32 %v4702_v6, %v8550_v52 }
 0x5a9   : > { %v4858_v12 = vmax.f32 %v4834_v22, 0.0  ;;  %v4805_v54 = vmul.f32 %v8589_v11, %v4708_v21 }
 0x5aa   : > { %v4857_v28 = vmax.f32 %v4833_v9, 0.0  ;;  %v4804_v17 = vmul.f32 %v8589_v11, %v4703_v34  ;;  %v5280_v42 = vpop.f32.mrb[110].mxu1 }
 0x5ab   : > { %4882 = vst [vmem:[%s8603_s17 + $0x28] sm:$0xff] %v4858_v12  ;;  %v4836_v41 = vadd.f32 %v8595_v40, %v4805_v54  ;;  %v4718_v55 = vadd.f32 %v5280_v42, %v8556_v47  ;;  %v4712_v29 = vpop.f32.mrb[111].mxu1 }
 0x5ac   : > { %4881 = vst [vmem:[%s8603_s17 + $0x20] sm:$0xff] %v4857_v28  ;;  %v4835_v36 = vadd.f32 %v8595_v40, %v4804_v17  ;;  %v4713_v52 = vadd.f32 %v4712_v29, %v8554_v25 }
 0x5ad   : > { %v4860_v53 = vmax.f32 %v4836_v41, 0.0  ;;  %v4807_v46 = vmul.f32 %v8589_v11, %v4718_v55 }
 0x5ae   : > { %v4859_v27 = vmax.f32 %v4835_v36, 0.0  ;;  %v4806_v33 = vmul.f32 %v8589_v11, %v4713_v52  ;;  %v5283_v45 = vpop.f32.mrb[112].mxu1 }
 0x5af   : > { %4884 = vst [vmem:[%s8603_s17 + $0x38] sm:$0xff] %v4860_v53  ;;  %v4838_v18 = vadd.f32 %v8595_v40, %v4807_v46  ;;  %v4728_v47 = vadd.f32 %v5283_v45, %v8560_v49  ;;  %v4722_v37 = vpop.f32.mrb[113].mxu1 }
 0x5b0   : > { %4883 = vst [vmem:[%s8603_s17 + $0x30] sm:$0xff] %v4859_v27  ;;  %v4837_v32 = vadd.f32 %v8595_v40, %v4806_v33  ;;  %v4723_v25 = vadd.f32 %v4722_v37, %v8558_v58 }
 0x5b1   : > { %v4862_v4 = vmax.f32 %v4838_v18, 0.0  ;;  %v4809_v60 = vmul.f32 %v8589_v11, %v4728_v47 }
 0x5b2   : > { %v4861_v35 = vmax.f32 %v4837_v32, 0.0  ;;  %v4808_v51 = vmul.f32 %v8589_v11, %v4723_v25  ;;  %v5286_v26 = vpop.f32.mrb[114].mxu1 }
 0x5b3   : > { %4886 = vst [vmem:[%s8603_s17 + $0x48] sm:$0xff] %v4862_v4  ;;  %v4840_v19 = vadd.f32 %v8595_v40, %v4809_v60  ;;  %v4738_v49 = vadd.f32 %v5286_v26, %v8564_v7  ;;  %v4732_v50 = vpop.f32.mrb[115].mxu1 }
 0x5b4   : > { %4885 = vst [vmem:[%s8603_s17 + $0x40] sm:$0xff] %v4861_v35  ;;  %v4839_v57 = vadd.f32 %v8595_v40, %v4808_v51  ;;  %v4733_v58 = vadd.f32 %v4732_v50, %v8562_v23 }
 0x5b5   : > { %v4864_v14 = vmax.f32 %v4840_v19, 0.0  ;;  %v4811_v8 = vmul.f32 %v8589_v11, %v4738_v49 }
 0x5b6   : > { %v4863_v31 = vmax.f32 %v4839_v57, 0.0  ;;  %v4810_v59 = vmul.f32 %v8589_v11, %v4733_v58  ;;  %v5289_v56 = vpop.f32.mrb[116].mxu1 }
 0x5b7   : > { %4888 = vst [vmem:[%s8603_s17 + $0x58] sm:$0xff] %v4864_v14  ;;  %v4842_v24 = vadd.f32 %v8595_v40, %v4811_v8  ;;  %v4748_v7 = vadd.f32 %v5289_v56, %v8568_v2  ;;  %v4742_v61 = vpop.f32.mrb[117].mxu1 }
 0x5b8   : > { %4887 = vst [vmem:[%s8603_s17 + $0x50] sm:$0xff] %v4863_v31  ;;  %v4841_v3 = vadd.f32 %v8595_v40, %v4810_v59  ;;  %v4743_v23 = vadd.f32 %v4742_v61, %v8566_v39 }
 0x5b9   : > { %v4866_v15 = vmax.f32 %v4842_v24, 0.0  ;;  %v4813_v5 = vmul.f32 %v8589_v11, %v4748_v7 }
 0x5ba   : > { %v4865_v48 = vmax.f32 %v4841_v3, 0.0  ;;  %v4812_v43 = vmul.f32 %v8589_v11, %v4743_v23  ;;  %v5292_v63 = vpop.f32.mrb[118].mxu1 }
 0x5bb   : > { %4890 = vst [vmem:[%s8603_s17 + $0x68] sm:$0xff] %v4866_v15  ;;  %v4844_v62 = vadd.f32 %v8595_v40, %v4813_v5  ;;  %v4758_v2 = vadd.f32 %v5292_v63, %v8572_v20  ;;  %v4752_v0 = vpop.f32.mrb[119].mxu1 }
 0x5bc   : > { %4889 = vst [vmem:[%s8603_s17 + $0x60] sm:$0xff] %v4865_v48  ;;  %v4843_v22 = vadd.f32 %v8595_v40, %v4812_v43  ;;  %v4753_v39 = vadd.f32 %v4752_v0, %v8570_v44 }
 0x5bd   : > { %v4868_v21 = vmax.f32 %v4844_v62, 0.0  ;;  %v4815_v6 = vmul.f32 %v8589_v11, %v4758_v2 }
 0x5be   : > { %v4867_v9 = vmax.f32 %v4843_v22, 0.0  ;;  %v4814_v34 = vmul.f32 %v8589_v11, %v4753_v39  ;;  %v5295_v12 = vpop.f32.mrb[120].mxu1 }
 0x5bf   : > { %4892 = vst [vmem:[%s8603_s17 + $0x78] sm:$0xff] %v4868_v21  ;;  %v4846_v54 = vadd.f32 %v8595_v40, %v4815_v6  ;;  %v4768_v20 = vadd.f32 %v5295_v12, %v8576_v13  ;;  %v4762_v28 = vpop.f32.mrb[121].mxu1 }
 0x5c0   : > { %4891 = vst [vmem:[%s8603_s17 + $0x70] sm:$0xff] %v4867_v9  ;;  %v4845_v44 = vadd.f32 %v8595_v40, %v4814_v34  ;;  %v4763_v17 = vadd.f32 %v4762_v28, %v8574_v16 }
 0x5c1   : > { %v4870_v42 = vmax.f32 %v4846_v54, 0.0  ;;  %v4817_v41 = vmul.f32 %v8589_v11, %v4768_v20 }
 0x5c2   : > { %v4869_v55 = vmax.f32 %v4845_v44, 0.0  ;;  %v4816_v29 = vmul.f32 %v8589_v11, %v4763_v17  ;;  %v5298_v36 = vpop.f32.mrb[122].mxu1 }
 0x5c3   : > { %4894 = vst [vmem:[%s8603_s17 + $0x88] sm:$0xff] %v4870_v42  ;;  %v4848_v52 = vadd.f32 %v8595_v40, %v4817_v41  ;;  %v4778_v13 = vadd.f32 %v5298_v36, %v8580_v10  ;;  %v4772_v53 = vpop.f32.mrb[123].mxu1 }
 0x5c4   : > { %4893 = vst [vmem:[%s8603_s17 + $0x80] sm:$0xff] %v4869_v55  ;;  %v4847_v16 = vadd.f32 %v8595_v40, %v4816_v29  ;;  %v4773_v46 = vadd.f32 %v4772_v53, %v8578_v30 }
 0x5c5   : > { %v4872_v27 = vmax.f32 %v4848_v52, 0.0  ;;  %v4819_v33 = vmul.f32 %v8589_v11, %v4778_v13 }
 0x5c6   : > { %v4871_v45 = vmax.f32 %v4847_v16, 0.0  ;;  %v4818_v18 = vmul.f32 %v8589_v11, %v4773_v46  ;;  %v5301_v47 = vpop.f32.mrb[124].mxu1 }
 0x5c7   : > { %4896 = vst [vmem:[%s8603_s17 + $0x98] sm:$0xff] %v4872_v27  ;;  %v4850_v10 = vadd.f32 %v8595_v40, %v4819_v33  ;;  %v4788_v37 = vadd.f32 %v5301_v47, %v8584_v38  ;;  %v4782_v32 = vpop.f32.mrb[125].mxu1 }
 0x5c8   : > { %4895 = vst [vmem:[%s8603_s17 + $0x90] sm:$0xff] %v4871_v45  ;;  %v4849_v30 = vadd.f32 %v8595_v40, %v4818_v18  ;;  %v4783_v25 = vadd.f32 %v4782_v32, %v8582_v1 }
 0x5c9   : > { %v4874_v4 = vmax.f32 %v4850_v10, 0.0  ;;  %v4821_v60 = vmul.f32 %v8589_v11, %v4788_v37 }
 0x5ca   : > { %v4873_v35 = vmax.f32 %v4849_v30, 0.0  ;;  %v4820_v51 = vmul.f32 %v8589_v11, %v4783_v25 }
 0x5cb   : > { %4898 = vst [vmem:[%s8603_s17 + $0xa8] sm:$0xff] %v4874_v4  ;;  %v4852_v38 = vadd.f32 %v8595_v40, %v4821_v60 }
 0x5cc   : > { %4897 = vst [vmem:[%s8603_s17 + $0xa0] sm:$0xff] %v4873_v35  ;;  %v4851_v26 = vadd.f32 %v8595_v40, %v4820_v51 }
 0x5cd   : > { %v4876_v19 = vmax.f32 %v4852_v38, 0.0 }
 0x5ce   : > { %v4875_v1 = vmax.f32 %v4851_v26, 0.0 }
 0x5cf   : > { %4900 = vst [vmem:[%s8603_s17 + $0xb8] sm:$0xff] %v4876_v19 }
 0x5d0   : > { %4899 = vst [vmem:[%s8603_s17 + $0xb0] sm:$0xff] %v4875_v1 }
 0x5d1   : > { %6363 = shalt.err (!%p6360_p12)
}
 0x5d2   : > { %s6364_s27 = scalar_lea.hbm %s8694_s20, 3072  ;;  %s6368_s17 = scalar_lea.hbm %s9122_s14, 12288 }
 0x5d3   : > { %p6365_p1 = scmp.ne.s32.totalorder %s8694_s20, %s6364_s27  ;;  %p6369_p9 = scmp.lt.u32.totalorder %s8694_s20, %s9122_s14 }
 0x5d4   : > { %p6370_p0 = scmp.lt.u32.totalorder %s6368_s17, %s6364_s27  ;;  %p6372_p10 = scmp.lt.u32.totalorder %s6364_s27, %s8694_s20 }
 0x5d5   : > { %p6366_p2 = pnand %p6365_p1, %p6657_p8 }
 0x5d6   : > { %p6371_p4 = por %p6370_p0, %p6369_p9 }
 0x5d7   : > { %p6367_p5 = pneg %p6366_p2 }
 0x5d8   : > { %p6373_p6 = por %p6372_p10, %p6371_p4 }
 0x5da   : > { %p6374_p11 = pnand %p6373_p6, %p6367_p5 }
 0x5dc   : > { %6377 = shalt.err (!%p6374_p11)
}
 0x5dd   : > { %s6462_s16 = smov 128   ;;  %s6463_s30 = smov 8  }
 0x5de   : > { %6129 = dma.vmem_to_hbm [thread:$0]  (%p6657_p8), %s8696_s25, 3072, %s8694_s20, %s4902_s23, %s6462_s16, %s6462_s16, %s6463_s30  }
 0x5df PF: > { %s9123_s18 = sld [smem:[#allocation14_spill]]  ;;  %s9124_s9 = sld [smem:[#allocation17_spill]] }
 0x5e0   : > { %p6151_p13 = scmp.ge.s32.totalorder %s6452_s12, 2 }
 0x5e5   : > { %s4932_s22 = sand.u32 1, %s9123_s18   ;;  %p9125_p3 = scmp.ne.s32.totalorder %s9124_s9, 0 }
 0x5e6   : > { %s4933_s21 = scalar_lea.sflag [#allocation6], %s4932_s22 }
 0x5e7   : > { %p6143_p7 = pnand %p6151_p13, %p9125_p3 }
 0x5e9   : > { %6419 = dma.done.wait (!%p6143_p7), %s4933_s21, 3072  }
 0x5ea   : > { %6421 = vsyncadd (!%p6143_p7), %s4933_s21, 4294964224  ;;  %s25_s12 = sadd.s32 1, %s6452_s12   ;;  %s9126_s30 = sld [smem:[#allocation16_spill]] }
 0x5eb   : > { %p22_p12 = scmp.ge.s32.totalorder %s25_s12, 6   ;;  %s9127_s10 = sld [smem:[#allocation18_spill]] }
 0x5ec   : > { %s9128_s24 = sld [smem:[#allocation19_spill]]  ;;  %s9129_s27 = smov %s6428_s28 }
 0x5ed   : > { %s9130_s28 = smov %s6432_s29  ;;  %s9131_s29 = smov %s6676_s2 }
 0x5ee   : > { %s9132_s9 = smov %s6448_s11  ;;  %24 = sbr.rel (!%p22_p12) target bundleno = 13 (0xd), region = 108 }
 0x5f2   : > { %s9133_s11 = smov %s9128_s24 }
 0x5f5   :  { %4938 = vsyncpa [#allocation5], 1 }
 0x5f6   :  { %4940 = vsyncpa [#allocation5 + $0x1], 1 }
 0x5f7   :  { %4941 = vsyncpa [#allocation8], 1 }
 0x5f8   :  { %4942 = vsyncpa [#allocation6], 1 }
 0x5f9   :  { %4944 = vsyncpa [#allocation6 + $0x1], 1 }

</bundles_post_ra>
